<compile_context>
chip_gen: v7x
topology: tpu7x:2x2x1
jax: 0.10.0
libtpu: 0.0.40
codegen_flags: <defaults>
</compile_context>

<pallas_src>
import jax
import jax.numpy as jnp
from jax import lax
from jax.experimental import pallas as pl
from jax.experimental.pallas import tpu as pltpu

# ---------------- static config ----------------
D_IN     = 8
NUM_FEAT = 3
CLASSES  = (2, 2)            # NUM_FEAT + sum(CLASSES) + 1 == D_IN
TASK     = "classification"  # != 'regression' -> batch softmax on last column
DIM_T    = 64                # d_model   (module default 2048, scaled down)
DIM_FF   = 128               # FFN width (module default 2048, scaled down)
N_LAYER  = 2
BATCH    = 256               # total rows
EPS_LN   = 1e-5
VMEM_LIMIT = 32 * 1024 * 1024  # plenty at this tiling; raise at production sizes

# packed per-layer small-parameter slab (one vreg per layer)
ROW_B_ATTN, ROW_LN1G, ROW_LN1B, ROW_BF1, ROW_BF2, ROW_LN2G, ROW_LN2B = range(7)
N_SMALL = 7
PACK_W  = max(DIM_T, DIM_FF)   # 128 -> lane-dense slab


def _pick_batch_tile(batch):
    """v7x (2 TensorCores): 128-row tiles on the 'parallel' axis; v5e/v6e: one tile."""
    kind = ""
    try:
        kind = jax.devices()[0].device_kind.lower()
    except Exception:
        pass
    tile = 128 if "7" in kind else 256
    tile = min(tile, batch)
    while tile > 8 and batch % tile:
        tile //= 2
    assert batch % tile == 0 and tile % 8 == 0, "batch must be a multiple of an 8-aligned tile"
    return tile


def _layernorm(h, g, b):
    mu = jnp.mean(h, axis=-1, keepdims=True)
    var = jnp.mean((h - mu) ** 2, axis=-1, keepdims=True)
    return (h - mu) * lax.rsqrt(var + EPS_LN) * g + b


def tabformer_kernel(x_ref, t_ref,
                     ipW_ref, ipb_ref, teW1_ref, teb1_ref, teW2_ref, teb2_ref,
                     opW_ref, opb_ref,
                     Wattn_ref, Wf1_ref, Wf2_ref, small_ref,
                     out_ref, h_ref):
    """One (batch_tile, layer) grid step of the Tabformer forward pass."""
    f32, bf16 = jnp.float32, jnp.bfloat16
    l = pl.program_id(1)
    n_layer = pl.num_programs(1)

    # ---- layer 0 only: input/time embeddings -> h scratch ---------------------
    @pl.when(l == 0)
    def _init():
        x = x_ref[...].astype(bf16)                                    # [TB, d_in]
        emb = jnp.dot(x, ipW_ref[...], preferred_element_type=f32) + ipb_ref[...]
        t = t_ref[...].astype(f32)                                     # [TB, 1]
        h1 = t * teW1_ref[...] + teb1_ref[...]                         # Linear(1, D)
        h1 = h1 * jax.nn.sigmoid(h1)                                   # SiLU
        t_emb = (jnp.dot(h1.astype(bf16), teW2_ref[...],
                         preferred_element_type=f32) + teb2_ref[...])
        h_ref[...] = emb + t_emb          # seq_len == 1 -> seq axis stays squeezed

    # ---- per-layer packed small params (one vreg) ------------------------------
    small = small_ref[...]                                             # [7, PACK_W] f32
    b_attn = small[ROW_B_ATTN:ROW_B_ATTN + 1, :DIM_T]
    ln1g   = small[ROW_LN1G:ROW_LN1G + 1, :DIM_T]
    ln1b   = small[ROW_LN1B:ROW_LN1B + 1, :DIM_T]
    b_f1   = small[ROW_BF1:ROW_BF1 + 1, :DIM_FF]
    b_f2   = small[ROW_BF2:ROW_BF2 + 1, :DIM_T]
    ln2g   = small[ROW_LN2G:ROW_LN2G + 1, :DIM_T]
    ln2b   = small[ROW_LN2B:ROW_LN2B + 1, :DIM_T]

    # ---- encoder layer l (post-LN, ReLU FFN) -----------------------------------
    # TODO(synk): dropout is eval-mode identity; training-mode dropout not implemented.
    # seq_len == 1 => MHA reduces exactly to one fused linear: h @ (Wv Wo) + (bv Wo + bo).
    h = h_ref[...]
    attn = jnp.dot(h.astype(bf16), Wattn_ref[...], preferred_element_type=f32) + b_attn
    h = _layernorm(h + attn, ln1g, ln1b)

    ff = jnp.dot(h.astype(bf16), Wf1_ref[...], preferred_element_type=f32) + b_f1
    ff = jnp.maximum(ff, 0.0)                                          # ReLU
    ff = jnp.dot(ff.astype(bf16), Wf2_ref[...], preferred_element_type=f32) + b_f2
    h = _layernorm(h + ff, ln2g, ln2b)
    h_ref[...] = h

    # ---- last layer only: out_proj + per-row post-processing -------------------
    @pl.when(l == n_layer - 1)
    def _finalize():
        logits = (jnp.dot(h.astype(bf16), opW_ref[...],
                          preferred_element_type=f32) + opb_ref[...])  # [TB, d_in]
        tb = logits.shape[0]
        col = lax.broadcasted_iota(jnp.int32, (tb, D_IN), 1)

        # numerical features copied straight through
        res = jnp.where(col < NUM_FEAT, logits, jnp.zeros_like(logits))

        # categorical blocks: exp(log_softmax(., dim=1)) == per-block row softmax.
        # d_in <= 128 -> a single lane-vreg; masked reductions are already minimal.
        cum = NUM_FEAT
        for val in CLASSES:
            m = (col >= cum) & (col < cum + val)
            mx = jnp.max(jnp.where(m, logits, -jnp.inf), axis=1, keepdims=True)
            e = jnp.where(m, jnp.exp(logits - mx), 0.0)
            s = jnp.sum(e, axis=1, keepdims=True)
            res = jnp.where(m, e / s, res)
            cum += val

        # last column: raw logit here.  For classification the batch-axis softmax
        # is a GLOBAL reduction across all batch tiles -> done in the JAX wrapper.
        res = jnp.where(col == (D_IN - 1), logits, res)
        out_ref[...] = res


# ---------------- parameter init (deterministic, PyTorch-Linear-style) --------
def _dense(key, fan_in, fan_out):
    kw, kb = jax.random.split(key)
    bound = 1.0 / (fan_in ** 0.5)
    W = jax.random.uniform(kw, (fan_in, fan_out), jnp.float32, -bound, bound)
    b = jax.random.uniform(kb, (1, fan_out), jnp.float32, -bound, bound)
    return W, b


def _pack_small(rows, width):
    padded = [jnp.pad(r, ((0, 0), (0, width - r.shape[1]))) for r in rows]
    return jnp.concatenate(padded, axis=0)            # (len(rows), width) f32


def init_params(key):
    bf16 = jnp.bfloat16
    keys = jax.random.split(key, 4 + 4 * N_LAYER)
    ipW, ipb = _dense(keys[0], D_IN, DIM_T)
    teW1, teb1 = _dense(keys[1], 1, DIM_T)             # used elementwise -> f32
    teW2, teb2 = _dense(keys[2], DIM_T, DIM_T)
    opW, opb = _dense(keys[3], DIM_T, D_IN)

    Wattn, Wf1, Wf2, small = [], [], [], []
    for l in range(N_LAYER):
        k = keys[4 + 4 * l: 4 + 4 * (l + 1)]
        Wv, bv = _dense(k[0], DIM_T, DIM_T)            # MHA value proj
        Wo, bo = _dense(k[1], DIM_T, DIM_T)            # MHA output proj
        w1, b1 = _dense(k[2], DIM_T, DIM_FF)           # FFN linear1
        w2, b2 = _dense(k[3], DIM_FF, DIM_T)           # FFN linear2
        # exact algebraic fusion of value + output projections (seq_len == 1)
        W_a = jnp.dot(Wv, Wo)                          # f32 accumulate
        b_a = jnp.dot(bv, Wo) + bo                     # (1, DIM_T) f32
        ln1g = jnp.ones((1, DIM_T), jnp.float32); ln1b = jnp.zeros((1, DIM_T), jnp.float32)
        ln2g = jnp.ones((1, DIM_T), jnp.float32); ln2b = jnp.zeros((1, DIM_T), jnp.float32)
        Wattn.append(W_a.astype(bf16))
        Wf1.append(w1.astype(bf16))
        Wf2.append(w2.astype(bf16))
        small.append(_pack_small([b_a, ln1g, ln1b, b1, b2, ln2g, ln2b], PACK_W))

    stack = lambda xs: jnp.stack(xs, axis=0)
    return (ipW.astype(bf16), ipb, teW1, teb1, teW2.astype(bf16), teb2,
            opW.astype(bf16), opb,
            stack(Wattn), stack(Wf1), stack(Wf2), stack(small))


# ---------------- wrappers ----------------
def _main_call(x, t, params):
    B = x.shape[0]
    batch_tile = _pick_batch_tile(B)
    grid = (B // batch_tile, N_LAYER)

    row  = lambda b, l: (b, 0)      # batch-tiled activations / outputs
    rep  = lambda b, l: (0, 0)      # shared 2-D weights, resident across the grid
    perl = lambda b, l: (l, 0, 0)   # per-layer stacked weights, streamed over l

    in_specs = [
        pl.BlockSpec((batch_tile, D_IN), row),            # x
        pl.BlockSpec((batch_tile, 1), row),               # t
        pl.BlockSpec((D_IN, DIM_T), rep),                 # ipW
        pl.BlockSpec((1, DIM_T), rep),                    # ipb
        pl.BlockSpec((1, DIM_T), rep),                    # teW1
        pl.BlockSpec((1, DIM_T), rep),                    # teb1
        pl.BlockSpec((DIM_T, DIM_T), rep),                # teW2
        pl.BlockSpec((1, DIM_T), rep),                    # teb2
        pl.BlockSpec((DIM_T, D_IN), rep),                 # opW
        pl.BlockSpec((1, D_IN), rep),                     # opb
        pl.BlockSpec((None, DIM_T, DIM_T), perl),         # fused W_attn
        pl.BlockSpec((None, DIM_T, DIM_FF), perl),        # Wf1
        pl.BlockSpec((None, DIM_FF, DIM_T), perl),        # Wf2
        pl.BlockSpec((None, N_SMALL, PACK_W), perl),      # packed small params
    ]
    out_specs = pl.BlockSpec((batch_tile, D_IN), row)     # post-processed result

    return pl.pallas_call(
        tabformer_kernel,
        out_shape=jax.ShapeDtypeStruct((B, D_IN), jnp.float32),
        grid_spec=pltpu.PrefetchScalarGridSpec(
            num_scalar_prefetch=0,
            grid=grid,
            in_specs=in_specs,
            out_specs=out_specs,
            scratch_shapes=[pltpu.VMEM((batch_tile, DIM_T), jnp.float32)]),
        compiler_params=pltpu.CompilerParams(
            dimension_semantics=("parallel", "arbitrary"),
            vmem_limit_bytes=VMEM_LIMIT),
    )(x, t, *params)


@jax.jit
def tabformer_forward(x, t, params):
    res = _main_call(x, t, params)
    if TASK == "regression":
        return res
    # exp(log_softmax(logits[:, -1], dim=0)): global softmax over the batch axis.
    # Plain JAX (O(B), trivially fused by XLA) instead of a second kernel launch.
    p = jax.nn.softmax(res[:, -1], axis=0)
    return res.at[:, -1].set(p)


if __name__ == "__main__":
    key = jax.random.PRNGKey(0)
    kx, kt, kp = jax.random.split(key, 3)
    x = jax.random.normal(kx, (BATCH, D_IN), jnp.float32)
    t = jax.random.uniform(kt, (BATCH, 1), jnp.float32)
    params = init_params(kp)

    res = jax.block_until_ready(tabformer_forward(x, t, params))

    # sanity: shape/finiteness, categorical blocks are row-stochastic,
    # last column sums to 1 over the whole batch (classification task).
    assert res.shape == (BATCH, D_IN)
    assert bool(jnp.all(jnp.isfinite(res)))
    cum = NUM_FEAT
    for val in CLASSES:
        if cum + val <= D_IN - 1:   # block not overwritten by the last column
            blk = res[:, cum:cum + val]
            assert bool(jnp.all((blk >= -1e-6) & (blk <= 1.0 + 1e-3)))
            assert bool(jnp.allclose(jnp.sum(blk, axis=1), 1.0, atol=1e-3))
        cum += val
    if TASK != "regression":
        assert bool(jnp.allclose(jnp.sum(res[:, -1]), 1.0, atol=1e-3))

    print("KERNEL_OK")
</pallas_src>

<mosaic_0001>
module attributes {stable_mosaic.version = 11 : i64} {
  func.func @tabformer_kernel(%arg0: i32, %arg1: i32, %arg2: memref<256x8xf32, #tpu.memory_space<vmem>>, %arg3: memref<256x1xf32, #tpu.memory_space<vmem>>, %arg4: memref<8x64xbf16, #tpu.memory_space<vmem>>, %arg5: memref<1x64xf32, #tpu.memory_space<vmem>>, %arg6: memref<1x64xf32, #tpu.memory_space<vmem>>, %arg7: memref<1x64xf32, #tpu.memory_space<vmem>>, %arg8: memref<64x64xbf16, #tpu.memory_space<vmem>>, %arg9: memref<1x64xf32, #tpu.memory_space<vmem>>, %arg10: memref<64x8xbf16, #tpu.memory_space<vmem>>, %arg11: memref<1x8xf32, #tpu.memory_space<vmem>>, %arg12: memref<1x64x64xbf16, #tpu.memory_space<vmem>>, %arg13: memref<1x64x128xbf16, #tpu.memory_space<vmem>>, %arg14: memref<1x128x64xbf16, #tpu.memory_space<vmem>>, %arg15: memref<1x7x128xf32, #tpu.memory_space<vmem>>, %arg16: memref<256x8xf32, #tpu.memory_space<vmem>>, %arg17: memref<256x64xf32, #tpu.memory_space<vmem>>) attributes {dimension_semantics = [#tpu.dimension_semantics<parallel>, #tpu.dimension_semantics<arbitrary>], iteration_bounds = array<i64: 1, 2>, scalar_prefetch = 0 : i64, scratch_operands = 1 : i64, tpu.core_type = #tpu.core_type<tc>, window_params = [{transform_indices = @transform_0, window_bounds = array<i64: 256, 8>}, {transform_indices = @transform_1, window_bounds = array<i64: 256, 1>}, {pipeline_mode = #tpu.pipeline_mode<synchronous>, transform_indices = @transform_2, window_bounds = array<i64: 8, 64>}, {pipeline_mode = #tpu.pipeline_mode<synchronous>, transform_indices = @transform_3, window_bounds = array<i64: 1, 64>}, {pipeline_mode = #tpu.pipeline_mode<synchronous>, transform_indices = @transform_4, window_bounds = array<i64: 1, 64>}, {pipeline_mode = #tpu.pipeline_mode<synchronous>, transform_indices = @transform_5, window_bounds = array<i64: 1, 64>}, {pipeline_mode = #tpu.pipeline_mode<synchronous>, transform_indices = @transform_6, window_bounds = array<i64: 64, 64>}, {pipeline_mode = #tpu.pipeline_mode<synchronous>, transform_indices = @transform_7, window_bounds = array<i64: 1, 64>}, {pipeline_mode = #tpu.pipeline_mode<synchronous>, transform_indices = @transform_8, window_bounds = array<i64: 64, 8>}, {pipeline_mode = #tpu.pipeline_mode<synchronous>, transform_indices = @transform_9, window_bounds = array<i64: 1, 8>}, {transform_indices = @transform_10, window_bounds = array<i64: 1, 64, 64>}, {transform_indices = @transform_11, window_bounds = array<i64: 1, 64, 128>}, {transform_indices = @transform_12, window_bounds = array<i64: 1, 128, 64>}, {transform_indices = @transform_13, window_bounds = array<i64: 1, 7, 128>}, {transform_indices = @transform_14, window_bounds = array<i64: 256, 8>}]} {
    %c0_i32 = arith.constant 0 : i32
    %0 = arith.cmpi eq, %arg1, %c0_i32 : i32
    %1 = arith.extui %0 : i1 to i32
    %c0_i32_0 = arith.constant 0 : i32
    %2 = arith.cmpi ne, %1, %c0_i32_0 : i32
    scf.if %2 {
      %c0_30 = arith.constant 0 : index
      %c0_31 = arith.constant 0 : index
      %83 = vector.load %arg2[%c0_30, %c0_31] : memref<256x8xf32, #tpu.memory_space<vmem>>, vector<256x8xf32>
      %84 = arith.truncf %83 : vector<256x8xf32> to vector<256x8xbf16>
      %c0_32 = arith.constant 0 : index
      %c0_33 = arith.constant 0 : index
      %85 = vector.load %arg4[%c0_32, %c0_33] : memref<8x64xbf16, #tpu.memory_space<vmem>>, vector<8x64xbf16>
      %cst_34 = arith.constant dense<0.000000e+00> : vector<256x64xf32>
      %86 = tpu.matmul %84, %85, %cst_34 {dimension_numbers = #tpu.dot_dimension_numbers<[1], [0], [0], [1], [0, 0, 1, 1], [], []>} : vector<256x8xbf16>, vector<8x64xbf16>, vector<256x64xf32> -> vector<256x64xf32>
      %c0_35 = arith.constant 0 : index
      %c0_36 = arith.constant 0 : index
      %87 = vector.load %arg5[%c0_35, %c0_36] : memref<1x64xf32, #tpu.memory_space<vmem>>, vector<1x64xf32>
      %88 = vector.broadcast %87 : vector<1x64xf32> to vector<256x64xf32>
      %89 = arith.addf %86, %88 : vector<256x64xf32>
      %c0_37 = arith.constant 0 : index
      %c0_38 = arith.constant 0 : index
      %90 = vector.load %arg3[%c0_37, %c0_38] : memref<256x1xf32, #tpu.memory_space<vmem>>, vector<256x1xf32>
      %c0_39 = arith.constant 0 : index
      %c0_40 = arith.constant 0 : index
      %91 = vector.load %arg6[%c0_39, %c0_40] : memref<1x64xf32, #tpu.memory_space<vmem>>, vector<1x64xf32>
      %92 = vector.broadcast %90 : vector<256x1xf32> to vector<256x64xf32>
      %93 = vector.broadcast %91 : vector<1x64xf32> to vector<256x64xf32>
      %94 = arith.mulf %92, %93 : vector<256x64xf32>
      %c0_41 = arith.constant 0 : index
      %c0_42 = arith.constant 0 : index
      %95 = vector.load %arg7[%c0_41, %c0_42] : memref<1x64xf32, #tpu.memory_space<vmem>>, vector<1x64xf32>
      %96 = vector.broadcast %95 : vector<1x64xf32> to vector<256x64xf32>
      %97 = arith.addf %94, %96 : vector<256x64xf32>
      %98 = arith.negf %97 : vector<256x64xf32>
      %99 = math.exp %98 : vector<256x64xf32>
      %cst_43 = arith.constant 1.000000e+00 : f32
      %100 = vector.broadcast %cst_43 : f32 to vector<256x64xf32>
      %101 = arith.addf %100, %99 : vector<256x64xf32>
      %102 = arith.divf %100, %101 : vector<256x64xf32>
      %103 = arith.mulf %97, %102 : vector<256x64xf32>
      %104 = arith.truncf %103 : vector<256x64xf32> to vector<256x64xbf16>
      %c0_44 = arith.constant 0 : index
      %c0_45 = arith.constant 0 : index
      %105 = vector.load %arg8[%c0_44, %c0_45] : memref<64x64xbf16, #tpu.memory_space<vmem>>, vector<64x64xbf16>
      %cst_46 = arith.constant dense<0.000000e+00> : vector<256x64xf32>
      %106 = tpu.matmul %104, %105, %cst_46 {dimension_numbers = #tpu.dot_dimension_numbers<[1], [0], [0], [1], [0, 0, 1, 1], [], []>} : vector<256x64xbf16>, vector<64x64xbf16>, vector<256x64xf32> -> vector<256x64xf32>
      %c0_47 = arith.constant 0 : index
      %c0_48 = arith.constant 0 : index
      %107 = vector.load %arg9[%c0_47, %c0_48] : memref<1x64xf32, #tpu.memory_space<vmem>>, vector<1x64xf32>
      %108 = vector.broadcast %107 : vector<1x64xf32> to vector<256x64xf32>
      %109 = arith.addf %106, %108 : vector<256x64xf32>
      %110 = arith.addf %89, %109 : vector<256x64xf32>
      %c0_49 = arith.constant 0 : index
      %c0_50 = arith.constant 0 : index
      %111 = vector.load %arg17[%c0_49, %c0_50] : memref<256x64xf32, #tpu.memory_space<vmem>>, vector<256x64xf32>
      tpu.vector_store %arg17[%c0_49, %c0_50], %110 {strides = array<i32>} : memref<256x64xf32, #tpu.memory_space<vmem>>, vector<256x64xf32>,
    } else {
    }
    %c0 = arith.constant 0 : index
    %c0_1 = arith.constant 0 : index
    %c0_2 = arith.constant 0 : index
    %3 = vector.load %arg15[%c0, %c0_1, %c0_2] : memref<1x7x128xf32, #tpu.memory_space<vmem>>, vector<1x7x128xf32>
    %4 = vector.shape_cast %3 : vector<1x7x128xf32> to vector<7x128xf32>
    %5 = vector.extract_strided_slice %4 {offsets = [0, 0], sizes = [1, 64], strides = [1, 1]} : vector<7x128xf32> to vector<1x64xf32>
    %6 = vector.extract_strided_slice %4 {offsets = [1, 0], sizes = [1, 64], strides = [1, 1]} : vector<7x128xf32> to vector<1x64xf32>
    %7 = vector.extract_strided_slice %4 {offsets = [2, 0], sizes = [1, 64], strides = [1, 1]} : vector<7x128xf32> to vector<1x64xf32>
    %8 = vector.extract_strided_slice %4 {offsets = [3, 0], sizes = [1, 128], strides = [1, 1]} : vector<7x128xf32> to vector<1x128xf32>
    %9 = vector.extract_strided_slice %4 {offsets = [4, 0], sizes = [1, 64], strides = [1, 1]} : vector<7x128xf32> to vector<1x64xf32>
    %10 = vector.extract_strided_slice %4 {offsets = [5, 0], sizes = [1, 64], strides = [1, 1]} : vector<7x128xf32> to vector<1x64xf32>
    %11 = vector.extract_strided_slice %4 {offsets = [6, 0], sizes = [1, 64], strides = [1, 1]} : vector<7x128xf32> to vector<1x64xf32>
    %c0_3 = arith.constant 0 : index
    %c0_4 = arith.constant 0 : index
    %12 = vector.load %arg17[%c0_3, %c0_4] : memref<256x64xf32, #tpu.memory_space<vmem>>, vector<256x64xf32>
    %13 = arith.truncf %12 : vector<256x64xf32> to vector<256x64xbf16>
    %c0_5 = arith.constant 0 : index
    %c0_6 = arith.constant 0 : index
    %c0_7 = arith.constant 0 : index
    %14 = vector.load %arg12[%c0_5, %c0_6, %c0_7] : memref<1x64x64xbf16, #tpu.memory_space<vmem>>, vector<1x64x64xbf16>
    %15 = vector.shape_cast %14 : vector<1x64x64xbf16> to vector<64x64xbf16>
    %cst = arith.constant dense<0.000000e+00> : vector<256x64xf32>
    %16 = tpu.matmul %13, %15, %cst {dimension_numbers = #tpu.dot_dimension_numbers<[1], [0], [0], [1], [0, 0, 1, 1], [], []>} : vector<256x64xbf16>, vector<64x64xbf16>, vector<256x64xf32> -> vector<256x64xf32>
    %17 = vector.broadcast %5 : vector<1x64xf32> to vector<256x64xf32>
    %18 = arith.addf %16, %17 : vector<256x64xf32>
    %19 = arith.addf %12, %18 : vector<256x64xf32>
    %cst_8 = arith.constant dense<0.000000e+00> : vector<256xf32>
    %20 = vector.multi_reduction <add>, %19, %cst_8 [1] : vector<256x64xf32> to vector<256xf32>
    %21 = vector.shape_cast %20 : vector<256xf32> to vector<256x1xf32>
    %cst_9 = arith.constant 6.400000e+01 : f32
    %22 = vector.broadcast %cst_9 : f32 to vector<256x1xf32>
    %23 = arith.divf %21, %22 : vector<256x1xf32>
    %24 = vector.broadcast %23 : vector<256x1xf32> to vector<256x64xf32>
    %25 = arith.subf %19, %24 : vector<256x64xf32>
    %26 = arith.mulf %25, %25 : vector<256x64xf32>
    %cst_10 = arith.constant dense<0.000000e+00> : vector<256xf32>
    %27 = vector.multi_reduction <add>, %26, %cst_10 [1] : vector<256x64xf32> to vector<256xf32>
    %28 = vector.shape_cast %27 : vector<256xf32> to vector<256x1xf32>
    %cst_11 = arith.constant 6.400000e+01 : f32
    %29 = vector.broadcast %cst_11 : f32 to vector<256x1xf32>
    %30 = arith.divf %28, %29 : vector<256x1xf32>
    %31 = vector.broadcast %23 : vector<256x1xf32> to vector<256x64xf32>
    %32 = arith.subf %19, %31 : vector<256x64xf32>
    %cst_12 = arith.constant 9.99999974E-6 : f32
    %33 = vector.broadcast %cst_12 : f32 to vector<256x1xf32>
    %34 = arith.addf %30, %33 : vector<256x1xf32>
    %35 = math.rsqrt %34 : vector<256x1xf32>
    %36 = vector.broadcast %35 : vector<256x1xf32> to vector<256x64xf32>
    %37 = arith.mulf %32, %36 : vector<256x64xf32>
    %38 = vector.broadcast %6 : vector<1x64xf32> to vector<256x64xf32>
    %39 = arith.mulf %37, %38 : vector<256x64xf32>
    %40 = vector.broadcast %7 : vector<1x64xf32> to vector<256x64xf32>
    %41 = arith.addf %39, %40 : vector<256x64xf32>
    %42 = arith.truncf %41 : vector<256x64xf32> to vector<256x64xbf16>
    %c0_13 = arith.constant 0 : index
    %c0_14 = arith.constant 0 : index
    %c0_15 = arith.constant 0 : index
    %43 = vector.load %arg13[%c0_13, %c0_14, %c0_15] : memref<1x64x128xbf16, #tpu.memory_space<vmem>>, vector<1x64x128xbf16>
    %44 = vector.shape_cast %43 : vector<1x64x128xbf16> to vector<64x128xbf16>
    %cst_16 = arith.constant dense<0.000000e+00> : vector<256x128xf32>
    %45 = tpu.matmul %42, %44, %cst_16 {dimension_numbers = #tpu.dot_dimension_numbers<[1], [0], [0], [1], [0, 0, 1, 1], [], []>} : vector<256x64xbf16>, vector<64x128xbf16>, vector<256x128xf32> -> vector<256x128xf32>
    %46 = vector.broadcast %8 : vector<1x128xf32> to vector<256x128xf32>
    %47 = arith.addf %45, %46 : vector<256x128xf32>
    %cst_17 = arith.constant 0.000000e+00 : f32
    %48 = vector.broadcast %cst_17 : f32 to vector<256x128xf32>
    %49 = arith.maximumf %47, %48 : vector<256x128xf32>
    %50 = arith.truncf %49 : vector<256x128xf32> to vector<256x128xbf16>
    %c0_18 = arith.constant 0 : index
    %c0_19 = arith.constant 0 : index
    %c0_20 = arith.constant 0 : index
    %51 = vector.load %arg14[%c0_18, %c0_19, %c0_20] : memref<1x128x64xbf16, #tpu.memory_space<vmem>>, vector<1x128x64xbf16>
    %52 = vector.shape_cast %51 : vector<1x128x64xbf16> to vector<128x64xbf16>
    %cst_21 = arith.constant dense<0.000000e+00> : vector<256x64xf32>
    %53 = tpu.matmul %50, %52, %cst_21 {dimension_numbers = #tpu.dot_dimension_numbers<[1], [0], [0], [1], [0, 0, 1, 1], [], []>} : vector<256x128xbf16>, vector<128x64xbf16>, vector<256x64xf32> -> vector<256x64xf32>
    %54 = vector.broadcast %9 : vector<1x64xf32> to vector<256x64xf32>
    %55 = arith.addf %53, %54 : vector<256x64xf32>
    %56 = arith.addf %41, %55 : vector<256x64xf32>
    %cst_22 = arith.constant dense<0.000000e+00> : vector<256xf32>
    %57 = vector.multi_reduction <add>, %56, %cst_22 [1] : vector<256x64xf32> to vector<256xf32>
    %58 = vector.shape_cast %57 : vector<256xf32> to vector<256x1xf32>
    %cst_23 = arith.constant 6.400000e+01 : f32
    %59 = vector.broadcast %cst_23 : f32 to vector<256x1xf32>
    %60 = arith.divf %58, %59 : vector<256x1xf32>
    %61 = vector.broadcast %60 : vector<256x1xf32> to vector<256x64xf32>
    %62 = arith.subf %56, %61 : vector<256x64xf32>
    %63 = arith.mulf %62, %62 : vector<256x64xf32>
    %cst_24 = arith.constant dense<0.000000e+00> : vector<256xf32>
    %64 = vector.multi_reduction <add>, %63, %cst_24 [1] : vector<256x64xf32> to vector<256xf32>
    %65 = vector.shape_cast %64 : vector<256xf32> to vector<256x1xf32>
    %cst_25 = arith.constant 6.400000e+01 : f32
    %66 = vector.broadcast %cst_25 : f32 to vector<256x1xf32>
    %67 = arith.divf %65, %66 : vector<256x1xf32>
    %68 = vector.broadcast %60 : vector<256x1xf32> to vector<256x64xf32>
    %69 = arith.subf %56, %68 : vector<256x64xf32>
    %cst_26 = arith.constant 9.99999974E-6 : f32
    %70 = vector.broadcast %cst_26 : f32 to vector<256x1xf32>
    %71 = arith.addf %67, %70 : vector<256x1xf32>
    %72 = math.rsqrt %71 : vector<256x1xf32>
    %73 = vector.broadcast %72 : vector<256x1xf32> to vector<256x64xf32>
    %74 = arith.mulf %69, %73 : vector<256x64xf32>
    %75 = vector.broadcast %10 : vector<1x64xf32> to vector<256x64xf32>
    %76 = arith.mulf %74, %75 : vector<256x64xf32>
    %77 = vector.broadcast %11 : vector<1x64xf32> to vector<256x64xf32>
    %78 = arith.addf %76, %77 : vector<256x64xf32>
    %c0_27 = arith.constant 0 : index
    %c0_28 = arith.constant 0 : index
    %79 = vector.load %arg17[%c0_27, %c0_28] : memref<256x64xf32, #tpu.memory_space<vmem>>, vector<256x64xf32>
    tpu.vector_store %arg17[%c0_27, %c0_28], %78 {strides = array<i32>} : memref<256x64xf32, #tpu.memory_space<vmem>>, vector<256x64xf32>,
    %c1_i32 = arith.constant 1 : i32
    %80 = arith.cmpi eq, %arg1, %c1_i32 : i32
    %81 = arith.extui %80 : i1 to i32
    %c0_i32_29 = arith.constant 0 : i32
    %82 = arith.cmpi ne, %81, %c0_i32_29 : i32
    scf.if %82 {
      %83 = arith.truncf %78 : vector<256x64xf32> to vector<256x64xbf16>
      %c0_30 = arith.constant 0 : index
      %c0_31 = arith.constant 0 : index
      %84 = vector.load %arg10[%c0_30, %c0_31] : memref<64x8xbf16, #tpu.memory_space<vmem>>, vector<64x8xbf16>
      %cst_32 = arith.constant dense<0.000000e+00> : vector<256x8xf32>
      %85 = tpu.matmul %83, %84, %cst_32 {dimension_numbers = #tpu.dot_dimension_numbers<[1], [0], [0], [1], [0, 0, 1, 1], [], []>} : vector<256x64xbf16>, vector<64x8xbf16>, vector<256x8xf32> -> vector<256x8xf32>
      %c0_33 = arith.constant 0 : index
      %c0_34 = arith.constant 0 : index
      %86 = vector.load %arg11[%c0_33, %c0_34] : memref<1x8xf32, #tpu.memory_space<vmem>>, vector<1x8xf32>
      %87 = vector.broadcast %86 : vector<1x8xf32> to vector<256x8xf32>
      %88 = arith.addf %85, %87 : vector<256x8xf32>
      %89 = tpu.iota {dimensions = array<i32: 1>} : vector<256x8xi32>
      %c3_i32 = arith.constant 3 : i32
      %90 = vector.broadcast %c3_i32 : i32 to vector<256x8xi32>
      %91 = arith.cmpi slt, %89, %90 : vector<256x8xi32>
      %cst_35 = arith.constant 0.000000e+00 : f32
      %92 = vector.broadcast %cst_35 : f32 to vector<256x8xf32>
      %93 = arith.select %91, %88, %92 : vector<256x8xi1>, vector<256x8xf32>
      %c3_i32_36 = arith.constant 3 : i32
      %94 = vector.broadcast %c3_i32_36 : i32 to vector<256x8xi32>
      %95 = arith.cmpi sge, %89, %94 : vector<256x8xi32>
      %c5_i32 = arith.constant 5 : i32
      %96 = vector.broadcast %c5_i32 : i32 to vector<256x8xi32>
      %97 = arith.cmpi slt, %89, %96 : vector<256x8xi32>
      %98 = arith.andi %95, %97 : vector<256x8xi1>
      %cst_37 = arith.constant 0xFF800000 : f32
      %99 = vector.broadcast %cst_37 : f32 to vector<256x8xf32>
      %100 = arith.select %98, %88, %99 : vector<256x8xi1>, vector<256x8xf32>
      %cst_38 = arith.constant dense<0xFF800000> : vector<256xf32>
      %101 = vector.multi_reduction <maximumf>, %100, %cst_38 [1] : vector<256x8xf32> to vector<256xf32>
      %102 = vector.shape_cast %101 : vector<256xf32> to vector<256x1xf32>
      %103 = vector.broadcast %102 : vector<256x1xf32> to vector<256x8xf32>
      %104 = arith.subf %88, %103 : vector<256x8xf32>
      %105 = math.exp %104 : vector<256x8xf32>
      %cst_39 = arith.constant 0.000000e+00 : f32
      %106 = vector.broadcast %cst_39 : f32 to vector<256x8xf32>
      %107 = arith.select %98, %105, %106 : vector<256x8xi1>, vector<256x8xf32>
      %cst_40 = arith.constant dense<0.000000e+00> : vector<256xf32>
      %108 = vector.multi_reduction <add>, %107, %cst_40 [1] : vector<256x8xf32> to vector<256xf32>
      %109 = vector.shape_cast %108 : vector<256xf32> to vector<256x1xf32>
      %110 = vector.broadcast %109 : vector<256x1xf32> to vector<256x8xf32>
      %111 = arith.divf %107, %110 : vector<256x8xf32>
      %112 = arith.select %98, %111, %93 : vector<256x8xi1>, vector<256x8xf32>
      %c5_i32_41 = arith.constant 5 : i32
      %113 = vector.broadcast %c5_i32_41 : i32 to vector<256x8xi32>
      %114 = arith.cmpi sge, %89, %113 : vector<256x8xi32>
      %c7_i32 = arith.constant 7 : i32
      %115 = vector.broadcast %c7_i32 : i32 to vector<256x8xi32>
      %116 = arith.cmpi slt, %89, %115 : vector<256x8xi32>
      %117 = arith.andi %114, %116 : vector<256x8xi1>
      %cst_42 = arith.constant 0xFF800000 : f32
      %118 = vector.broadcast %cst_42 : f32 to vector<256x8xf32>
      %119 = arith.select %117, %88, %118 : vector<256x8xi1>, vector<256x8xf32>
      %cst_43 = arith.constant dense<0xFF800000> : vector<256xf32>
      %120 = vector.multi_reduction <maximumf>, %119, %cst_43 [1] : vector<256x8xf32> to vector<256xf32>
      %121 = vector.shape_cast %120 : vector<256xf32> to vector<256x1xf32>
      %122 = vector.broadcast %121 : vector<256x1xf32> to vector<256x8xf32>
      %123 = arith.subf %88, %122 : vector<256x8xf32>
      %124 = math.exp %123 : vector<256x8xf32>
      %cst_44 = arith.constant 0.000000e+00 : f32
      %125 = vector.broadcast %cst_44 : f32 to vector<256x8xf32>
      %126 = arith.select %117, %124, %125 : vector<256x8xi1>, vector<256x8xf32>
      %cst_45 = arith.constant dense<0.000000e+00> : vector<256xf32>
      %127 = vector.multi_reduction <add>, %126, %cst_45 [1] : vector<256x8xf32> to vector<256xf32>
      %128 = vector.shape_cast %127 : vector<256xf32> to vector<256x1xf32>
      %129 = vector.broadcast %128 : vector<256x1xf32> to vector<256x8xf32>
      %130 = arith.divf %126, %129 : vector<256x8xf32>
      %131 = arith.select %117, %130, %112 : vector<256x8xi1>, vector<256x8xf32>
      %c7_i32_46 = arith.constant 7 : i32
      %132 = vector.broadcast %c7_i32_46 : i32 to vector<256x8xi32>
      %133 = arith.cmpi eq, %89, %132 : vector<256x8xi32>
      %134 = arith.select %133, %88, %131 : vector<256x8xi1>, vector<256x8xf32>
      %c0_47 = arith.constant 0 : index
      %c0_48 = arith.constant 0 : index
      %135 = vector.load %arg16[%c0_47, %c0_48] : memref<256x8xf32, #tpu.memory_space<vmem>>, vector<256x8xf32>
      tpu.vector_store %arg16[%c0_47, %c0_48], %134 {strides = array<i32>} : memref<256x8xf32, #tpu.memory_space<vmem>>, vector<256x8xf32>,
    } else {
    }
    return
  }
  func.func @transform_0(%arg0: i32, %arg1: i32) -> (i32, i32) {
    %c0_i32 = arith.constant 0 : i32
    %c0_i32_0 = arith.constant 0 : i32
    return %arg0, %c0_i32 : i32, i32
  }
  func.func @transform_1(%arg0: i32, %arg1: i32) -> (i32, i32) {
    %c0_i32 = arith.constant 0 : i32
    %c0_i32_0 = arith.constant 0 : i32
    return %arg0, %c0_i32 : i32, i32
  }
  func.func @transform_2(%arg0: i32, %arg1: i32) -> (i32, i32) {
    %c0_i32 = arith.constant 0 : i32
    %c0_i32_0 = arith.constant 0 : i32
    %c0_i32_1 = arith.constant 0 : i32
    return %c0_i32, %c0_i32_0 : i32, i32
  }
  func.func @transform_3(%arg0: i32, %arg1: i32) -> (i32, i32) {
    %c0_i32 = arith.constant 0 : i32
    %c0_i32_0 = arith.constant 0 : i32
    %c0_i32_1 = arith.constant 0 : i32
    return %c0_i32, %c0_i32_0 : i32, i32
  }
  func.func @transform_4(%arg0: i32, %arg1: i32) -> (i32, i32) {
    %c0_i32 = arith.constant 0 : i32
    %c0_i32_0 = arith.constant 0 : i32
    %c0_i32_1 = arith.constant 0 : i32
    return %c0_i32, %c0_i32_0 : i32, i32
  }
  func.func @transform_5(%arg0: i32, %arg1: i32) -> (i32, i32) {
    %c0_i32 = arith.constant 0 : i32
    %c0_i32_0 = arith.constant 0 : i32
    %c0_i32_1 = arith.constant 0 : i32
    return %c0_i32, %c0_i32_0 : i32, i32
  }
  func.func @transform_6(%arg0: i32, %arg1: i32) -> (i32, i32) {
    %c0_i32 = arith.constant 0 : i32
    %c0_i32_0 = arith.constant 0 : i32
    %c0_i32_1 = arith.constant 0 : i32
    return %c0_i32, %c0_i32_0 : i32, i32
  }
  func.func @transform_7(%arg0: i32, %arg1: i32) -> (i32, i32) {
    %c0_i32 = arith.constant 0 : i32
    %c0_i32_0 = arith.constant 0 : i32
    %c0_i32_1 = arith.constant 0 : i32
    return %c0_i32, %c0_i32_0 : i32, i32
  }
  func.func @transform_8(%arg0: i32, %arg1: i32) -> (i32, i32) {
    %c0_i32 = arith.constant 0 : i32
    %c0_i32_0 = arith.constant 0 : i32
    %c0_i32_1 = arith.constant 0 : i32
    return %c0_i32, %c0_i32_0 : i32, i32
  }
  func.func @transform_9(%arg0: i32, %arg1: i32) -> (i32, i32) {
    %c0_i32 = arith.constant 0 : i32
    %c0_i32_0 = arith.constant 0 : i32
    %c0_i32_1 = arith.constant 0 : i32
    return %c0_i32, %c0_i32_0 : i32, i32
  }
  func.func @transform_10(%arg0: i32, %arg1: i32) -> (i32, i32, i32) {
    %c0_i32 = arith.constant 0 : i32
    %c0_i32_0 = arith.constant 0 : i32
    %c0_i32_1 = arith.constant 0 : i32
    return %arg1, %c0_i32, %c0_i32_0 : i32, i32, i32
  }
  func.func @transform_11(%arg0: i32, %arg1: i32) -> (i32, i32, i32) {
    %c0_i32 = arith.constant 0 : i32
    %c0_i32_0 = arith.constant 0 : i32
    %c0_i32_1 = arith.constant 0 : i32
    return %arg1, %c0_i32, %c0_i32_0 : i32, i32, i32
  }
  func.func @transform_12(%arg0: i32, %arg1: i32) -> (i32, i32, i32) {
    %c0_i32 = arith.constant 0 : i32
    %c0_i32_0 = arith.constant 0 : i32
    %c0_i32_1 = arith.constant 0 : i32
    return %arg1, %c0_i32, %c0_i32_0 : i32, i32, i32
  }
  func.func @transform_13(%arg0: i32, %arg1: i32) -> (i32, i32, i32) {
    %c0_i32 = arith.constant 0 : i32
    %c0_i32_0 = arith.constant 0 : i32
    %c0_i32_1 = arith.constant 0 : i32
    return %arg1, %c0_i32, %c0_i32_0 : i32, i32, i32
  }
  func.func @transform_14(%arg0: i32, %arg1: i32) -> (i32, i32) {
    %c0_i32 = arith.constant 0 : i32
    %c0_i32_0 = arith.constant 0 : i32
    return %arg0, %c0_i32 : i32, i32
  }
}

</mosaic_0001>

<bundles_post_ra>
// kernel: tabformer_forward.1
= control target key start
LH: loop header
LB: loop body
LE: loop exit
PB: predicated region body
PF: predicated region fallthrough
CT: control target
= control target key end

     0   :  { %s6297_s29 = smov 0   ;;  %s6299_s30 = smov 0   ;;  %s9786_s0 = inlined_call_operand.vmem [shape: f32[256,8], index: 0, kind: input, shape index: {}]   ;;  %s9787_s1 = inlined_call_operand.vmem [shape: f32[256,1], index: 1, kind: input, shape index: {}]   ;;  %s9788_s2 = inlined_call_operand.vmem [shape: bf16[8,64], index: 2, kind: input, shape index: {}]   ;;  %s9789_s3 = inlined_call_operand.vmem [shape: f32[1,64], index: 3, kind: input, shape index: {}]   ;;  %s9790_s4 = inlined_call_operand.vmem [shape: f32[1,64], index: 4, kind: input, shape index: {}]   ;;  %s9791_s5 = inlined_call_operand.vmem [shape: f32[1,64], index: 5, kind: input, shape index: {}]   ;;  %s9792_s6 = inlined_call_operand.vmem [shape: bf16[64,64], index: 6, kind: input, shape index: {}]   ;;  %s9793_s7 = inlined_call_operand.vmem [shape: f32[1,64], index: 7, kind: input, shape index: {}]   ;;  %s9794_s8 = inlined_call_operand.vmem [shape: bf16[64,8], index: 8, kind: input, shape index: {}]   ;;  %s9795_s9 = inlined_call_operand.vmem [shape: f32[1,8], index: 9, kind: input, shape index: {}]   ;;  %s9796_s10 = inlined_call_operand.vmem [shape: bf16[2,64,64], index: 10, kind: input, shape index: {}]   ;;  %s9797_s11 = inlined_call_operand.vmem [shape: bf16[2,64,128], index: 11, kind: input, shape index: {}]   ;;  %s9798_s12 = inlined_call_operand.vmem [shape: bf16[2,128,64], index: 12, kind: input, shape index: {}]   ;;  %s9799_s13 = inlined_call_operand.vmem [shape: f32[2,7,128], index: 13, kind: input, shape index: {}]   ;;  %s9800_s14 = inlined_call_operand.vmem [shape: f32[256,8], index: 14, kind: output, shape index: {}]  }
   0x1   :  { %9875 = sst [smem:[#allocation55_spill]] %s9800_s14  ;;  %s6301_s15 = smov 0  }
   0x2 LB: > { %9876 = sst [smem:[#allocation3_spill]] %s6215_s30  ;;  %s33_s16 = sadd.s32 1, %s6215_s30  ;;  %s6219_s15 = sphi %s6301_s15, %s24_s15   ;;  %s6215_s30 = sphi %s6299_s30, %s9984_s30   ;;  %s6211_s29 = sphi %s6297_s29, %s9983_s29  }
   0x3   : > { %9877 = sst [smem:[#allocation4_spill]] %s6219_s15  ;;  %p4990_p0 = scmp.ge.s32.totalorder %s6219_s15, 1 }
   0x4   : > { %p34_p1 = scmp.ge.s32.totalorder %s33_s16, 2  ;;  %p475_p2 = scmp.lt.s32.totalorder %s6219_s15, 3 }
   0x6   : > { %s9986_s16 = smov (%p34_p1, %s33_s16), 0  ;;  %p476_p3 = pnand %p4990_p0, %p475_p2 }
   0x7   : > { %9878 = sst [smem:[#allocation5_spill]] %s9986_s16  ;;  %p557_p4 = scmp.lt.s32.totalorder (!%p476_p3), %s6211_s29, 1 }
   0x8   : > { %479 = sbr.rel (%p476_p3) target bundleno = 2521 (0x9d9), region = 76  ;;  %p4998_p5 = scmp.ne.s32.totalorder (!%p476_p3), %s6211_s29, 0 }
   0xf   : > { %s558_s17 = scalar_select %p557_p4, %s6211_s29, 1 }
  0x10   : > { %586 = sbr.rel (%p4998_p5) target bundleno = 462 (0x1ce), region = 80  ;;  %v863_v0 = vld [vmem:[%s9787_s1 + $0x30] sm:$0xff] (!%p4998_p5)  ;;  %v861_v1 = vld [vmem:[%s9787_s1 + $0x20] sm:$0xff] (!%p4998_p5)  ;;  %v6221_v2 = vmov (!%p4998_p5), 0   ;;  %v864_v3 = vld [vmem:[%s9787_s1 + $0x38] sm:$0xff] (!%p4998_p5)  ;;  %vm692_vm0 = vcmask (!%p4998_p5), 1043456  }
  0x11   : > { %s5145_s18 = sshll.u32 %s558_s17, 5  ;;  %s5147_s19 = sshll.u32 %s558_s17, 6  ;;  %5658 = vset.pattern.permute.xlu1 (!%p4998_p5), %v6221_v2  ;;  %5657 = vset.pattern.permute.xlu0 (!%p4998_p5), %v6221_v2  ;;  %v862_v4 = vld [vmem:[%s9787_s1 + $0x28] sm:$0xff] (!%p4998_p5)  ;;  %v865_v6 = vld [vmem:[%s9787_s1 + $0x40] sm:$0xff] (!%p4998_p5)  ;;  %v868_v7 = vld [vmem:[%s9787_s1 + $0x58] sm:$0xff] (!%p4998_p5)  ;;  %vm643_vm1 = vcmask (!%p4998_p5), 64512  }
  0x12   : > { %s6322_s22 = scalar_lea.vmem %s9796_s10, %s5145_s18  ;;  %s6327_s25 = scalar_lea.vmem %s9797_s11, %s5145_s18  ;;  %922 = vperm.xlu1 (!%p4998_p5), %5658, %v863_v0   ;;  %912 = vperm.xlu0 (!%p4998_p5), %5657, %v861_v1   ;;  %v866_v5 = vld [vmem:[%s9787_s1 + $0x48] sm:$0xff] (!%p4998_p5)  ;;  %v867_v8 = vld [vmem:[%s9787_s1 + $0x50] sm:$0xff] (!%p4998_p5)  ;;  %v869_v10 = vld [vmem:[%s9787_s1 + $0x60] sm:$0xff] (!%p4998_p5)  ;;  %vm1406_vm2 = vcmask (!%p4998_p5), 523264  }
  0x13   : > { %s6332_s28 = scalar_lea.vmem %s9798_s12, %s5147_s19  ;;  %s4997_s16 = sshll.u32 %s558_s17, 3  ;;  %v870_v9 = vld [vmem:[%s9787_s1 + $0x68] sm:$0xff] (!%p4998_p5)  ;;  %v872_v11 = vld [vmem:[%s9787_s1 + $0x78] sm:$0xff] (!%p4998_p5)  ;;  %v871_v12 = vld [vmem:[%s9787_s1 + $0x70] sm:$0xff] (!%p4998_p5) }
  0x14   : > { %s6337_s14 = scalar_lea.vmem %s9799_s13, %s4997_s16  ;;  %v874_v13 = vld [vmem:[%s9787_s1 + $0x88] sm:$0xff] (!%p4998_p5)  ;;  %v873_v14 = vld [vmem:[%s9787_s1 + $0x80] sm:$0xff] (!%p4998_p5)  ;;  %v876_v15 = vld [vmem:[%s9787_s1 + $0x98] sm:$0xff] (!%p4998_p5) }
  0x15   : > { %v635_v16 = vld [vmem:[%s9788_s2] sm:$0xf] (!%p4998_p5)  ;;  %v588_v20 = vld [vmem:[%s9786_s0 + $0x8] sm:$0xff] (!%p4998_p5)  ;;  %v875_v21 = vld [vmem:[%s9787_s1 + $0x90] sm:$0xff] (!%p4998_p5) }
  0x16   : > { %927 = vperm.xlu1 (!%p4998_p5), %5658, %v864_v3   ;;  %917 = vperm.xlu0 (!%p4998_p5), %5657, %v862_v4   ;;  %v694_v17 = vsel (!%p4998_p5), %vm692_vm0, %v635_v16, 0  ;;  %v5659_v18 = vld [vmem:[%s9792_s6] sm:$0xff] (!%p4998_p5)   ;;  %v589_v23 = vld [vmem:[%s9786_s0 + $0x10] sm:$0xff] (!%p4998_p5)  ;;  %v590_v24 = vld [vmem:[%s9786_s0 + $0x18] sm:$0xff] (!%p4998_p5) }
  0x17   : > { %v587_v19 = vld [vmem:[%s9786_s0] sm:$0xff]  ;;  %5631 = vmatprep.subr.msk.bf16.mxu0 %vm692_vm0, %v635_v16  ;;  %5511 = vmatprep.subr.bf16.mxu1 %v5659_v18  ;;  %v620_v25 = vpack.c.bf16 %v590_v24, %v589_v23  ;;  %v5660_v26 = vld [vmem:[%s9792_s6 + $0x8] sm:$0xff]   ;;  %v880_v29 = vld [vmem:[%s9787_s1 + $0xb8] sm:$0xff] }
  0x18   : > { %v619_v22 = vpack.c.bf16 %v588_v20, %v587_v19  ;;  %5270 = vmatpush3.bf16.msra.mxu0 %v694_v17  ;;  %5515 = vmatpush3.bf16.msra.mxu1 %v5659_v18  ;;  %v878_v27 = vld [vmem:[%s9787_s1 + $0xa8] sm:$0xff]  ;;  %v877_v28 = vld [vmem:[%s9787_s1 + $0xa0] sm:$0xff]  ;;  %v5661_v30 = vld [vmem:[%s9792_s6 + $0x10] sm:$0xff]  }
  0x19   : > { %5303 = vmatprep.subr.bf16.mxu0 %v5659_v18  ;;  %5512 = vmatprep.subr.bf16.mxu1 %v5660_v26  ;;  %v591_v31 = vld [vmem:[%s9786_s0 + $0x20] sm:$0xff]  ;;  %v592_v32 = vld [vmem:[%s9786_s0 + $0x28] sm:$0xff]  ;;  %v879_v33 = vld [vmem:[%s9787_s1 + $0xb0] sm:$0xff] }
  0x1a   : > { %937 = vperm.xlu1 %5658, %v866_v5   ;;  %932 = vperm.xlu0 %5657, %v865_v6   ;;  %v621_v34 = vpack.c.bf16 %v592_v32, %v591_v31  ;;  %v593_v35 = vld [vmem:[%s9786_s0 + $0x30] sm:$0xff]  ;;  %v594_v36 = vld [vmem:[%s9786_s0 + $0x38] sm:$0xff]  ;;  %v882_v39 = vld [vmem:[%s9787_s1 + $0xc8] sm:$0xff] }
  0x1b   : > { %5271 = vmatprep.mubr.msk.bf16.mxu0 %vm643_vm1, %v619_v22  ;;  %v622_v37 = vpack.c.bf16 %v594_v36, %v593_v35  ;;  %v5662_v38 = vld [vmem:[%s9792_s6 + $0x18] sm:$0xff]   ;;  %v881_v40 = vld [vmem:[%s9787_s1 + $0xc0] sm:$0xff]  ;;  %v883_v42 = vld [vmem:[%s9787_s1 + $0xd0] sm:$0xff] }
  0x1c   : > { %5272 = vmatmul.mubr.msk.bf16.vlgmr.msra.gmra.mrb[0].mxu0 %vm643_vm1, %v620_v25  ;;  %5516 = vmatpush3.bf16.msra.mxu1 %v5660_v26  ;;  %v884_v41 = vld [vmem:[%s9787_s1 + $0xd8] sm:$0xff]  ;;  %v595_v43 = vld [vmem:[%s9786_s0 + $0x40] sm:$0xff]  ;;  %v596_v44 = vld [vmem:[%s9786_s0 + $0x48] sm:$0xff] }
  0x1d   : > { %5304 = vmatpush3.bf16.msra.mxu0 %v5659_v18  ;;  %5513 = vmatprep.subr.bf16.mxu1 %v5661_v30  ;;  %v623_v45 = vpack.c.bf16 %v596_v44, %v595_v43  ;;  %v597_v46 = vld [vmem:[%s9786_s0 + $0x50] sm:$0xff]  ;;  %v598_v47 = vld [vmem:[%s9786_s0 + $0x58] sm:$0xff]  ;;  %v858_v49 = vld [vmem:[%s9787_s1 + $0x8] sm:$0xff] }
  0x1e   : > { %947 = vperm.xlu1 %5658, %v868_v7   ;;  %942 = vperm.xlu0 %5657, %v867_v8   ;;  %v624_v48 = vpack.c.bf16 %v598_v47, %v597_v46  ;;  %v857_v50 = vld [vmem:[%s9787_s1] sm:$0xff]  ;;  %v886_v51 = vld [vmem:[%s9787_s1 + $0xe8] sm:$0xff]  ;;  %v601_v56 = vld [vmem:[%s9786_s0 + $0x70] sm:$0xff] }
  0x1f   : > { %5305 = vmatprep.subr.bf16.mxu0 %v5660_v26  ;;  %5275 = vmatprep.mubr.msk.bf16.mxu0 %vm643_vm1, %v621_v34  ;;  %v885_v52 = vld [vmem:[%s9787_s1 + $0xe0] sm:$0xff]  ;;  %v600_v54 = vld [vmem:[%s9786_s0 + $0x68] sm:$0xff]  ;;  %v602_v57 = vld [vmem:[%s9786_s0 + $0x78] sm:$0xff] }
  0x20   : > { %5517 = vmatpush3.bf16.msra.mxu1 %v5661_v30  ;;  %v599_v53 = vld [vmem:[%s9786_s0 + $0x60] sm:$0xff]  ;;  %v626_v58 = vpack.c.bf16 %v602_v57, %v601_v56  ;;  %v860_v59 = vld [vmem:[%s9787_s1 + $0x18] sm:$0xff]  ;;  %v859_v60 = vld [vmem:[%s9787_s1 + $0x10] sm:$0xff] }
  0x21   : > { %5306 = vmatpush3.bf16.msra.mxu0 %v5660_v26  ;;  %5514 = vmatprep.subr.bf16.mxu1 %v5662_v38  ;;  %v625_v55 = vpack.c.bf16 %v600_v54, %v599_v53  ;;  %v888_v61 = vld [vmem:[%s9787_s1 + $0xf8] sm:$0xff]  ;;  %v887_v62 = vld [vmem:[%s9787_s1 + $0xf0] sm:$0xff]  ;;  %v603_v63 = vld [vmem:[%s9786_s0 + $0x80] sm:$0xff] }
  0x22   : > { %957 = vperm.xlu1 %5658, %v870_v9   ;;  %952 = vperm.xlu0 %5657, %v869_v10   ;;  %v604_v0 = vld [vmem:[%s9786_s0 + $0x88] sm:$0xff]  ;;  %v605_v2 = vld [vmem:[%s9786_s0 + $0x90] sm:$0xff]  ;;  %v606_v3 = vld [vmem:[%s9786_s0 + $0x98] sm:$0xff] }
  0x23   : > { %5307 = vmatprep.subr.bf16.mxu0 %v5661_v30  ;;  %v627_v1 = vpack.c.bf16 %v604_v0, %v603_v63  ;;  %v628_v4 = vpack.c.bf16 %v606_v3, %v605_v2  ;;  %v607_v5 = vld [vmem:[%s9786_s0 + $0xa0] sm:$0xff]  ;;  %v608_v6 = vld [vmem:[%s9786_s0 + $0xa8] sm:$0xff]  ;;  %v609_v8 = vld [vmem:[%s9786_s0 + $0xb0] sm:$0xff] }
  0x24   : > { %5276 = vmatmul.mubr.msk.bf16.gmra.mrb[4].mxu0 %vm643_vm1, %v622_v37  ;;  %5518 = vmatpush3.bf16.msra.mxu1 %v5662_v38  ;;  %v629_v7 = vpack.c.bf16 %v608_v6, %v607_v5  ;;  %v610_v9 = vld [vmem:[%s9786_s0 + $0xb8] sm:$0xff]  ;;  %v615_v17 = vld [vmem:[%s9786_s0 + $0xe0] sm:$0xff]  ;;  %v616_v18 = vld [vmem:[%s9786_s0 + $0xe8] sm:$0xff] }
  0x25   : > { %5308 = vmatpush3.bf16.msra.mxu0 %v5661_v30  ;;  %5279 = vmatprep.mubr.msk.bf16.mxu0 %vm643_vm1, %v623_v45  ;;  %v630_v10 = vpack.c.bf16 %v610_v9, %v609_v8  ;;  %v633_v19 = vpack.c.bf16 %v616_v18, %v615_v17  ;;  %v617_v20 = vld [vmem:[%s9786_s0 + $0xf0] sm:$0xff]  ;;  %v6566_v23 = vld [vmem:[%s9790_s4] ss:$0 sm:$0xff] }
  0x26   : > { %967 = vperm.xlu1 %5658, %v872_v11   ;;  %962 = vperm.xlu0 %5657, %v871_v12   ;;  %v611_v11 = vld [vmem:[%s9786_s0 + $0xc0] sm:$0xff]  ;;  %v612_v12 = vld [vmem:[%s9786_s0 + $0xc8] sm:$0xff] }
  0x27   : > { %5309 = vmatprep.subr.bf16.mxu0 %v5662_v38  ;;  %v6571_v24 = vld [vmem:[%s9791_s5] ss:$0 sm:$0xff] }
  0x29   : > { %5310 = vmatpush3.bf16.msra.mxu0 %v5662_v38 }
  0x2a   : > { %977 = vperm.xlu1 %5658, %v874_v13   ;;  %972 = vperm.xlu0 %5657, %v873_v14   ;;  %v631_v13 = vpack.c.bf16 %v612_v12, %v611_v11  ;;  %v613_v14 = vld [vmem:[%s9786_s0 + $0xd0] sm:$0xff] }
  0x2c   : > { %5280 = vmatmul.mubr.msk.bf16.gmra.mrb[8].mxu0 %vm643_vm1, %v624_v48 }
  0x2d   : > { %5283 = vmatprep.mubr.msk.bf16.mxu0 %vm643_vm1, %v625_v55 }
  0x2e   : > { %987 = vperm.xlu1 %5658, %v876_v15   ;;  %982 = vperm.xlu0 %5657, %v875_v21   ;;  %v614_v15 = vld [vmem:[%s9786_s0 + $0xd8] sm:$0xff] }
  0x2f   : > { %v632_v16 = vpack.c.bf16 %v614_v15, %v613_v14  ;;  %v618_v21 = vld [vmem:[%s9786_s0 + $0xf8] sm:$0xff] }
  0x30   : > { %v634_v22 = vpack.c.bf16 %v618_v21, %v617_v20 }
  0x32   : > { %997 = vperm.xlu1 %5658, %v878_v27   ;;  %992 = vperm.xlu0 %5657, %v877_v28  }
  0x34   : > { %5284 = vmatmul.mubr.msk.bf16.gmra.mrb[12].mxu0 %vm643_vm1, %v626_v58 }
  0x35   : > { %5287 = vmatprep.mubr.msk.bf16.mxu0 %vm643_vm1, %v627_v1 }
  0x36   : > { %1007 = vperm.xlu1 %5658, %v880_v29   ;;  %1002 = vperm.xlu0 %5657, %v879_v33  }
  0x3a   : > { %1017 = vperm.xlu1 %5658, %v882_v39   ;;  %1012 = vperm.xlu0 %5657, %v881_v40  }
  0x3c   : > { %5288 = vmatmul.mubr.msk.bf16.gmra.mrb[16].mxu0 %vm643_vm1, %v628_v4 }
  0x3d   : > { %5291 = vmatprep.mubr.msk.bf16.mxu0 %vm643_vm1, %v629_v7 }
  0x3e   : > { %1027 = vperm.xlu1 %5658, %v884_v41   ;;  %1022 = vperm.xlu0 %5657, %v883_v42  }
  0x42   : > { %897 = vperm.xlu1 %5658, %v858_v49   ;;  %892 = vperm.xlu0 %5657, %v857_v50  }
  0x44   : > { %5292 = vmatmul.mubr.msk.bf16.gmra.mrb[20].mxu0 %vm643_vm1, %v630_v10 }
  0x45   : > { %5295 = vmatprep.mubr.msk.bf16.mxu0 %vm643_vm1, %v631_v13 }
  0x46   : > { %1037 = vperm.xlu1 %5658, %v886_v51   ;;  %1032 = vperm.xlu0 %5657, %v885_v52  }
  0x4a   : > { %907 = vperm.xlu1 %5658, %v860_v59   ;;  %902 = vperm.xlu0 %5657, %v859_v60  }
  0x4c   : > { %5296 = vmatmul.mubr.msk.bf16.gmra.mrb[24].mxu0 %vm643_vm1, %v632_v16 }
  0x4d   : > { %5299 = vmatprep.mubr.msk.bf16.mxu0 %vm643_vm1, %v633_v19 }
  0x4e   : > { %1047 = vperm.xlu1 %5658, %v888_v61   ;;  %1042 = vperm.xlu0 %5657, %v887_v62  }
  0x54   : > { %5300 = vmatmul.mubr.msk.bf16.gmra.mrb[28].mxu0 %vm643_vm1, %v634_v22 }
  0x91   : > { %v923_v25 = vpop.permute.xlu1 %922  ;;  %v913_v26 = vpop.permute.xlu0 %912 }
  0x92   : > { %v1062_v27 = vmul.f32 %v6566_v23, %v923_v25  ;;  %v1060_v28 = vmul.f32 %v6566_v23, %v913_v26 }
  0x94   : > { %v6576_v29 = vadd.f32 %v6571_v24, %v1062_v27  ;;  %v6579_v30 = vadd.f32 %v6571_v24, %v1060_v28 }
  0x95   : > { %v928_v31 = vpop.permute.xlu1 %927  ;;  %v918_v32 = vpop.permute.xlu0 %917 }
  0x96   : > { %v5024_v33 = vmul.f32 -1.442695, %v6576_v29  ;;  %v5022_v34 = vmul.f32 -1.442695, %v6579_v30  ;;  %v1063_v35 = vmul.f32 %v6566_v23, %v928_v31  ;;  %v1061_v36 = vmul.f32 %v6566_v23, %v918_v32 }
  0x98   : > { %5663 = vpow2.f32 %v5024_v33  ;;  %v6586_v37 = vadd.f32 %v6571_v24, %v1063_v35  ;;  %v6589_v38 = vadd.f32 %v6571_v24, %v1061_v36 }
  0x99   : > { %5665 = vpow2.f32 %v5022_v34  ;;  %v938_v39 = vpop.permute.xlu1 %937  ;;  %v933_v40 = vpop.permute.xlu0 %932 }
  0x9a   : > { %v5025_v41 = vmul.f32 -1.442695, %v6586_v37  ;;  %v5023_v42 = vmul.f32 -1.442695, %v6589_v38  ;;  %v1065_v43 = vmul.f32 %v6566_v23, %v938_v39  ;;  %v1064_v44 = vmul.f32 %v6566_v23, %v933_v40 }
  0x9c   : > { %5667 = vpow2.f32 %v5025_v41  ;;  %v6596_v45 = vadd.f32 %v6571_v24, %v1065_v43  ;;  %v6599_v46 = vadd.f32 %v6571_v24, %v1064_v44 }
  0x9d   : > { %5669 = vpow2.f32 %v5023_v42  ;;  %v948_v47 = vpop.permute.xlu1 %947  ;;  %v943_v48 = vpop.permute.xlu0 %942 }
  0x9e   : > { %v5027_v49 = vmul.f32 -1.442695, %v6596_v45  ;;  %v5026_v50 = vmul.f32 -1.442695, %v6599_v46  ;;  %v1067_v51 = vmul.f32 %v6566_v23, %v948_v47  ;;  %v1066_v52 = vmul.f32 %v6566_v23, %v943_v48 }
  0xa0   : > { %5671 = vpow2.f32 %v5027_v49  ;;  %v6606_v53 = vadd.f32 %v6571_v24, %v1067_v51  ;;  %v6609_v54 = vadd.f32 %v6571_v24, %v1066_v52 }
  0xa1   : > { %5673 = vpow2.f32 %v5026_v50  ;;  %v958_v55 = vpop.permute.xlu1 %957  ;;  %v953_v56 = vpop.permute.xlu0 %952 }
  0xa2   : > { %v5664_v57 = vpop.eup %5663  ;;  %v5029_v58 = vmul.f32 -1.442695, %v6606_v53  ;;  %v1069_v59 = vmul.f32 %v6566_v23, %v958_v55  ;;  %v1068_v60 = vmul.f32 %v6566_v23, %v953_v56  ;;  %v5028_v63 = vmul.f32 -1.442695, %v6609_v54 }
  0xa3   : > { %v5666_v61 = vpop.eup %5665  ;;  %v1229_v62 = vadd.f32 1.0, %v5664_v57 }
  0xa4   : > { %v1227_v0 = vadd.f32 1.0, %v5666_v61  ;;  %5675 = vpow2.f32 %v5029_v58  ;;  %v6616_v1 = vadd.f32 %v6571_v24, %v1069_v59  ;;  %v6619_v2 = vadd.f32 %v6571_v24, %v1068_v60 }
  0xa5   : > { %5677 = vrcp.f32 %v1229_v62  ;;  %v968_v3 = vpop.permute.xlu1 %967  ;;  %v963_v4 = vpop.permute.xlu0 %962 }
  0xa6   : > { %v5668_v5 = vpop.eup %5667  ;;  %5679 = vrcp.f32 %v1227_v0  ;;  %v5031_v6 = vmul.f32 -1.442695, %v6616_v1  ;;  %v1071_v7 = vmul.f32 %v6566_v23, %v968_v3  ;;  %v5030_v10 = vmul.f32 -1.442695, %v6619_v2 }
  0xa7   : > { %v5670_v8 = vpop.eup %5669  ;;  %v1230_v9 = vadd.f32 1.0, %v5668_v5  ;;  %5681 = vpow2.f32 %v5028_v63  ;;  %v1070_v11 = vmul.f32 %v6566_v23, %v963_v4 }
  0xa8   : > { %v1228_v12 = vadd.f32 1.0, %v5670_v8  ;;  %5683 = vpow2.f32 %v5031_v6  ;;  %v6626_v13 = vadd.f32 %v6571_v24, %v1071_v7 }
  0xa9   : > { %5685 = vrcp.f32 %v1230_v9  ;;  %v6629_v14 = vadd.f32 %v6571_v24, %v1070_v11  ;;  %v978_v15 = vpop.permute.xlu1 %977  ;;  %v973_v16 = vpop.permute.xlu0 %972 }
  0xaa   : > { %v5672_v17 = vpop.eup %5671  ;;  %5687 = vrcp.f32 %v1228_v12  ;;  %v5033_v18 = vmul.f32 -1.442695, %v6626_v13  ;;  %v1073_v19 = vmul.f32 %v6566_v23, %v978_v15  ;;  %v1072_v20 = vmul.f32 %v6566_v23, %v973_v16 }
  0xab   : > { %v5674_v21 = vpop.eup %5673  ;;  %v1232_v22 = vadd.f32 1.0, %v5672_v17  ;;  %5689 = vpow2.f32 %v5030_v10  ;;  %v5032_v25 = vmul.f32 -1.442695, %v6629_v14 }
  0xac   : > { %v1231_v26 = vadd.f32 1.0, %v5674_v21  ;;  %5691 = vpow2.f32 %v5033_v18  ;;  %v6636_v27 = vadd.f32 %v6571_v24, %v1073_v19  ;;  %v6639_v28 = vadd.f32 %v6571_v24, %v1072_v20 }
  0xad   : > { %5693 = vrcp.f32 %v1232_v22  ;;  %v988_v31 = vpop.permute.xlu1 %987  ;;  %v983_v32 = vpop.permute.xlu0 %982 }
  0xae   : > { %v5676_v33 = vpop.eup %5675  ;;  %5695 = vrcp.f32 %v1231_v26  ;;  %v5035_v34 = vmul.f32 -1.442695, %v6636_v27  ;;  %v5034_v35 = vmul.f32 -1.442695, %v6639_v28  ;;  %v1075_v36 = vmul.f32 %v6566_v23, %v988_v31 }
  0xaf   : > { %v5678_v39 = vpop.eup %5677  ;;  %v1234_v40 = vadd.f32 1.0, %v5676_v33  ;;  %5697 = vpow2.f32 %v5032_v25  ;;  %v1074_v41 = vmul.f32 %v6566_v23, %v983_v32 }
  0xb0   : > { %v5680_v42 = vpop.eup %5679  ;;  %5699 = vpow2.f32 %v5035_v34  ;;  %v6646_v43 = vadd.f32 %v6571_v24, %v1075_v36  ;;  %v1325_v61 = vmul.f32 %v5678_v39, %v6576_v29 }
  0xb1   : > { %v5682_v44 = vpop.eup %5681  ;;  %5701 = vrcp.f32 %v1234_v40  ;;  %v6649_v47 = vadd.f32 %v6571_v24, %v1074_v41  ;;  %v998_v48 = vpop.permute.xlu1 %997  ;;  %v1323_v6 = vmul.f32 %v5680_v42, %v6579_v30 }
  0xb2   : > { %v993_v49 = vpop.permute.xlu0 %992  ;;  %v5684_v50 = vpop.eup %5683  ;;  %v1233_v51 = vadd.f32 1.0, %v5682_v44  ;;  %5703 = vpow2.f32 %v5034_v35  ;;  %v5037_v52 = vmul.f32 -1.442695, %v6646_v43  ;;  %v1077_v55 = vmul.f32 %v6566_v23, %v998_v48 }
  0xb3   : > { %v5686_v56 = vpop.eup %5685  ;;  %v1236_v57 = vadd.f32 1.0, %v5684_v50  ;;  %v5036_v58 = vmul.f32 -1.442695, %v6649_v47  ;;  %v1076_v59 = vmul.f32 %v6566_v23, %v993_v49 }
  0xb4   : > { %v5688_v60 = vpop.eup %5687  ;;  %v1326_v62 = vmul.f32 %v5686_v56, %v6586_v37  ;;  %5705 = vrcp.f32 %v1233_v51  ;;  %v6658_v63 = vadd.f32 %v6571_v24, %v1077_v55 }
  0xb5   : > { %v5690_v0 = vpop.eup %5689  ;;  %5707 = vrcp.f32 %v1236_v57  ;;  %v6661_v3 = vadd.f32 %v6571_v24, %v1076_v59  ;;  %v1008_v4 = vpop.permute.xlu1 %1007  ;;  %v1324_v7 = vmul.f32 %v5688_v60, %v6589_v38 }
  0xb6   : > { %v1003_v5 = vpop.permute.xlu0 %1002  ;;  %v5692_v8 = vpop.eup %5691  ;;  %v1354_v9 = vpack.c.bf16 %v1326_v62, %v1325_v61  ;;  %v1235_v29 = vadd.f32 1.0, %v5690_v0  ;;  %5709 = vpow2.f32 %v5037_v52  ;;  %v5039_v37 = vmul.f32 -1.442695, %v6658_v63 }
  0xb7   : > { %v5694_v10 = vpop.eup %5693  ;;  %v1238_v11 = vadd.f32 1.0, %v5692_v8  ;;  %5711 = vpow2.f32 %v5036_v58  ;;  %v5038_v12 = vmul.f32 -1.442695, %v6661_v3  ;;  %v1079_v15 = vmul.f32 %v6566_v23, %v1008_v4 }
  0xb8   : > { %v5696_v16 = vpop.eup %5695  ;;  %v1328_v17 = vmul.f32 %v5694_v10, %v6596_v45  ;;  %5713 = vrcp.f32 %v1235_v29  ;;  %v1078_v30 = vmul.f32 %v6566_v23, %v1003_v5  ;;  %v1353_v38 = vpack.c.bf16 %v1324_v7, %v1323_v6 }
  0xb9   : > { %v5698_v18 = vpop.eup %5697  ;;  %v1327_v19 = vmul.f32 %v5696_v16, %v6599_v46  ;;  %5715 = vrcp.f32 %v1238_v11  ;;  %v6672_v20 = vadd.f32 %v6571_v24, %v1079_v15  ;;  %v1018_v21 = vpop.permute.xlu1 %1017 }
  0xba   : > { %v1013_v22 = vpop.permute.xlu0 %1012  ;;  %v5700_v25 = vpop.eup %5699  ;;  %v1237_v26 = vadd.f32 1.0, %v5698_v18  ;;  %5717 = vpow2.f32 %v5039_v37  ;;  %v6675_v31 = vadd.f32 %v6571_v24, %v1078_v30  ;;  %5315 = vmatprep.mubr.msk.bf16.mxu1 %vm1406_vm2, %v1353_v38  ;;  %v1081_v45 = vmul.f32 %v6566_v23, %v1018_v21 }
  0xbb   : > { %v5702_v32 = vpop.eup %5701  ;;  %v1355_v33 = vpack.c.bf16 %v1328_v17, %v1327_v19  ;;  %v1240_v34 = vadd.f32 1.0, %v5700_v25  ;;  %5719 = vpow2.f32 %v5038_v12  ;;  %v5041_v46 = vmul.f32 -1.442695, %v6672_v20  ;;  %5316 = vmatmul.mubr.msk.bf16.vlgmr.msra.gmra.mrb[0].mxu1 %vm1406_vm2, %v1354_v9 }
  0xbc   : > { %v5704_v35 = vpop.eup %5703  ;;  %5721 = vrcp.f32 %v1237_v26  ;;  %v5040_v36 = vmul.f32 -1.442695, %v6675_v31  ;;  %v6683_v39 = vadd.f32 %v6571_v24, %v1081_v45  ;;  %v1330_v40 = vmul.f32 %v5702_v32, %v6606_v53 }
  0xbd   : > { %5723 = vrcp.f32 %v1240_v34  ;;  %v1239_v41 = vadd.f32 1.0, %v5704_v35  ;;  %v1080_v42 = vmul.f32 %v6566_v23, %v1013_v22  ;;  %5319 = vmatprep.mubr.msk.bf16.mxu1 %vm1406_vm2, %v1355_v33  ;;  %v1028_v44 = vpop.permute.xlu1 %1027 }
  0xbe   : > { %v1023_v48 = vpop.permute.xlu0 %1022  ;;  %v5706_v49 = vpop.eup %5705  ;;  %5725 = vpow2.f32 %v5041_v46  ;;  %v5043_v50 = vmul.f32 -1.442695, %v6683_v39  ;;  %v1083_v51 = vmul.f32 %v6566_v23, %v1028_v44 }
  0xbf   : > { %v1082_v52 = vmul.f32 %v6566_v23, %v1023_v48  ;;  %v5708_v55 = vpop.eup %5707  ;;  %v1329_v56 = vmul.f32 %v5706_v49, %v6609_v54  ;;  %5727 = vrcp.f32 %v1239_v41  ;;  %v6693_v53 = vadd.f32 %v6571_v24, %v1080_v42 }
  0xc0   : > { %v5710_v57 = vpop.eup %5709  ;;  %v1332_v58 = vmul.f32 %v5708_v55, %v6616_v1  ;;  %5729 = vpow2.f32 %v5040_v36  ;;  %v6697_v59 = vadd.f32 %v6571_v24, %v1083_v51 }
  0xc1   : > { %v6700_v60 = vadd.f32 %v6571_v24, %v1082_v52  ;;  %v5712_v61 = vpop.eup %5711  ;;  %v1356_v62 = vpack.c.bf16 %v1330_v40, %v1329_v56  ;;  %v1242_v0 = vadd.f32 1.0, %v5710_v57  ;;  %5731 = vpow2.f32 %v5043_v50  ;;  %v898_v4 = vpop.permute.xlu1 %897 }
  0xc2   : > { %v5042_v54 = vmul.f32 -1.442695, %v6693_v53  ;;  %v893_v5 = vpop.permute.xlu0 %892  ;;  %v5714_v6 = vpop.eup %5713  ;;  %v1241_v7 = vadd.f32 1.0, %v5712_v61  ;;  %v5045_v8 = vmul.f32 -1.442695, %v6697_v59  ;;  %v1057_v1 = vmul.f32 %v6566_v23, %v898_v4 }
  0xc3   : > { %v5716_v9 = vpop.eup %5715  ;;  %v1331_v29 = vmul.f32 %v5714_v6, %v6619_v2  ;;  %5733 = vrcp.f32 %v1242_v0  ;;  %5320 = vmatmul.mubr.msk.bf16.gmra.mrb[4].mxu1 %vm1406_vm2, %v1356_v62  ;;  %v1056_v37 = vmul.f32 %v6566_v23, %v893_v5  ;;  %v5044_v12 = vmul.f32 -1.442695, %v6700_v60 }
  0xc4   : > { %v5718_v10 = vpop.eup %5717  ;;  %v1334_v11 = vmul.f32 %v5716_v9, %v6626_v13  ;;  %5735 = vrcp.f32 %v1241_v7  ;;  %v6711_v15 = vadd.f32 %v6571_v24, %v1057_v1 }
  0xc5   : > { %v5720_v16 = vpop.eup %5719  ;;  %v1357_v17 = vpack.c.bf16 %v1332_v58, %v1331_v29  ;;  %v1244_v30 = vadd.f32 1.0, %v5718_v10  ;;  %5737 = vpow2.f32 %v5042_v54  ;;  %v6714_v2 = vadd.f32 %v6571_v24, %v1056_v37  ;;  %v1038_v38 = vpop.permute.xlu1 %1037 }
  0xc6   : > { %v1033_v18 = vpop.permute.xlu0 %1032  ;;  %v5722_v19 = vpop.eup %5721  ;;  %v1243_v21 = vadd.f32 1.0, %v5720_v16  ;;  %5739 = vpow2.f32 %v5045_v8  ;;  %v5019_v13 = vmul.f32 -1.442695, %v6711_v15  ;;  %v1085_v22 = vmul.f32 %v6566_v23, %v1038_v38 }
  0xc7   : > { %v5724_v25 = vpop.eup %5723  ;;  %v1333_v26 = vmul.f32 %v5722_v19, %v6629_v14  ;;  %5741 = vrcp.f32 %v1244_v30  ;;  %5323 = vmatprep.mubr.msk.bf16.mxu1 %vm1406_vm2, %v1357_v17  ;;  %v1084_v45 = vmul.f32 %v6566_v23, %v1033_v18  ;;  %v5018_v34 = vmul.f32 -1.442695, %v6714_v2 }
  0xc8   : > { %v5726_v32 = vpop.eup %5725  ;;  %v1336_v33 = vmul.f32 %v5724_v25, %v6636_v27  ;;  %5743 = vrcp.f32 %v1243_v21  ;;  %v6724_v46 = vadd.f32 %v6571_v24, %v1085_v22 }
  0xc9   : > { %v5728_v35 = vpop.eup %5727  ;;  %v1358_v36 = vpack.c.bf16 %v1334_v11, %v1333_v26  ;;  %v1246_v40 = vadd.f32 1.0, %v5726_v32  ;;  %5745 = vpow2.f32 %v5044_v12  ;;  %v6727_v14 = vadd.f32 %v6571_v24, %v1084_v45  ;;  %v908_v41 = vpop.permute.xlu1 %907 }
  0xca   : > { %v903_v42 = vpop.permute.xlu0 %902  ;;  %v5730_v44 = vpop.eup %5729  ;;  %v1335_v48 = vmul.f32 %v5728_v35, %v6639_v28  ;;  %5747 = vpow2.f32 %v5019_v13  ;;  %v5047_v27 = vmul.f32 -1.442695, %v6724_v46  ;;  %v1059_v49 = vmul.f32 %v6566_v23, %v908_v41 }
  0xcb   : > { %v5732_v50 = vpop.eup %5731  ;;  %5749 = vrcp.f32 %v1246_v40  ;;  %v1245_v51 = vadd.f32 1.0, %v5730_v44  ;;  %v5046_v52 = vmul.f32 -1.442695, %v6727_v14  ;;  %5324 = vmatmul.mubr.msk.bf16.gmra.mrb[8].mxu1 %vm1406_vm2, %v1358_v36  ;;  %v1058_v55 = vmul.f32 %v6566_v23, %v903_v42 }
  0xcc   : > { %v1359_v56 = vpack.c.bf16 %v1336_v33, %v1335_v48  ;;  %v1248_v57 = vadd.f32 1.0, %v5732_v50  ;;  %5751 = vpow2.f32 %v5018_v34  ;;  %v6736_v58 = vadd.f32 %v6571_v24, %v1059_v49 }
  0xcd   : > { %v5734_v28 = vpop.eup %5733  ;;  %5753 = vrcp.f32 %v1245_v51  ;;  %v6739_v61 = vadd.f32 %v6571_v24, %v1058_v55  ;;  %v1048_v62 = vpop.permute.xlu1 %1047 }
  0xce   : > { %v1043_v0 = vpop.permute.xlu0 %1042  ;;  %v5736_v54 = vpop.eup %5735  ;;  %v1338_v4 = vmul.f32 %v5734_v28, %v6646_v43  ;;  %5755 = vrcp.f32 %v1248_v57  ;;  %v5021_v5 = vmul.f32 -1.442695, %v6736_v58  ;;  %5327 = vmatprep.mubr.msk.bf16.mxu1 %vm1406_vm2, %v1359_v56  ;;  %v1087_v6 = vmul.f32 %v6566_v23, %v1048_v62 }
  0xcf   : > { %v5738_v7 = vpop.eup %5737  ;;  %v1337_v8 = vmul.f32 %v5736_v54, %v6649_v47  ;;  %5757 = vpow2.f32 %v5047_v27  ;;  %v1086_v1 = vmul.f32 %v6566_v23, %v1043_v0  ;;  %v5020_v37 = vmul.f32 -1.442695, %v6739_v61 }
  0xd0   : > { %v5740_v9 = vpop.eup %5739  ;;  %v1247_v29 = vadd.f32 1.0, %v5738_v7  ;;  %5759 = vpow2.f32 %v5046_v52  ;;  %v6749_v43 = vadd.f32 %v6571_v24, %v1087_v6 }
  0xd1   : > { %v5742_v10 = vpop.eup %5741  ;;  %v1360_v11 = vpack.c.bf16 %v1338_v4, %v1337_v8  ;;  %v1250_v12 = vadd.f32 1.0, %v5740_v9  ;;  %5761 = vpow2.f32 %v5021_v5  ;;  %v6752_v16 = vadd.f32 %v6571_v24, %v1086_v1 }
  0xd2   : > { %v5744_v17 = vpop.eup %5743  ;;  %v1340_v47 = vmul.f32 %v5742_v10, %v6658_v63  ;;  %5763 = vrcp.f32 %v1247_v29  ;;  %v5049_v23 = vmul.f32 -1.442695, %v6749_v43 }
  0xd3   : > { %v5746_v30 = vpop.eup %5745  ;;  %v1339_v38 = vmul.f32 %v5744_v17, %v6661_v3  ;;  %5765 = vrcp.f32 %v1250_v12  ;;  %5328 = vmatmul.mubr.msk.bf16.gmra.mrb[12].mxu1 %vm1406_vm2, %v1360_v11  ;;  %v5048_v21 = vmul.f32 -1.442695, %v6752_v16 }
  0xd4   : > { %v5748_v18 = vpop.eup %5747  ;;  %v1249_v19 = vadd.f32 1.0, %v5746_v30  ;;  %5767 = vpow2.f32 %v5020_v37 }
  0xd5   : > { %v5750_v13 = vpop.eup %5749  ;;  %v1361_v24 = vpack.c.bf16 %v1340_v47, %v1339_v38  ;;  %v1224_v22 = vadd.f32 1.0, %v5748_v18  ;;  %5769 = vpow2.f32 %v5049_v23 }
  0xd6   : > { %v5752_v25 = vpop.eup %5751  ;;  %v1342_v63 = vmul.f32 %v5750_v13, %v6672_v20  ;;  %5771 = vrcp.f32 %v1249_v19 }
  0xd7   : > { %v5754_v26 = vpop.eup %5753  ;;  %5773 = vrcp.f32 %v1224_v22  ;;  %v1223_v45 = vadd.f32 1.0, %v5752_v25  ;;  %5331 = vmatprep.mubr.msk.bf16.mxu1 %vm1406_vm2, %v1361_v24 }
  0xd8   : > { %v5756_v3 = vpop.eup %5755  ;;  %v1341_v32 = vmul.f32 %v5754_v26, %v6675_v31  ;;  %5775 = vpow2.f32 %v5048_v21 }
  0xd9   : > { %v5758_v33 = vpop.eup %5757  ;;  %5777 = vrcp.f32 %v1223_v45  ;;  %v1344_v41 = vmul.f32 %v5756_v3, %v6683_v39 }
  0xda   : > { %v5760_v34 = vpop.eup %5759  ;;  %v1362_v35 = vpack.c.bf16 %v1342_v63, %v1341_v32  ;;  %v1252_v36 = vadd.f32 1.0, %v5758_v33 }
  0xdb   : > { %v5762_v40 = vpop.eup %5761  ;;  %v1251_v42 = vadd.f32 1.0, %v5760_v34 }
  0xdc   : > { %v5764_v20 = vpop.eup %5763  ;;  %5779 = vrcp.f32 %v1252_v36  ;;  %v1226_v44 = vadd.f32 1.0, %v5762_v40  ;;  %5332 = vmatmul.mubr.msk.bf16.gmra.mrb[16].mxu1 %vm1406_vm2, %v1362_v35 }
  0xdd   : > { %v5766_v48 = vpop.eup %5765  ;;  %v1343_v27 = vmul.f32 %v5764_v20, %v6693_v53  ;;  %5781 = vrcp.f32 %v1251_v42  ;;  %v6816_v42 = vld [vmem:[%s9789_s3] ss:$0 sm:$0xff] }
  0xde   : > { %v5768_v31 = vpop.eup %5767  ;;  %5783 = vrcp.f32 %v1226_v44  ;;  %v1346_v51 = vmul.f32 %v5766_v48, %v6697_v59  ;;  %v6823_v48 = vld [vmem:[%s9793_s7] ss:$0 sm:$0xff] }
  0xdf   : > { %v5770_v49 = vpop.eup %5769  ;;  %v1363_v50 = vpack.c.bf16 %v1344_v41, %v1343_v27  ;;  %v1225_v52 = vadd.f32 1.0, %v5768_v31 }
  0xe0   : > { %v5772_v55 = vpop.eup %5771  ;;  %v1254_v56 = vadd.f32 1.0, %v5770_v49 }
  0xe1   : > { %v5774_v39 = vpop.eup %5773  ;;  %v1345_v57 = vmul.f32 %v5772_v55, %v6700_v60  ;;  %5785 = vrcp.f32 %v1225_v52  ;;  %5335 = vmatprep.mubr.msk.bf16.mxu1 %vm1406_vm2, %v1363_v50 }
  0xe2   : > { %v5776_v28 = vpop.eup %5775  ;;  %v1320_v62 = vmul.f32 %v5774_v39, %v6711_v15  ;;  %5787 = vrcp.f32 %v1254_v56 }
  0xe3   : > { %v5778_v53 = vpop.eup %5777  ;;  %v1364_v0 = vpack.c.bf16 %v1346_v51, %v1345_v57  ;;  %v1253_v54 = vadd.f32 1.0, %v5776_v28 }
  0xe4   : > { %v1319_v4 = vmul.f32 %v5778_v53, %v6714_v2 }
  0xe5   : > { %5789 = vrcp.f32 %v1253_v54  ;;  %5336 = vmatmul.mubr.msk.bf16.gmra.mrb[20].mxu1 %vm1406_vm2, %v1364_v0 }
  0xe6   : > { %v5780_v59 = vpop.eup %5779  ;;  %v1351_v5 = vpack.c.bf16 %v1320_v62, %v1319_v4 }
  0xe7   : > { %v5782_v6 = vpop.eup %5781  ;;  %v1348_v60 = vmul.f32 %v5780_v59, %v6724_v46 }
  0xe8   : > { %v5784_v7 = vpop.eup %5783  ;;  %v1347_v8 = vmul.f32 %v5782_v6, %v6727_v14  ;;  %5311 = vmatprep.mubr.msk.bf16.mxu0 %vm1406_vm2, %v1351_v5 }
  0xe9   : > { %v1322_v1 = vmul.f32 %v5784_v7, %v6736_v58 }
  0xea   : > { %v1365_v15 = vpack.c.bf16 %v1348_v60, %v1347_v8 }
  0xeb   : > { %v5786_v9 = vpop.eup %5785 }
  0xec   : > { %v5788_v29 = vpop.eup %5787  ;;  %v1321_v2 = vmul.f32 %v5786_v9, %v6739_v61  ;;  %5339 = vmatprep.mubr.msk.bf16.mxu1 %vm1406_vm2, %v1365_v15 }
  0xed   : > { %v1350_v10 = vmul.f32 %v5788_v29, %v6749_v43 }
  0xee   : > { %v1352_v37 = vpack.c.bf16 %v1322_v1, %v1321_v2 }
  0xef   : > { %v5790_v11 = vpop.eup %5789 }
  0xf0   : > { %v1349_v46 = vmul.f32 %v5790_v11, %v6752_v16  ;;  %5312 = vmatmul.mubr.msk.bf16.vlgmr.msra.gmra.mrb[0].mxu0 %vm1406_vm2, %v1352_v37 }
  0xf2   : > { %v1366_v14 = vpack.c.bf16 %v1350_v10, %v1349_v46 }
  0xf4   : > { %5340 = vmatmul.mubr.msk.bf16.gmra.mrb[24].mxu1 %vm1406_vm2, %v1366_v14 }
  0xf7   : > { %v5277_v12 = vpop.f32.mrb[4].mxu0 }
  0xf8   : > { %v746_v17 = vpop.f32.mrb[5].mxu0  ;;  %v755_v20 = vadd.f32 %v5277_v12, %v6816_v42 }
  0xf9   : > { %v5278_v58 = vpop.f32.mrb[6].mxu0  ;;  %v747_v44 = vadd.f32 %v6816_v42, %v746_v17 }
  0xfa   : > { %v749_v47 = vpop.f32.mrb[7].mxu0  ;;  %v758_v27 = vadd.f32 %v5278_v58, %v6816_v42  ;;  %v5528_v49 = vadd.f32 %v6823_v48, %v755_v20 }
  0xfb   : > { %v750_v31 = vadd.f32 %v6816_v42, %v749_v47  ;;  %v5531_v50 = vadd.f32 %v6823_v48, %v747_v44 }
  0xfc   : > { %v5534_v51 = vadd.f32 %v6823_v48, %v758_v27 }
  0xfd   : > { %v5537_v55 = vadd.f32 %v6823_v48, %v750_v31 }
  0xff   : > { %v5281_v23 = vpop.f32.mrb[8].mxu0 }
 0x100   : > { %v762_v30 = vpop.f32.mrb[9].mxu0  ;;  %v771_v57 = vadd.f32 %v5281_v23, %v6816_v42 }
 0x101   : > { %v5282_v61 = vpop.f32.mrb[10].mxu0  ;;  %v763_v53 = vadd.f32 %v6816_v42, %v762_v30 }
 0x102   : > { %v765_v38 = vpop.f32.mrb[11].mxu0  ;;  %v774_v4 = vadd.f32 %v5282_v61, %v6816_v42  ;;  %v5540_v6 = vadd.f32 %v6823_v48, %v771_v57 }
 0x103   : > { %v766_v5 = vadd.f32 %v6816_v42, %v765_v38  ;;  %v5543_v60 = vadd.f32 %v6823_v48, %v763_v53 }
 0x104   : > { %v5546_v7 = vadd.f32 %v6823_v48, %v774_v4 }
 0x105   : > { %v5549_v15 = vadd.f32 %v6823_v48, %v766_v5 }
 0x107   : > { %v5285_v18 = vpop.f32.mrb[12].mxu0 }
 0x108   : > { %v778_v19 = vpop.f32.mrb[13].mxu0  ;;  %v787_v29 = vadd.f32 %v5285_v18, %v6816_v42 }
 0x109   : > { %v5286_v21 = vpop.f32.mrb[14].mxu0  ;;  %v779_v10 = vadd.f32 %v6816_v42, %v778_v19 }
 0x10a   : > { %v781_v43 = vpop.f32.mrb[15].mxu0  ;;  %v790_v14 = vadd.f32 %v5286_v21, %v6816_v42  ;;  %v5552_v58 = vadd.f32 %v6823_v48, %v787_v29 }
 0x10b   : > { %v782_v17 = vadd.f32 %v6816_v42, %v781_v43  ;;  %v5555_v47 = vadd.f32 %v6823_v48, %v779_v10 }
 0x10c   : > { %v5558_v23 = vadd.f32 %v6823_v48, %v790_v14 }
 0x10d   : > { %v5561_v61 = vadd.f32 %v6823_v48, %v782_v17 }
 0x10f   : > { %v6781_v13 = vpop.f32.mrb[16].mxu0 }
 0x110   : > { %v6783_v16 = vpop.f32.mrb[17].mxu0  ;;  %v803_v19 = vadd.f32 %v6781_v13, %v6816_v42 }
 0x111   : > { %v6785_v24 = vpop.f32.mrb[18].mxu0  ;;  %v795_v20 = vadd.f32 %v6816_v42, %v6783_v16 }
 0x112   : > { %v6787_v22 = vpop.f32.mrb[19].mxu0  ;;  %v806_v31 = vadd.f32 %v6785_v24, %v6816_v42  ;;  %v5564_v13 = vadd.f32 %v6823_v48, %v803_v19 }
 0x113   : > { %v5567_v16 = vadd.f32 %v6823_v48, %v795_v20 }
 0x117   : > { %v6789_v25 = vpop.f32.mrb[20].mxu0 }
 0x118   : > { %v6791_v63 = vpop.f32.mrb[21].mxu0 }
 0x119   : > { %v6793_v26 = vpop.f32.mrb[22].mxu0  ;;  %v811_v53 = vadd.f32 %v6816_v42, %v6791_v63 }
 0x11a   : > { %v6795_v45 = vpop.f32.mrb[23].mxu0 }
 0x11b   : > { %v814_v4 = vadd.f32 %v6816_v42, %v6795_v45 }
 0x11f   : > { %v6797_v3 = vpop.f32.mrb[24].mxu0 }
 0x120   : > { %v6799_v32 = vpop.f32.mrb[25].mxu0 }
 0x121   : > { %v6801_v33 = vpop.f32.mrb[26].mxu0 }
 0x122   : > { %v6803_v34 = vpop.f32.mrb[27].mxu0 }
 0x127   : > { %v6805_v35 = vpop.f32.mrb[28].mxu0 }
 0x128   : > { %v6807_v36 = vpop.f32.mrb[29].mxu0 }
 0x129   : > { %v6809_v40 = vpop.f32.mrb[30].mxu0 }
 0x12a   : > { %v6811_v41 = vpop.f32.mrb[31].mxu0 }
 0x18e   : > { %v5317_v52 = vpop.f32.mrb[0].mxu1 }
 0x18f   : > { %v5529_v56 = vadd.f32 %v5528_v49, %v5317_v52  ;;  %v1505_v39 = vpop.f32.mrb[1].mxu1 }
 0x190   : > { %v5532_v28 = vadd.f32 %v5531_v50, %v1505_v39  ;;  %v5318_v62 = vpop.f32.mrb[2].mxu1  ;;  %v798_v50 = vadd.f32 %v6816_v42, %v6787_v22  ;;  %v819_v22 = vadd.f32 %v6789_v25, %v6816_v42 }
 0x191   : > { %1654 = vst.msk [vmem:[#allocation2 + $0x30] sm:$0xff] %vm1406_vm2, %v5529_v56  ;;  %v5535_v0 = vadd.f32 %v5534_v51, %v5318_v62  ;;  %v1508_v54 = vpop.f32.mrb[3].mxu1  ;;  %v5570_v51 = vadd.f32 %v6823_v48, %v806_v31 }
 0x192   : > { %1652 = vst.msk [vmem:[#allocation2 + $0x20] sm:$0xff] %vm1406_vm2, %v5532_v28  ;;  %v5538_v59 = vadd.f32 %v5537_v55, %v1508_v54  ;;  %v5573_v55 = vadd.f32 %v6823_v48, %v798_v50  ;;  %v822_v54 = vadd.f32 %v6793_v26, %v6816_v42  ;;  %v5576_v25 = vadd.f32 %v6823_v48, %v819_v22 }
 0x193   : > { %1655 = vst.msk [vmem:[#allocation2 + $0x38] sm:$0xff] %vm1406_vm2, %v5535_v0 }
 0x194   : > { %1653 = vst.msk [vmem:[#allocation2 + $0x28] sm:$0xff] %vm1406_vm2, %v5538_v59  ;;  %v5579_v59 = vadd.f32 %v6823_v48, %v811_v53  ;;  %v5582_v5 = vadd.f32 %v6823_v48, %v822_v54 }
 0x196   : > { %v5321_v8 = vpop.f32.mrb[4].mxu1 }
 0x197   : > { %v5541_v1 = vadd.f32 %v5540_v6, %v5321_v8  ;;  %v1521_v9 = vpop.f32.mrb[5].mxu1  ;;  %v5585_v6 = vadd.f32 %v6823_v48, %v814_v4 }
 0x198   : > { %v5544_v2 = vadd.f32 %v5543_v60, %v1521_v9  ;;  %v5322_v37 = vpop.f32.mrb[6].mxu1  ;;  %v827_v9 = vadd.f32 %v6816_v42, %v6799_v32 }
 0x199   : > { %1658 = vst.msk [vmem:[#allocation2 + $0x50] sm:$0xff] %vm1406_vm2, %v5541_v1  ;;  %v5547_v11 = vadd.f32 %v5546_v7, %v5322_v37  ;;  %v1524_v46 = vpop.f32.mrb[7].mxu1  ;;  %v830_v37 = vadd.f32 %v6816_v42, %v6803_v34 }
 0x19a   : > { %1656 = vst.msk [vmem:[#allocation2 + $0x40] sm:$0xff] %vm1406_vm2, %v5544_v2  ;;  %v5550_v12 = vadd.f32 %v5549_v15, %v1524_v46  ;;  %v835_v15 = vadd.f32 %v6797_v3, %v6816_v42  ;;  %v838_v2 = vadd.f32 %v6801_v33, %v6816_v42  ;;  %v5591_v10 = vadd.f32 %v6823_v48, %v827_v9 }
 0x19b   : > { %1659 = vst.msk [vmem:[#allocation2 + $0x58] sm:$0xff] %vm1406_vm2, %v5547_v11  ;;  %v5597_v46 = vadd.f32 %v6823_v48, %v830_v37 }
 0x19c   : > { %1657 = vst.msk [vmem:[#allocation2 + $0x48] sm:$0xff] %vm1406_vm2, %v5550_v12  ;;  %v5588_v3 = vadd.f32 %v6823_v48, %v835_v15  ;;  %v5594_v11 = vadd.f32 %v6823_v48, %v838_v2 }
 0x19e   : > { %v5325_v30 = vpop.f32.mrb[8].mxu1 }
 0x19f   : > { %v5553_v38 = vadd.f32 %v5552_v58, %v5325_v30  ;;  %v1537_v18 = vpop.f32.mrb[9].mxu1  ;;  %v5525_v30 = vadd.f32 %v6823_v48, %v6816_v42 }
 0x1a0   : > { %v5556_v21 = vadd.f32 %v5555_v47, %v1537_v18  ;;  %v5326_v43 = vpop.f32.mrb[10].mxu1  ;;  %v854_v18 = vadd.f32 %v6809_v40, %v6816_v42 }
 0x1a1   : > { %1662 = vst.msk [vmem:[#allocation2 + $0x70] sm:$0xff] %vm1406_vm2, %v5553_v38  ;;  %v5559_v44 = vadd.f32 %v5558_v23, %v5326_v43  ;;  %v1540_v27 = vpop.f32.mrb[11].mxu1  ;;  %v851_v23 = vadd.f32 %v6805_v35, %v6816_v42  ;;  %v846_v43 = vadd.f32 %v6816_v42, %v6811_v41 }
 0x1a2   : > { %1660 = vst.msk [vmem:[#allocation2 + $0x60] sm:$0xff] %vm1406_vm2, %v5556_v21  ;;  %v5562_v49 = vadd.f32 %v5561_v61, %v1540_v27  ;;  %v843_v61 = vadd.f32 %v6816_v42, %v6807_v36 }
 0x1a3   : > { %1663 = vst.msk [vmem:[#allocation2 + $0x78] sm:$0xff] %vm1406_vm2, %v5559_v44 }
 0x1a4   : > { %1661 = vst.msk [vmem:[#allocation2 + $0x68] sm:$0xff] %vm1406_vm2, %v5562_v49  ;;  %v5600_v49 = vadd.f32 %v6823_v48, %v851_v23  ;;  %v5603_v40 = vadd.f32 %v6823_v48, %v843_v61 }
 0x1a6   : > { %v5329_v52 = vpop.f32.mrb[12].mxu1 }
 0x1a7   : > { %v5565_v24 = vadd.f32 %v5564_v13, %v5329_v52  ;;  %v1553_v56 = vpop.f32.mrb[13].mxu1 }
 0x1a8   : > { %v5568_v39 = vadd.f32 %v5567_v16, %v1553_v56  ;;  %v5330_v57 = vpop.f32.mrb[14].mxu1 }
 0x1a9   : > { %1666 = vst.msk [vmem:[#allocation2 + $0x90] sm:$0xff] %vm1406_vm2, %v5565_v24  ;;  %v5571_v28 = vadd.f32 %v5570_v51, %v5330_v57  ;;  %v1556_v62 = vpop.f32.mrb[15].mxu1 }
 0x1aa   : > { %1664 = vst.msk [vmem:[#allocation2 + $0x80] sm:$0xff] %vm1406_vm2, %v5568_v39  ;;  %v5574_v0 = vadd.f32 %v5573_v55, %v1556_v62  ;;  %v5609_v55 = vadd.f32 %v6823_v48, %v846_v43 }
 0x1ab   : > { %1667 = vst.msk [vmem:[#allocation2 + $0x98] sm:$0xff] %vm1406_vm2, %v5571_v28 }
 0x1ac   : > { %1665 = vst.msk [vmem:[#allocation2 + $0x88] sm:$0xff] %vm1406_vm2, %v5574_v0 }
 0x1af   : > { %v5333_v63 = vpop.f32.mrb[16].mxu1 }
 0x1b0   : > { %v5577_v60 = vadd.f32 %v5576_v25, %v5333_v63  ;;  %v1569_v7 = vpop.f32.mrb[17].mxu1 }
 0x1b1   : > { %v5580_v8 = vadd.f32 %v5579_v59, %v1569_v7  ;;  %v5334_v26 = vpop.f32.mrb[18].mxu1 }
 0x1b2   : > { %1670 = vst.msk [vmem:[#allocation2 + $0xb0] sm:$0xff] %vm1406_vm2, %v5577_v60  ;;  %v5583_v45 = vadd.f32 %v5582_v5, %v5334_v26  ;;  %v1572_v1 = vpop.f32.mrb[19].mxu1 }
 0x1b3   : > { %1668 = vst.msk [vmem:[#allocation2 + $0xa0] sm:$0xff] %vm1406_vm2, %v5580_v8  ;;  %v5586_v29 = vadd.f32 %v5585_v6, %v1572_v1 }
 0x1b4   : > { %1671 = vst.msk [vmem:[#allocation2 + $0xb8] sm:$0xff] %vm1406_vm2, %v5583_v45 }
 0x1b5   : > { %1669 = vst.msk [vmem:[#allocation2 + $0xa8] sm:$0xff] %vm1406_vm2, %v5586_v29 }
 0x1b8   : > { %v5337_v32 = vpop.f32.mrb[20].mxu1 }
 0x1b9   : > { %v5589_v14 = vadd.f32 %v5588_v3, %v5337_v32  ;;  %v1585_v12 = vpop.f32.mrb[21].mxu1 }
 0x1ba   : > { %v5592_v17 = vadd.f32 %v5591_v10, %v1585_v12  ;;  %v5338_v33 = vpop.f32.mrb[22].mxu1 }
 0x1bb   : > { %1674 = vst.msk [vmem:[#allocation2 + $0xd0] sm:$0xff] %vm1406_vm2, %v5589_v14  ;;  %v5595_v58 = vadd.f32 %v5594_v11, %v5338_v33  ;;  %v1588_v47 = vpop.f32.mrb[23].mxu1 }
 0x1bc   : > { %1672 = vst.msk [vmem:[#allocation2 + $0xc0] sm:$0xff] %vm1406_vm2, %v5592_v17  ;;  %v5598_v34 = vadd.f32 %v5597_v46, %v1588_v47 }
 0x1bd   : > { %1675 = vst.msk [vmem:[#allocation2 + $0xd8] sm:$0xff] %vm1406_vm2, %v5595_v58 }
 0x1be   : > { %1673 = vst.msk [vmem:[#allocation2 + $0xc8] sm:$0xff] %vm1406_vm2, %v5598_v34 }
 0x1c3   : > { %v5313_v38 = vpop.f32.mrb[0].mxu0 }
 0x1c4   : > { %v5519_v19 = vadd.f32 %v5313_v38, %v6816_v42  ;;  %v1489_v21 = vpop.f32.mrb[1].mxu0 }
 0x1c5   : > { %v5521_v20 = vadd.f32 %v6816_v42, %v1489_v21  ;;  %v5314_v44 = vpop.f32.mrb[2].mxu0  ;;  %v5606_v42 = vadd.f32 %v6823_v48, %v854_v18 }
 0x1c6   : > { %v5520_v35 = vadd.f32 %v5519_v19, %v6823_v48  ;;  %v5524_v27 = vadd.f32 %v5525_v30, %v5314_v44  ;;  %v1492_v31 = vpop.f32.mrb[3].mxu0 }
 0x1c7   : > { %v5522_v36 = vadd.f32 %v5521_v20, %v6823_v48  ;;  %v5526_v50 = vadd.f32 %v5525_v30, %v1492_v31  ;;  %v5341_v13 = vpop.f32.mrb[24].mxu1 }
 0x1c8   : > { %1650 = vst.msk [vmem:[#allocation2 + $0x10] sm:$0xff] %vm1406_vm2, %v5520_v35  ;;  %1651 = vst.msk [vmem:[#allocation2 + $0x18] sm:$0xff] %vm1406_vm2, %v5524_v27  ;;  %v5601_v41 = vadd.f32 %v5600_v49, %v5341_v13  ;;  %v1601_v16 = vpop.f32.mrb[25].mxu1 }
 0x1c9   : > { %1648 = vst.msk [vmem:[#allocation2] sm:$0xff] %vm1406_vm2, %v5522_v36  ;;  %1649 = vst.msk [vmem:[#allocation2 + $0x8] sm:$0xff] %vm1406_vm2, %v5526_v50  ;;  %v5604_v51 = vadd.f32 %v5603_v40, %v1601_v16  ;;  %v5342_v52 = vpop.f32.mrb[26].mxu1 }
 0x1ca   : > { %1678 = vst.msk [vmem:[#allocation2 + $0xf0] sm:$0xff] %vm1406_vm2, %v5601_v41  ;;  %v5607_v24 = vadd.f32 %v5606_v42, %v5342_v52  ;;  %v1604_v56 = vpop.f32.mrb[27].mxu1 }
 0x1cb   : > { %1676 = vst.msk [vmem:[#allocation2 + $0xe0] sm:$0xff] %vm1406_vm2, %v5604_v51  ;;  %v5610_v39 = vadd.f32 %v5609_v55, %v1604_v56 }
 0x1cc   : > { %1679 = vst.msk [vmem:[#allocation2 + $0xf8] sm:$0xff] %vm1406_vm2, %v5607_v24 }
 0x1cd   : > { %1677 = vst.msk [vmem:[#allocation2 + $0xe8] sm:$0xff] %vm1406_vm2, %v5610_v39 }
 0x1ce PF: > { %v5791_v57 = vld [vmem:[%s6322_s22] sm:$0xff]   ;;  %v5792_v22 = vld [vmem:[%s6322_s22 + $0x8] sm:$0xff]   ;;  %v5793_v48 = vld [vmem:[%s6322_s22 + $0x10] sm:$0xff]   ;;  %vm1765_vm3 = vcmask 523264   ;;  %v1737_v50 = vlaneseq  ;;  %p5119_p6 = scmp.ne.s32.totalorder %s6211_s29, 1 }
 0x1cf   : > { %5343 = vmatprep.subr.bf16.mxu0 %v5791_v57  ;;  %5615 = vmatprep.subr.bf16.mxu1 %v5791_v57  ;;  %v5794_v0 = vld [vmem:[%s6322_s22 + $0x18] sm:$0xff]   ;;  %v6944_v54 = vld [vmem:[#allocation2 + $0x80] sm:$0xff]  ;;  %v6946_v4 = vld [vmem:[#allocation2 + $0x88] sm:$0xff] }
 0x1d0   : > { %5344 = vmatpush3.bf16.msra.mxu0 %v5791_v57  ;;  %5619 = vmatpush3.bf16.msra.mxu1 %v5791_v57  ;;  %v6936_v28 = vld [vmem:[#allocation2] sm:$0xff]  ;;  %v6938_v62 = vld [vmem:[#allocation2 + $0x8] sm:$0xff]  ;;  %v1721_v25 = vpack.c.bf16 %v6946_v4, %v6944_v54  ;;  %v6950_v59 = vld [vmem:[#allocation2 + $0x10] sm:$0xff]  ;;  %v7050_v13 = vshrl.u32 %v1737_v50, 7 }
 0x1d1   : > { %5345 = vmatprep.subr.bf16.mxu0 %v5792_v22  ;;  %5616 = vmatprep.subr.bf16.mxu1 %v5792_v22  ;;  %v1713_v53 = vpack.c.bf16 %v6938_v62, %v6936_v28  ;;  %v6952_v5 = vld [vmem:[#allocation2 + $0x18] sm:$0xff]  ;;  %v6954_v63 = vld [vmem:[#allocation2 + $0x20] sm:$0xff]  ;;  %v6956_v6 = vld [vmem:[#allocation2 + $0x28] sm:$0xff] }
 0x1d2   : > { %v6958_v60 = vld [vmem:[#allocation2 + $0x90] sm:$0xff]  ;;  %v6960_v7 = vld [vmem:[#allocation2 + $0x98] sm:$0xff]  ;;  %5367 = vmatprep.mubr.msk.bf16.mxu1 %vm1765_vm3, %v1721_v25  ;;  %v6963_v8 = vld [vmem:[#allocation2 + $0xa0] sm:$0xff]  ;;  %v1714_v15 = vpack.c.bf16 %v6952_v5, %v6950_v59  ;;  %v1715_v45 = vpack.c.bf16 %v6956_v6, %v6954_v63  ;;  %v1739_v40 = vsub.s32 0, %v7050_v13 }
 0x1d3   : > { %5351 = vmatprep.mubr.msk.bf16.mxu0 %vm1765_vm3, %v1713_v53  ;;  %v6965_v26 = vld [vmem:[#allocation2 + $0xa8] sm:$0xff]  ;;  %v1722_v1 = vpack.c.bf16 %v6960_v7, %v6958_v60  ;;  %v6975_v29 = vld [vmem:[#allocation2 + $0x30] sm:$0xff]  ;;  %v6977_v2 = vld [vmem:[#allocation2 + $0x38] sm:$0xff] }
 0x1d4   : > { %5346 = vmatpush3.bf16.msra.mxu0 %v5792_v22  ;;  %5620 = vmatpush3.bf16.msra.mxu1 %v5792_v22  ;;  %v1723_v9 = vpack.c.bf16 %v6965_v26, %v6963_v8  ;;  %v6980_v37 = vld [vmem:[#allocation2 + $0x40] sm:$0xff]  ;;  %v6982_v3 = vld [vmem:[#allocation2 + $0x48] sm:$0xff]  ;;  %v6984_v10 = vld [vmem:[#allocation2 + $0xb0] sm:$0xff]  ;;  %v1716_v14 = vpack.c.bf16 %v6977_v2, %v6975_v29 }
 0x1d5   : > { %5347 = vmatprep.subr.bf16.mxu0 %v5793_v48  ;;  %5617 = vmatprep.subr.bf16.mxu1 %v5793_v48  ;;  %v6986_v11 = vld [vmem:[#allocation2 + $0xb8] sm:$0xff]  ;;  %v6990_v32 = vld [vmem:[#allocation2 + $0xc0] sm:$0xff]  ;;  %v6992_v46 = vld [vmem:[#allocation2 + $0xc8] sm:$0xff]  ;;  %v1717_v12 = vpack.c.bf16 %v6982_v3, %v6980_v37 }
 0x1d6   : > { %v1724_v17 = vpack.c.bf16 %v6986_v11, %v6984_v10  ;;  %v1725_v33 = vpack.c.bf16 %v6992_v46, %v6990_v32  ;;  %v7005_v58 = vld [vmem:[#allocation2 + $0x50] sm:$0xff]  ;;  %v7007_v47 = vld [vmem:[#allocation2 + $0x58] sm:$0xff]  ;;  %v7009_v34 = vld [vmem:[#allocation2 + $0x60] sm:$0xff] }
 0x1d7   : > { %v7012_v23 = vld [vmem:[#allocation2 + $0x68] sm:$0xff]  ;;  %v7015_v30 = vld [vmem:[#allocation2 + $0xd0] sm:$0xff]  ;;  %v7017_v61 = vld [vmem:[#allocation2 + $0xd8] sm:$0xff]  ;;  %v1718_v19 = vpack.c.bf16 %v7007_v47, %v7005_v58 }
 0x1d8   : > { %5348 = vmatpush3.bf16.msra.mxu0 %v5793_v48  ;;  %5621 = vmatpush3.bf16.msra.mxu1 %v5793_v48  ;;  %v7019_v38 = vld [vmem:[#allocation2 + $0xe0] sm:$0xff]  ;;  %v7021_v18 = vld [vmem:[#allocation2 + $0xe8] sm:$0xff]  ;;  %v1719_v21 = vpack.c.bf16 %v7012_v23, %v7009_v34  ;;  %v1726_v43 = vpack.c.bf16 %v7017_v61, %v7015_v30  ;;  %v7033_v44 = vld [vmem:[#allocation2 + $0x70] sm:$0xff] }
 0x1d9   : > { %5349 = vmatprep.subr.bf16.mxu0 %v5794_v0  ;;  %5618 = vmatprep.subr.bf16.mxu1 %v5794_v0  ;;  %v1727_v20 = vpack.c.bf16 %v7021_v18, %v7019_v38  ;;  %v7035_v35 = vld [vmem:[#allocation2 + $0x78] sm:$0xff]  ;;  %v7039_v27 = vld [vmem:[#allocation2 + $0xf0] sm:$0xff]  ;;  %v7054_v41 = vld [vmem:[%s6337_s14] sm:$0x7f] }
 0x1da   : > { %v7041_v31 = vld [vmem:[#allocation2 + $0xf8] sm:$0xff]  ;;  %v1720_v49 = vpack.c.bf16 %v7035_v35, %v7033_v44  ;;  %v7057_v16 = vrot.slane %v7054_v41, %v1739_v40 }
 0x1db   : > { %v1728_v36 = vpack.c.bf16 %v7041_v31, %v7039_v27 }
 0x1dc   : > { %5350 = vmatpush3.bf16.msra.mxu0 %v5794_v0  ;;  %5622 = vmatpush3.bf16.msra.mxu1 %v5794_v0 }
 0x1df   : > { %5352 = vmatmul.mubr.msk.bf16.vlgmr.msra.gmra.mrb[0].mxu0 %vm1765_vm3, %v1714_v15  ;;  %5368 = vmatmul.mubr.msk.bf16.vlgmr.msra.gmra.mrb[0].mxu1 %vm1765_vm3, %v1722_v1 }
 0x1e0   : > { %5355 = vmatprep.mubr.msk.bf16.mxu0 %vm1765_vm3, %v1715_v45  ;;  %5371 = vmatprep.mubr.msk.bf16.mxu1 %vm1765_vm3, %v1723_v9 }
 0x1e7   : > { %5356 = vmatmul.mubr.msk.bf16.gmra.mrb[4].mxu0 %vm1765_vm3, %v1716_v14  ;;  %5372 = vmatmul.mubr.msk.bf16.gmra.mrb[4].mxu1 %vm1765_vm3, %v1724_v17 }
 0x1e8   : > { %5359 = vmatprep.mubr.msk.bf16.mxu0 %vm1765_vm3, %v1717_v12  ;;  %5375 = vmatprep.mubr.msk.bf16.mxu1 %vm1765_vm3, %v1725_v33 }
 0x1ef   : > { %5360 = vmatmul.mubr.msk.bf16.gmra.mrb[8].mxu0 %vm1765_vm3, %v1718_v19  ;;  %5376 = vmatmul.mubr.msk.bf16.gmra.mrb[8].mxu1 %vm1765_vm3, %v1726_v43 }
 0x1f0   : > { %5363 = vmatprep.mubr.msk.bf16.mxu0 %vm1765_vm3, %v1719_v21  ;;  %5379 = vmatprep.mubr.msk.bf16.mxu1 %vm1765_vm3, %v1727_v20 }
 0x1f7   : > { %5364 = vmatmul.mubr.msk.bf16.gmra.mrb[12].mxu0 %vm1765_vm3, %v1720_v49  ;;  %5380 = vmatmul.mubr.msk.bf16.gmra.mrb[12].mxu1 %vm1765_vm3, %v1728_v36 }
 0x2b2   : > { %v5353_v42 = vpop.f32.mrb[0].mxu0  ;;  %v7060_v55 = vpop.f32.mrb[0].mxu1 }
 0x2b3   : > { %v1857_v51 = vadd.f32 %v5353_v42, %v7057_v16  ;;  %v1848_v52 = vpop.f32.mrb[1].mxu0  ;;  %v7063_v39 = vpop.f32.mrb[1].mxu1 }
 0x2b4   : > { %v1849_v24 = vadd.f32 %v1848_v52, %v7057_v16  ;;  %v5354_v56 = vpop.f32.mrb[2].mxu0  ;;  %v7069_v53 = vpop.f32.mrb[2].mxu1 }
 0x2b5   : > { %v1860_v57 = vadd.f32 %v5354_v56, %v7057_v16  ;;  %v1851_v22 = vpop.f32.mrb[3].mxu0  ;;  %v7067_v48 = vadd.f32 %v1857_v51, %v6950_v59  ;;  %v7075_v15 = vpop.f32.mrb[3].mxu1 }
 0x2b6   : > { %v1852_v0 = vadd.f32 %v1851_v22, %v7057_v16  ;;  %v7073_v25 = vadd.f32 %v1849_v24, %v6936_v28 }
 0x2b7   : > { %v2013_v45 = vsel %vm1765_vm3, %v7067_v48, 0.0  ;;  %v7080_v1 = vadd.f32 %v1860_v57, %v6952_v5 }
 0x2b8   : > { %2014 = vadd.xlane.f32.xlu1 %v2013_v45  ;;  %v2007_v59 = vsel %vm1765_vm3, %v7073_v25, 0.0  ;;  %v7085_v9 = vadd.f32 %v1852_v0, %v6938_v62 }
 0x2b9   : > { %2008 = vadd.xlane.f32.xlu0 %v2007_v59  ;;  %v2016_v28 = vsel %vm1765_vm3, %v7080_v1, 0.0 }
 0x2ba   : > { %v5357_v14 = vpop.f32.mrb[4].mxu0  ;;  %v7089_v17 = vpop.f32.mrb[4].mxu1  ;;  %v2010_v21 = vsel %vm1765_vm3, %v7085_v9, 0.0 }
 0x2bb   : > { %v1864_v12 = vpop.f32.mrb[5].mxu0  ;;  %v1873_v33 = vadd.f32 %v5357_v14, %v7057_v16  ;;  %v7095_v43 = vpop.f32.mrb[5].mxu1 }
 0x2bc   : > { %v1865_v5 = vadd.f32 %v1864_v12, %v7057_v16  ;;  %v5358_v19 = vpop.f32.mrb[6].mxu0  ;;  %2017 = vadd.xlane.f32.xlu1 %v2016_v28  ;;  %v7097_v20 = vpop.f32.mrb[6].mxu1 }
 0x2bd   : > { %v1867_v62 = vpop.f32.mrb[7].mxu0  ;;  %2011 = vadd.xlane.f32.xlu0 %v2010_v21  ;;  %v1876_v49 = vadd.f32 %v5358_v19, %v7057_v16  ;;  %v7104_v42 = vpop.f32.mrb[7].mxu1  ;;  %v7112_v24 = vadd.f32 %v1873_v33, %v6975_v29 }
 0x2be   : > { %v1868_v36 = vadd.f32 %v1867_v62, %v7057_v16  ;;  %v7102_v40 = vadd.f32 %v1865_v5, %v6954_v63 }
 0x2bf   : > { %v7117_v22 = vadd.f32 %v1876_v49, %v6977_v2  ;;  %v2025_v29 = vsel %vm1765_vm3, %v7112_v24, 0.0 }
 0x2c0   : > { %v2019_v51 = vsel %vm1765_vm3, %v7102_v40, 0.0  ;;  %v7109_v52 = vadd.f32 %v1868_v36, %v6956_v6 }
 0x2c1   : > { %2020 = vadd.xlane.f32.xlu0 %v2019_v51  ;;  %v2028_v5 = vsel %vm1765_vm3, %v7117_v22, 0.0 }
 0x2c2   : > { %v5361_v56 = vpop.f32.mrb[8].mxu0  ;;  %v2022_v57 = vsel %vm1765_vm3, %v7109_v52, 0.0  ;;  %v7119_v0 = vpop.f32.mrb[8].mxu1 }
 0x2c3   : > { %v1880_v63 = vpop.f32.mrb[9].mxu0  ;;  %2023 = vadd.xlane.f32.xlu1 %v2022_v57  ;;  %v1889_v45 = vadd.f32 %v5361_v56, %v7057_v16  ;;  %v7125_v14 = vpop.f32.mrb[9].mxu1 }
 0x2c4   : > { %v1881_v6 = vadd.f32 %v1880_v63, %v7057_v16  ;;  %v5362_v59 = vpop.f32.mrb[10].mxu0  ;;  %v7128_v2 = vpop.f32.mrb[10].mxu1 }
 0x2c5   : > { %v1892_v12 = vadd.f32 %v5362_v59, %v7057_v16  ;;  %v1883_v28 = vpop.f32.mrb[11].mxu0  ;;  %2026 = vadd.xlane.f32.xlu0 %v2025_v29  ;;  %v7136_v21 = vpop.f32.mrb[11].mxu1  ;;  %v7144_v36 = vadd.f32 %v1889_v45, %v7005_v58 }
 0x2c6   : > { %v1884_v33 = vadd.f32 %v1883_v28, %v7057_v16  ;;  %v7134_v19 = vadd.f32 %v1881_v6, %v6980_v37 }
 0x2c7   : > { %2029 = vadd.xlane.f32.xlu1 %v2028_v5  ;;  %v7147_v51 = vadd.f32 %v1892_v12, %v7007_v47  ;;  %v2037_v58 = vsel %vm1765_vm3, %v7144_v36, 0.0  ;;  %v1913_v12 = vadd.f32 %v7063_v39, %v7057_v16  ;;  %v1916_v39 = vadd.f32 %v7075_v15, %v7057_v16 }
 0x2c8   : > { %v2031_v62 = vsel %vm1765_vm3, %v7134_v19, 0.0  ;;  %v7141_v49 = vadd.f32 %v1884_v33, %v6982_v3 }
 0x2c9   : > { %2032 = vadd.xlane.f32.xlu0 %v2031_v62  ;;  %v2040_v47 = vsel %vm1765_vm3, %v7147_v51, 0.0 }
 0x2ca   : > { %v5365_v56 = vpop.f32.mrb[12].mxu0  ;;  %v2034_v37 = vsel %vm1765_vm3, %v7141_v49, 0.0  ;;  %v7151_v63 = vpop.f32.mrb[12].mxu1 }
 0x2cb   : > { %v1896_v57 = vpop.f32.mrb[13].mxu0  ;;  %2035 = vadd.xlane.f32.xlu1 %v2034_v37  ;;  %v1905_v6 = vadd.f32 %v5365_v56, %v7057_v16  ;;  %v1960_v45 = vpop.f32.mrb[13].mxu1 }
 0x2cc   : > { %v1897_v3 = vadd.f32 %v1896_v57, %v7057_v16  ;;  %v5366_v59 = vpop.f32.mrb[14].mxu0  ;;  %v5382_v28 = vpop.f32.mrb[14].mxu1 }
 0x2cd   : > { %v1899_v29 = vpop.f32.mrb[15].mxu0  ;;  %2038 = vadd.xlane.f32.xlu0 %v2037_v58  ;;  %v1908_v33 = vadd.f32 %v5366_v59, %v7057_v16  ;;  %v7167_v56 = vadd.f32 %v5382_v28, %v7057_v16  ;;  %v1963_v37 = vpop.f32.mrb[15].mxu1  ;;  %v7177_v59 = vadd.f32 %v1905_v6, %v7033_v44  ;;  %v7192_v44 = vadd.f32 %v1916_v39, %v6946_v4 }
 0x2ce   : > { %v1900_v5 = vadd.f32 %v1899_v29, %v7057_v16  ;;  %v7164_v62 = vadd.f32 %v1897_v3, %v7009_v34  ;;  %v7185_v29 = vadd.f32 %v1913_v12, %v6944_v54  ;;  %v1924_v6 = vadd.f32 %v7069_v53, %v7057_v16 }
 0x2cf   : > { %2041 = vadd.xlane.f32.xlu1 %v2040_v47  ;;  %v7182_v3 = vadd.f32 %v1908_v33, %v7035_v35  ;;  %v2049_v15 = vsel %vm1765_vm3, %v7177_v59, 0.0  ;;  %v1929_v47 = vadd.f32 %v7095_v43, %v7057_v16  ;;  %v1932_v4 = vadd.f32 %v7104_v42, %v7057_v16 }
 0x2d0   : > { %v2043_v57 = vsel %vm1765_vm3, %v7164_v62, 0.0  ;;  %v7172_v58 = vadd.f32 %v1900_v5, %v7012_v23  ;;  %v1921_v23 = vadd.f32 %v7060_v55, %v7057_v16  ;;  %v2055_v54 = vsel %vm1765_vm3, %v7185_v29, 0.0 }
 0x2d1   : > { %2044 = vadd.xlane.f32.xlu0 %v2043_v57  ;;  %v2052_v35 = vsel %vm1765_vm3, %v7182_v3, 0.0  ;;  %v2058_v55 = vsel %vm1765_vm3, %v7192_v44, 0.0  ;;  %v7210_v53 = vadd.f32 %v1924_v6, %v6960_v7  ;;  %v7213_v28 = vadd.f32 %v1929_v47, %v6963_v8  ;;  %v5795_v47 = vld [vmem:[%s6327_s25] sm:$0xff]  }
 0x2d2   : > { %v2046_v34 = vsel %vm1765_vm3, %v7172_v58, 0.0  ;;  %v7207_v12 = vadd.f32 %v1921_v23, %v6958_v60  ;;  %v1937_v43 = vadd.f32 %v7089_v17, %v7057_v16  ;;  %v7220_v5 = vadd.f32 %v1932_v4, %v6965_v26  ;;  %5383 = vmatprep.subr.bf16.mxu1 %v5795_v47 }
 0x2d3   : > { %2047 = vadd.xlane.f32.xlu1 %v2046_v34  ;;  %v1940_v60 = vadd.f32 %v7097_v20, %v7057_v16  ;;  %v2064_v7 = vsel %vm1765_vm3, %v7210_v53, 0.0  ;;  %v2067_v8 = vsel %vm1765_vm3, %v7213_v28, 0.0  ;;  %v1945_v42 = vadd.f32 %v7125_v14, %v7057_v16  ;;  %5384 = vmatpush3.bf16.msra.mxu1 %v5795_v47 }
 0x2d4   : > { %v2061_v33 = vsel %vm1765_vm3, %v7207_v12, 0.0  ;;  %v2070_v17 = vsel %vm1765_vm3, %v7220_v5, 0.0  ;;  %v1948_v26 = vadd.f32 %v7136_v21, %v7057_v16  ;;  %v7235_v57 = vadd.f32 %v1937_v43, %v6984_v10 }
 0x2d5   : > { %2050 = vadd.xlane.f32.xlu0 %v2049_v15  ;;  %v7238_v20 = vadd.f32 %v1940_v60, %v6986_v11  ;;  %v7241_v39 = vadd.f32 %v1945_v42, %v6990_v32  ;;  %v1953_v14 = vadd.f32 %v7119_v0, %v7057_v16  ;;  %v1956_v10 = vadd.f32 %v7128_v2, %v7057_v16 }
 0x2d6   : > { %v2073_v34 = vsel %vm1765_vm3, %v7235_v57, 0.0  ;;  %v7248_v23 = vadd.f32 %v1948_v26, %v6992_v46  ;;  %v1961_v21 = vadd.f32 %v1960_v45, %v7057_v16  ;;  %v1964_v15 = vadd.f32 %v1963_v37, %v7057_v16 }
 0x2d7   : > { %2053 = vadd.xlane.f32.xlu1 %v2052_v35  ;;  %v2076_v11 = vsel %vm1765_vm3, %v7238_v20, 0.0  ;;  %v2079_v32 = vsel %vm1765_vm3, %v7241_v39, 0.0  ;;  %v7261_v46 = vadd.f32 %v1953_v14, %v7015_v30  ;;  %v7264_v2 = vadd.f32 %v1956_v10, %v7017_v61 }
 0x2d8   : > { %v2082_v0 = vsel %vm1765_vm3, %v7248_v23, 0.0  ;;  %v7267_v6 = vadd.f32 %v1961_v21, %v7019_v38  ;;  %v1969_v45 = vadd.f32 %v7151_v63, %v7057_v16  ;;  %v7274_v37 = vadd.f32 %v1964_v15, %v7021_v18 }
 0x2d9   : > { %2056 = vadd.xlane.f32.xlu0 %v2055_v54  ;;  %v2085_v35 = vsel %vm1765_vm3, %v7261_v46, 0.0  ;;  %v2088_v30 = vsel %vm1765_vm3, %v7264_v2, 0.0  ;;  %v7287_v63 = vadd.f32 %v7167_v56, %v7041_v31 }
 0x2da   : > { %v2091_v61 = vsel %vm1765_vm3, %v7267_v6, 0.0  ;;  %v2094_v38 = vsel %vm1765_vm3, %v7274_v37, 0.0  ;;  %v7283_v16 = vadd.f32 %v1969_v45, %v7039_v27 }
 0x2db   : > { %2059 = vadd.xlane.f32.xlu1 %v2058_v55  ;;  %v2100_v54 = vsel %vm1765_vm3, %v7287_v63, 0.0 }
 0x2dc   : > { %v2097_v18 = vsel %vm1765_vm3, %v7283_v16, 0.0 }
 0x2dd   : > { %2062 = vadd.xlane.f32.xlu0 %v2061_v33 }
 0x2df   : > { %2065 = vadd.xlane.f32.xlu1 %v2064_v7 }
 0x2e1   : > { %2068 = vadd.xlane.f32.xlu0 %v2067_v8 }
 0x2e3   : > { %2071 = vadd.xlane.f32.xlu1 %v2070_v17 }
 0x2e5   : > { %2074 = vadd.xlane.f32.xlu0 %v2073_v34 }
 0x2e7   : > { %2077 = vadd.xlane.f32.xlu1 %v2076_v11 }
 0x2e9   : > { %2080 = vadd.xlane.f32.xlu0 %v2079_v32 }
 0x2eb   : > { %2083 = vadd.xlane.f32.xlu1 %v2082_v0 }
 0x2ed   : > { %2086 = vadd.xlane.f32.xlu0 %v2085_v35 }
 0x2ef   : > { %2089 = vadd.xlane.f32.xlu1 %v2088_v30 }
 0x2f1   : > { %2092 = vadd.xlane.f32.xlu0 %v2091_v61 }
 0x2f3   : > { %2095 = vadd.xlane.f32.xlu1 %v2094_v38 }
 0x2f5   : > { %2098 = vadd.xlane.f32.xlu0 %v2097_v18 }
 0x2f7   : > { %2101 = vadd.xlane.f32.xlu1 %v2100_v54 }
 0x345   : > { %v2015_v55 = vpop.xlane.xlu1 %2014 }
 0x346   : > { %v2106_v27 = vmul.f32 0.015625, %v2015_v55  ;;  %v2009_v4 = vpop.xlane.xlu0 %2008 }
 0x347   : > { %v2104_v43 = vmul.f32 0.015625, %v2009_v4 }
 0x348   : > { %v7295_v33 = vsub.f32 %v7067_v48, %v2106_v27 }
 0x349   : > { %v7298_v31 = vsub.f32 %v7073_v25, %v2104_v43  ;;  %v2018_v56 = vpop.xlane.xlu1 %2017 }
 0x34a   : > { %v2107_v60 = vmul.f32 0.015625, %v2018_v56  ;;  %v2012_v7 = vpop.xlane.xlu0 %2011  ;;  %v2170_v48 = vmul.f32 %v7295_v33, %v7295_v33 }
 0x34b   : > { %v2105_v8 = vmul.f32 0.015625, %v2012_v7  ;;  %v2168_v42 = vmul.f32 %v7298_v31, %v7298_v31 }
 0x34c   : > { %v7303_v17 = vsub.f32 %v7080_v1, %v2107_v60  ;;  %v2206_v21 = vsel %vm1765_vm3, %v2170_v48, 0.0 }
 0x34d   : > { %v7306_v26 = vsub.f32 %v7085_v9, %v2105_v8  ;;  %v2200_v14 = vsel %vm1765_vm3, %v2168_v42, 0.0 }
 0x34e   : > { %2201 = vadd.xlane.f32.xlu0 %v2200_v14  ;;  %v2021_v25 = vpop.xlane.xlu0 %2020  ;;  %v2171_v32 = vmul.f32 %v7303_v17, %v7303_v17 }
 0x34f   : > { %v2108_v34 = vmul.f32 0.015625, %v2021_v25  ;;  %v2169_v10 = vmul.f32 %v7306_v26, %v7306_v26 }
 0x350   : > { %v2024_v11 = vpop.xlane.xlu1 %2023  ;;  %v2209_v38 = vsel %vm1765_vm3, %v2171_v32, 0.0 }
 0x351   : > { %v7316_v1 = vsub.f32 %v7102_v40, %v2108_v34  ;;  %v2109_v9 = vmul.f32 0.015625, %v2024_v11  ;;  %v2203_v0 = vsel %vm1765_vm3, %v2169_v10, 0.0 }
 0x352   : > { %2207 = vadd.xlane.f32.xlu0 %v2206_v21  ;;  %2204 = vadd.xlane.f32.xlu1 %v2203_v0  ;;  %v2027_v15 = vpop.xlane.xlu0 %2026 }
 0x353   : > { %v7321_v45 = vsub.f32 %v7109_v52, %v2109_v9  ;;  %v2110_v35 = vmul.f32 0.015625, %v2027_v15  ;;  %v2172_v30 = vmul.f32 %v7316_v1, %v7316_v1 }
 0x354   : > { %v2030_v61 = vpop.xlane.xlu1 %2029 }
 0x355   : > { %v7327_v40 = vsub.f32 %v7112_v24, %v2110_v35  ;;  %v2111_v18 = vmul.f32 0.015625, %v2030_v61  ;;  %v2212_v54 = vsel %vm1765_vm3, %v2172_v30, 0.0  ;;  %v2173_v47 = vmul.f32 %v7321_v45, %v7321_v45 }
 0x356   : > { %2210 = vadd.xlane.f32.xlu1 %v2209_v38  ;;  %2213 = vadd.xlane.f32.xlu0 %v2212_v54  ;;  %v2033_v52 = vpop.xlane.xlu0 %2032 }
 0x357   : > { %v7333_v55 = vsub.f32 %v7117_v22, %v2111_v18  ;;  %v2112_v27 = vmul.f32 0.015625, %v2033_v52  ;;  %v2174_v4 = vmul.f32 %v7327_v40, %v7327_v40  ;;  %v2215_v24 = vsel %vm1765_vm3, %v2173_v47, 0.0 }
 0x358   : > { %v2036_v43 = vpop.xlane.xlu1 %2035 }
 0x359   : > { %v7339_v56 = vsub.f32 %v7134_v19, %v2112_v27  ;;  %v2113_v60 = vmul.f32 0.015625, %v2036_v43  ;;  %v2218_v7 = vsel %vm1765_vm3, %v2174_v4, 0.0  ;;  %v2175_v8 = vmul.f32 %v7333_v55, %v7333_v55 }
 0x35a   : > { %2216 = vadd.xlane.f32.xlu1 %v2215_v24  ;;  %2219 = vadd.xlane.f32.xlu0 %v2218_v7  ;;  %v2039_v22 = vpop.xlane.xlu0 %2038 }
 0x35b   : > { %v7345_v42 = vsub.f32 %v7141_v49, %v2113_v60  ;;  %v2114_v14 = vmul.f32 0.015625, %v2039_v22  ;;  %v2176_v48 = vmul.f32 %v7339_v56, %v7339_v56  ;;  %v2221_v19 = vsel %vm1765_vm3, %v2175_v8, 0.0 }
 0x35c   : > { %v2042_v25 = vpop.xlane.xlu1 %2041 }
 0x35d   : > { %v7351_v34 = vsub.f32 %v7144_v36, %v2114_v14  ;;  %v2115_v10 = vmul.f32 0.015625, %v2042_v25  ;;  %v2224_v11 = vsel %vm1765_vm3, %v2176_v48, 0.0  ;;  %v2177_v32 = vmul.f32 %v7345_v42, %v7345_v42 }
 0x35e   : > { %2222 = vadd.xlane.f32.xlu1 %v2221_v19  ;;  %2225 = vadd.xlane.f32.xlu0 %v2224_v11  ;;  %v2045_v49 = vpop.xlane.xlu0 %2044 }
 0x35f   : > { %v7357_v9 = vsub.f32 %v7147_v51, %v2115_v10  ;;  %v2116_v21 = vmul.f32 0.015625, %v2045_v49  ;;  %v2178_v0 = vmul.f32 %v7351_v34, %v7351_v34  ;;  %v2227_v36 = vsel %vm1765_vm3, %v2177_v32, 0.0 }
 0x360   : > { %v2048_v15 = vpop.xlane.xlu1 %2047 }
 0x361   : > { %v7363_v35 = vsub.f32 %v7164_v62, %v2116_v21  ;;  %v2117_v30 = vmul.f32 0.015625, %v2048_v15  ;;  %v2230_v61 = vsel %vm1765_vm3, %v2178_v0, 0.0  ;;  %v2179_v38 = vmul.f32 %v7357_v9, %v7357_v9 }
 0x362   : > { %2228 = vadd.xlane.f32.xlu1 %v2227_v36  ;;  %2231 = vadd.xlane.f32.xlu0 %v2230_v61  ;;  %v2051_v51 = vpop.xlane.xlu0 %2050 }
 0x363   : > { %v7369_v18 = vsub.f32 %v7172_v58, %v2117_v30  ;;  %v2118_v54 = vmul.f32 0.015625, %v2051_v51  ;;  %v2180_v47 = vmul.f32 %v7363_v35, %v7363_v35  ;;  %v2233_v62 = vsel %vm1765_vm3, %v2179_v38, 0.0  ;;  %v5796_v30 = vld [vmem:[%s6327_s25 + $0x8] sm:$0xff]  }
 0x364   : > { %v2054_v52 = vpop.xlane.xlu1 %2053  ;;  %5385 = vmatprep.subr.bf16.mxu1 %v5796_v30 }
 0x365   : > { %v7375_v27 = vsub.f32 %v7177_v59, %v2118_v54  ;;  %v2119_v4 = vmul.f32 0.015625, %v2054_v52  ;;  %v2236_v43 = vsel %vm1765_vm3, %v2180_v47, 0.0  ;;  %v2181_v24 = vmul.f32 %v7369_v18, %v7369_v18  ;;  %5386 = vmatpush3.bf16.msra.mxu1 %v5796_v30 }
 0x366   : > { %2234 = vadd.xlane.f32.xlu1 %v2233_v62  ;;  %2237 = vadd.xlane.f32.xlu0 %v2236_v43  ;;  %v2057_v58 = vpop.xlane.xlu0 %2056  ;;  %v5797_v43 = vld [vmem:[%s6327_s25 + $0x10] sm:$0xff]  }
 0x367   : > { %v7381_v60 = vsub.f32 %v7182_v3, %v2119_v4  ;;  %v2120_v7 = vmul.f32 0.015625, %v2057_v58  ;;  %v2182_v8 = vmul.f32 %v7375_v27, %v7375_v27  ;;  %v2239_v59 = vsel %vm1765_vm3, %v2181_v24, 0.0  ;;  %5387 = vmatprep.subr.bf16.mxu1 %v5797_v43 }
 0x368   : > { %v2060_v22 = vpop.xlane.xlu1 %2059 }
 0x369   : > { %v7387_v14 = vsub.f32 %v7185_v29, %v2120_v7  ;;  %v2121_v48 = vmul.f32 0.015625, %v2060_v22  ;;  %v2242_v25 = vsel %vm1765_vm3, %v2182_v8, 0.0  ;;  %v2183_v19 = vmul.f32 %v7381_v60, %v7381_v60  ;;  %5388 = vmatpush3.bf16.msra.mxu1 %v5797_v43 }
 0x36a   : > { %2240 = vadd.xlane.f32.xlu1 %v2239_v59  ;;  %2243 = vadd.xlane.f32.xlu0 %v2242_v25  ;;  %v2063_v3 = vpop.xlane.xlu0 %2062 }
 0x36b   : > { %v7393_v10 = vsub.f32 %v7192_v44, %v2121_v48  ;;  %v2122_v11 = vmul.f32 0.015625, %v2063_v3  ;;  %v2184_v32 = vmul.f32 %v7387_v14, %v7387_v14  ;;  %v2245_v29 = vsel %vm1765_vm3, %v2183_v19, 0.0  ;;  %v5798_v19 = vld [vmem:[%s6327_s25 + $0x18] sm:$0xff]  }
 0x36c   : > { %v2066_v49 = vpop.xlane.xlu1 %2065  ;;  %5389 = vmatprep.subr.bf16.mxu1 %v5798_v19 }
 0x36d   : > { %v7399_v21 = vsub.f32 %v7207_v12, %v2122_v11  ;;  %v2123_v0 = vmul.f32 0.015625, %v2066_v49  ;;  %v2248_v15 = vsel %vm1765_vm3, %v2184_v32, 0.0  ;;  %v2185_v36 = vmul.f32 %v7393_v10, %v7393_v10  ;;  %5390 = vmatpush3.bf16.msra.mxu1 %v5798_v19 }
 0x36e   : > { %2246 = vadd.xlane.f32.xlu1 %v2245_v29  ;;  %2249 = vadd.xlane.f32.xlu0 %v2248_v15  ;;  %v2069_v44 = vpop.xlane.xlu0 %2068 }
 0x36f   : > { %v7406_v61 = vsub.f32 %v7210_v53, %v2123_v0  ;;  %v2124_v38 = vmul.f32 0.015625, %v2069_v44  ;;  %v2186_v51 = vmul.f32 %v7399_v21, %v7399_v21  ;;  %v2251_v54 = vsel %vm1765_vm3, %v2185_v36, 0.0 }
 0x370   : > { %v2072_v12 = vpop.xlane.xlu1 %2071 }
 0x371   : > { %v7412_v47 = vsub.f32 %v7213_v28, %v2124_v38  ;;  %v2125_v52 = vmul.f32 0.015625, %v2072_v12  ;;  %v2254_v62 = vsel %vm1765_vm3, %v2186_v51, 0.0  ;;  %v2187_v4 = vmul.f32 %v7406_v61, %v7406_v61 }
 0x372   : > { %2252 = vadd.xlane.f32.xlu1 %v2251_v54  ;;  %2255 = vadd.xlane.f32.xlu0 %v2254_v62  ;;  %v2075_v53 = vpop.xlane.xlu0 %2074 }
 0x373   : > { %v7419_v24 = vsub.f32 %v7220_v5, %v2125_v52  ;;  %v2126_v58 = vmul.f32 0.015625, %v2075_v53  ;;  %v2188_v28 = vmul.f32 %v7412_v47, %v7412_v47  ;;  %v2257_v8 = vsel %vm1765_vm3, %v2187_v4, 0.0 }
 0x374   : > { %v2078_v7 = vpop.xlane.xlu1 %2077 }
 0x375   : > { %v7425_v22 = vsub.f32 %v7235_v57, %v2126_v58  ;;  %v2127_v59 = vmul.f32 0.015625, %v2078_v7  ;;  %v2260_v48 = vsel %vm1765_vm3, %v2188_v28, 0.0  ;;  %v2189_v25 = vmul.f32 %v7419_v24, %v7419_v24 }
 0x376   : > { %2258 = vadd.xlane.f32.xlu1 %v2257_v8  ;;  %2261 = vadd.xlane.f32.xlu0 %v2260_v48  ;;  %v2081_v5 = vpop.xlane.xlu0 %2080 }
 0x377   : > { %v7432_v3 = vsub.f32 %v7238_v20, %v2127_v59  ;;  %v2128_v11 = vmul.f32 0.015625, %v2081_v5  ;;  %v2190_v32 = vmul.f32 %v7425_v22, %v7425_v22  ;;  %v2263_v49 = vsel %vm1765_vm3, %v2189_v25, 0.0 }
 0x378   : > { %v2084_v57 = vpop.xlane.xlu1 %2083 }
 0x379   : > { %v7438_v29 = vsub.f32 %v7241_v39, %v2128_v11  ;;  %v2129_v0 = vmul.f32 0.015625, %v2084_v57  ;;  %v2266_v15 = vsel %vm1765_vm3, %v2190_v32, 0.0  ;;  %v2191_v36 = vmul.f32 %v7432_v3, %v7432_v3 }
 0x37a   : > { %2264 = vadd.xlane.f32.xlu1 %v2263_v49  ;;  %2267 = vadd.xlane.f32.xlu0 %v2266_v15  ;;  %v2087_v20 = vpop.xlane.xlu0 %2086 }
 0x37b   : > { %v7444_v44 = vsub.f32 %v7248_v23, %v2129_v0  ;;  %v2130_v30 = vmul.f32 0.015625, %v2087_v20  ;;  %v2192_v38 = vmul.f32 %v7438_v29, %v7438_v29  ;;  %v2269_v39 = vsel %vm1765_vm3, %v2191_v36, 0.0 }
 0x37c   : > { %v2090_v51 = vpop.xlane.xlu1 %2089 }
 0x37d   : > { %v7450_v12 = vsub.f32 %v7261_v46, %v2130_v30  ;;  %v2131_v54 = vmul.f32 0.015625, %v2090_v51  ;;  %v2272_v52 = vsel %vm1765_vm3, %v2192_v38, 0.0  ;;  %v2193_v62 = vmul.f32 %v7444_v44, %v7444_v44  ;;  %v5800_v30 = vld [vmem:[%s6332_s28 + $0x8] sm:$0xff]   ;;  %v5801_v38 = vld [vmem:[%s6332_s28 + $0x10] sm:$0xff]   ;;  %v5802_v51 = vld [vmem:[%s6332_s28 + $0x18] sm:$0xff]  }
 0x37e   : > { %2270 = vadd.xlane.f32.xlu1 %v2269_v39  ;;  %2273 = vadd.xlane.f32.xlu0 %v2272_v52  ;;  %v2093_v23 = vpop.xlane.xlu0 %2092  ;;  %v5803_v39 = vld [vmem:[%s6332_s28 + $0x20] sm:$0xff]  }
 0x37f   : > { %v7456_v4 = vsub.f32 %v7264_v2, %v2131_v54  ;;  %v2132_v53 = vmul.f32 0.015625, %v2093_v23  ;;  %v2194_v43 = vmul.f32 %v7450_v12, %v7450_v12  ;;  %v2275_v46 = vsel %vm1765_vm3, %v2193_v62, 0.0  ;;  %v5804_v54 = vld [vmem:[%s6332_s28 + $0x28] sm:$0xff]  }
 0x380   : > { %v2096_v58 = vpop.xlane.xlu1 %2095 }
 0x381   : > { %v7462_v28 = vsub.f32 %v7267_v6, %v2132_v53  ;;  %v2133_v7 = vmul.f32 0.015625, %v2096_v58  ;;  %v2278_v8 = vsel %vm1765_vm3, %v2194_v43, 0.0  ;;  %v2195_v59 = vmul.f32 %v7456_v4, %v7456_v4 }
 0x382   : > { %2276 = vadd.xlane.f32.xlu1 %v2275_v46  ;;  %2279 = vadd.xlane.f32.xlu0 %v2278_v8  ;;  %v2099_v2 = vpop.xlane.xlu0 %2098 }
 0x383   : > { %v7468_v48 = vsub.f32 %v7274_v37, %v2133_v7  ;;  %v2134_v25 = vmul.f32 0.015625, %v2099_v2  ;;  %v2196_v5 = vmul.f32 %v7462_v28, %v7462_v28  ;;  %v2281_v6 = vsel %vm1765_vm3, %v2195_v59, 0.0 }
 0x384   : > { %v2102_v19 = vpop.xlane.xlu1 %2101 }
 0x385   : > { %v7474_v11 = vsub.f32 %v7283_v16, %v2134_v25  ;;  %v2135_v32 = vmul.f32 0.015625, %v2102_v19  ;;  %v2284_v57 = vsel %vm1765_vm3, %v2196_v5, 0.0  ;;  %v2197_v49 = vmul.f32 %v7468_v48, %v7468_v48 }
 0x386   : > { %2282 = vadd.xlane.f32.xlu1 %v2281_v6  ;;  %2285 = vadd.xlane.f32.xlu0 %v2284_v57 }
 0x387   : > { %v7480_v37 = vsub.f32 %v7287_v63, %v2135_v32  ;;  %v2198_v0 = vmul.f32 %v7474_v11, %v7474_v11  ;;  %v2287_v16 = vsel %vm1765_vm3, %v2197_v49, 0.0  ;;  %v5799_v63 = vld [vmem:[%s6332_s28] sm:$0xff]   ;;  %v2426_v32 = vsub.s32 1, %v7050_v13 }
 0x388   : > { %5423 = vmatprep.subr.bf16.mxu0 %v5799_v63 }
 0x389   : > { %v2290_v15 = vsel %vm1765_vm3, %v2198_v0, 0.0  ;;  %v2199_v36 = vmul.f32 %v7480_v37, %v7480_v37  ;;  %5424 = vmatpush3.bf16.msra.mxu0 %v5799_v63 }
 0x38a   : > { %2288 = vadd.xlane.f32.xlu1 %v2287_v16  ;;  %2291 = vadd.xlane.f32.xlu0 %v2290_v15 }
 0x38b   : > { %v2293_v20 = vsel %vm1765_vm3, %v2199_v36, 0.0  ;;  %5425 = vmatprep.subr.bf16.mxu0 %v5800_v30 }
 0x38d   : > { %5426 = vmatpush3.bf16.msra.mxu0 %v5800_v30  ;;  %v7498_v30 = vrot.slane %v7054_v41, %v2426_v32 }
 0x38e   : > { %2294 = vadd.xlane.f32.xlu1 %v2293_v20  ;;  %5427 = vmatprep.subr.bf16.mxu0 %v5801_v38 }
 0x391   : > { %5428 = vmatpush3.bf16.msra.mxu0 %v5801_v38  ;;  %v2462_v38 = vsub.s32 2, %v7050_v13 }
 0x392   : > { %5429 = vmatprep.subr.bf16.mxu0 %v5802_v51 }
 0x395   : > { %5430 = vmatpush3.bf16.msra.mxu0 %v5802_v51 }
 0x396   : > { %5431 = vmatprep.subr.bf16.mxu0 %v5803_v39 }
 0x399   : > { %5432 = vmatpush3.bf16.msra.mxu0 %v5803_v39 }
 0x39a   : > { %5433 = vmatprep.subr.bf16.mxu0 %v5804_v54 }
 0x39d   : > { %5434 = vmatpush3.bf16.msra.mxu0 %v5804_v54 }
 0x3db   : > { %v2202_v52 = vpop.xlane.xlu0 %2201 }
 0x3dc   : > { %v2296_v62 = vmul.f32 0.015625, %v2202_v52 }
 0x3de   : > { %v2328_v23 = vadd.f32 1e-05, %v2296_v62 }
 0x3df   : > { %v2205_v53 = vpop.xlane.xlu1 %2204  ;;  %v2208_v43 = vpop.xlane.xlu0 %2207 }
 0x3e0   : > { %5807 = vrsqrt.f32 %v2328_v23  ;;  %v2297_v58 = vmul.f32 0.015625, %v2205_v53  ;;  %v2298_v46 = vmul.f32 0.015625, %v2208_v43 }
 0x3e2   : > { %v2329_v7 = vadd.f32 1e-05, %v2297_v58  ;;  %v2330_v8 = vadd.f32 1e-05, %v2298_v46  ;;  %v7503_v46 = vrot.slane %v7054_v41, %v2462_v38 }
 0x3e3   : > { %v2211_v59 = vpop.xlane.xlu1 %2210  ;;  %v2214_v2 = vpop.xlane.xlu0 %2213 }
 0x3e4   : > { %5809 = vrsqrt.f32 %v2329_v7  ;;  %v2299_v25 = vmul.f32 0.015625, %v2211_v59  ;;  %v2300_v5 = vmul.f32 0.015625, %v2214_v2 }
 0x3e5   : > { %5811 = vrsqrt.f32 %v2330_v8 }
 0x3e6   : > { %v2331_v19 = vadd.f32 1e-05, %v2299_v25  ;;  %v2332_v6 = vadd.f32 1e-05, %v2300_v5 }
 0x3e7   : > { %v2217_v57 = vpop.xlane.xlu1 %2216  ;;  %v2220_v49 = vpop.xlane.xlu0 %2219 }
 0x3e8   : > { %5813 = vrsqrt.f32 %v2331_v19  ;;  %v2301_v0 = vmul.f32 0.015625, %v2217_v57  ;;  %v2302_v16 = vmul.f32 0.015625, %v2220_v49 }
 0x3e9   : > { %5815 = vrsqrt.f32 %v2332_v6 }
 0x3ea   : > { %v5808_v15 = vpop.eup %5807  ;;  %v2333_v36 = vadd.f32 1e-05, %v2301_v0  ;;  %v2334_v20 = vadd.f32 1e-05, %v2302_v16 }
 0x3eb   : > { %v2392_v63 = vmul.f32 %v5808_v15, %v7298_v31  ;;  %v2223_v51 = vpop.xlane.xlu1 %2222  ;;  %v2226_v39 = vpop.xlane.xlu0 %2225 }
 0x3ec   : > { %5817 = vrsqrt.f32 %v2333_v36  ;;  %v2303_v54 = vmul.f32 0.015625, %v2223_v51  ;;  %v2304_v52 = vmul.f32 0.015625, %v2226_v39 }
 0x3ed   : > { %5819 = vrsqrt.f32 %v2334_v20  ;;  %v2428_v8 = vmul.f32 %v7498_v30, %v2392_v63 }
 0x3ee   : > { %v5810_v62 = vpop.eup %5809  ;;  %v2335_v23 = vadd.f32 1e-05, %v2303_v54  ;;  %v2336_v53 = vadd.f32 1e-05, %v2304_v52 }
 0x3ef   : > { %v5812_v43 = vpop.eup %5811  ;;  %v2393_v58 = vmul.f32 %v5810_v62, %v7306_v26  ;;  %v2229_v31 = vpop.xlane.xlu1 %2228  ;;  %v7511_v16 = vadd.f32 %v7503_v46, %v2428_v8 }
 0x3f0   : > { %v2232_v7 = vpop.xlane.xlu0 %2231  ;;  %v2394_v59 = vmul.f32 %v5812_v43, %v7295_v33  ;;  %5821 = vrsqrt.f32 %v2335_v23  ;;  %v2305_v2 = vmul.f32 0.015625, %v2229_v31 }
 0x3f1   : > { %v2306_v25 = vmul.f32 0.015625, %v2232_v7  ;;  %5823 = vrsqrt.f32 %v2336_v53  ;;  %v2429_v5 = vmul.f32 %v7498_v30, %v2393_v58 }
 0x3f2   : > { %v5814_v19 = vpop.eup %5813  ;;  %v2430_v6 = vmul.f32 %v7498_v30, %v2394_v59  ;;  %v2337_v32 = vadd.f32 1e-05, %v2305_v2 }
 0x3f3   : > { %v2338_v26 = vadd.f32 1e-05, %v2306_v25  ;;  %v5816_v57 = vpop.eup %5815  ;;  %v2395_v41 = vmul.f32 %v5814_v19, %v7303_v17  ;;  %v2235_v49 = vpop.xlane.xlu1 %2234  ;;  %v7514_v33 = vadd.f32 %v7503_v46, %v2429_v5 }
 0x3f4   : > { %v2238_v0 = vpop.xlane.xlu0 %2237  ;;  %v2396_v15 = vmul.f32 %v5816_v57, %v7316_v1  ;;  %5825 = vrsqrt.f32 %v2337_v32  ;;  %v2307_v36 = vmul.f32 0.015625, %v2235_v49  ;;  %v7521_v51 = vadd.f32 %v7503_v46, %v2430_v6 }
 0x3f5   : > { %v2431_v20 = vmul.f32 %v7498_v30, %v2395_v41  ;;  %5827 = vrsqrt.f32 %v2338_v26  ;;  %v2308_v63 = vmul.f32 0.015625, %v2238_v0  ;;  %v2496_v38 = vpack.c.bf16 %v7514_v33, %v7511_v16 }
 0x3f6   : > { %v5818_v17 = vpop.eup %5817  ;;  %v2339_v39 = vadd.f32 1e-05, %v2307_v36  ;;  %v2432_v43 = vmul.f32 %v7498_v30, %v2396_v15 }
 0x3f7   : > { %v5820_v54 = vpop.eup %5819  ;;  %v7524_v52 = vadd.f32 %v7503_v46, %v2431_v20  ;;  %v2397_v1 = vmul.f32 %v5818_v17, %v7321_v45  ;;  %v2340_v62 = vadd.f32 1e-05, %v2308_v63  ;;  %v2241_v23 = vpop.xlane.xlu1 %2240  ;;  %5391 = vmatprep.mubr.msk.bf16.mxu1 %vm1765_vm3, %v2496_v38 }
 0x3f8   : > { %v2244_v53 = vpop.xlane.xlu0 %2243  ;;  %v2398_v58 = vmul.f32 %v5820_v54, %v7327_v40  ;;  %5829 = vrsqrt.f32 %v2339_v39  ;;  %v2309_v31 = vmul.f32 0.015625, %v2241_v23  ;;  %v7536_v40 = vadd.f32 %v7503_v46, %v2432_v43 }
 0x3f9   : > { %v2310_v7 = vmul.f32 0.015625, %v2244_v53  ;;  %5831 = vrsqrt.f32 %v2340_v62  ;;  %v2497_v8 = vpack.c.bf16 %v7524_v52, %v7521_v51  ;;  %v2433_v59 = vmul.f32 %v7498_v30, %v2397_v1 }
 0x3fa   : > { %v5822_v2 = vpop.eup %5821  ;;  %v2341_v45 = vadd.f32 1e-05, %v2309_v31  ;;  %v2434_v57 = vmul.f32 %v7498_v30, %v2398_v58 }
 0x3fb   : > { %v2342_v25 = vadd.f32 1e-05, %v2310_v7  ;;  %v5824_v5 = vpop.eup %5823  ;;  %v2399_v19 = vmul.f32 %v5822_v2, %v7333_v55  ;;  %v2247_v6 = vpop.xlane.xlu1 %2246  ;;  %5392 = vmatmul.mubr.msk.bf16.vlgmr.msra.gmra.mrb[16].mxu1 %vm1765_vm3, %v2497_v8  ;;  %v7539_v26 = vadd.f32 %v7503_v46, %v2433_v59 }
 0x3fc   : > { %v2250_v32 = vpop.xlane.xlu0 %2249  ;;  %v2400_v41 = vmul.f32 %v5824_v5, %v7339_v56  ;;  %5833 = vrsqrt.f32 %v2341_v45  ;;  %v2311_v49 = vmul.f32 0.015625, %v2247_v6  ;;  %v7549_v56 = vadd.f32 %v7503_v46, %v2434_v57 }
 0x3fd   : > { %v2312_v0 = vmul.f32 0.015625, %v2250_v32  ;;  %5835 = vrsqrt.f32 %v2342_v25  ;;  %v2498_v55 = vpack.c.bf16 %v7539_v26, %v7536_v40  ;;  %v2435_v15 = vmul.f32 %v7498_v30, %v2399_v19 }
 0x3fe   : > { %v5826_v36 = vpop.eup %5825  ;;  %v2343_v20 = vadd.f32 1e-05, %v2311_v49  ;;  %v2436_v62 = vmul.f32 %v7498_v30, %v2400_v41 }
 0x3ff   : > { %v2344_v63 = vadd.f32 1e-05, %v2312_v0  ;;  %v5828_v38 = vpop.eup %5827  ;;  %v2401_v17 = vmul.f32 %v5826_v36, %v7345_v42  ;;  %v2253_v39 = vpop.xlane.xlu1 %2252  ;;  %5395 = vmatprep.mubr.msk.bf16.mxu1 %vm1765_vm3, %v2498_v55  ;;  %v7552_v1 = vadd.f32 %v7503_v46, %v2435_v15 }
 0x400   : > { %v2256_v54 = vpop.xlane.xlu0 %2255  ;;  %v2402_v23 = vmul.f32 %v5828_v38, %v7351_v34  ;;  %5837 = vrsqrt.f32 %v2343_v20  ;;  %v2313_v53 = vmul.f32 0.015625, %v2253_v39  ;;  %v7562_v34 = vadd.f32 %v7503_v46, %v2436_v62 }
 0x401   : > { %v2314_v43 = vmul.f32 0.015625, %v2256_v54  ;;  %5839 = vrsqrt.f32 %v2344_v63  ;;  %v2499_v42 = vpack.c.bf16 %v7552_v1, %v7549_v56  ;;  %v2437_v58 = vmul.f32 %v7498_v30, %v2401_v17 }
 0x402   : > { %v5830_v31 = vpop.eup %5829  ;;  %v2345_v7 = vadd.f32 1e-05, %v2313_v53  ;;  %v2438_v19 = vmul.f32 %v7498_v30, %v2402_v23 }
 0x403   : > { %v2346_v8 = vadd.f32 1e-05, %v2314_v43  ;;  %v5832_v59 = vpop.eup %5831  ;;  %v2403_v2 = vmul.f32 %v5830_v31, %v7357_v9  ;;  %v2259_v45 = vpop.xlane.xlu1 %2258  ;;  %5396 = vmatmul.mubr.msk.bf16.gmra.mrb[20].mxu1 %vm1765_vm3, %v2499_v42  ;;  %v7565_v5 = vadd.f32 %v7503_v46, %v2437_v58 }
 0x404   : > { %v2262_v25 = vpop.xlane.xlu0 %2261  ;;  %v2404_v6 = vmul.f32 %v5832_v59, %v7363_v35  ;;  %5841 = vrsqrt.f32 %v2345_v7  ;;  %v2315_v32 = vmul.f32 0.015625, %v2259_v45  ;;  %v7575_v35 = vadd.f32 %v7503_v46, %v2438_v19 }
 0x405   : > { %v2316_v57 = vmul.f32 0.015625, %v2262_v25  ;;  %5843 = vrsqrt.f32 %v2346_v8  ;;  %v2500_v9 = vpack.c.bf16 %v7565_v5, %v7562_v34  ;;  %v2439_v41 = vmul.f32 %v7498_v30, %v2403_v2 }
 0x406   : > { %v5834_v49 = vpop.eup %5833  ;;  %v2347_v0 = vadd.f32 1e-05, %v2315_v32  ;;  %v2440_v17 = vmul.f32 %v7498_v30, %v2404_v6 }
 0x407   : > { %v2348_v55 = vadd.f32 1e-05, %v2316_v57  ;;  %v5836_v15 = vpop.eup %5835  ;;  %v2405_v36 = vmul.f32 %v5834_v49, %v7369_v18  ;;  %v2265_v20 = vpop.xlane.xlu1 %2264  ;;  %5399 = vmatprep.mubr.msk.bf16.mxu1 %vm1765_vm3, %v2500_v9  ;;  %v7578_v38 = vadd.f32 %v7503_v46, %v2439_v41 }
 0x408   : > { %v2268_v63 = vpop.xlane.xlu0 %2267  ;;  %v2406_v39 = vmul.f32 %v5836_v15, %v7375_v27  ;;  %5845 = vrsqrt.f32 %v2347_v0  ;;  %v2317_v54 = vmul.f32 0.015625, %v2265_v20  ;;  %v7588_v27 = vadd.f32 %v7503_v46, %v2440_v17 }
 0x409   : > { %v2318_v62 = vmul.f32 0.015625, %v2268_v63  ;;  %5847 = vrsqrt.f32 %v2348_v55  ;;  %v2501_v18 = vpack.c.bf16 %v7578_v38, %v7575_v35  ;;  %v2441_v23 = vmul.f32 %v7498_v30, %v2405_v36 }
 0x40a   : > { %v5838_v53 = vpop.eup %5837  ;;  %v2349_v43 = vadd.f32 1e-05, %v2317_v54  ;;  %v2442_v2 = vmul.f32 %v7498_v30, %v2406_v39 }
 0x40b   : > { %v2350_v42 = vadd.f32 1e-05, %v2318_v62  ;;  %v5840_v58 = vpop.eup %5839  ;;  %v2407_v31 = vmul.f32 %v5838_v53, %v7381_v60  ;;  %v2271_v7 = vpop.xlane.xlu1 %2270  ;;  %5400 = vmatmul.mubr.msk.bf16.gmra.mrb[24].mxu1 %vm1765_vm3, %v2501_v18  ;;  %v7591_v59 = vadd.f32 %v7503_v46, %v2441_v23 }
 0x40c   : > { %v2274_v8 = vpop.xlane.xlu0 %2273  ;;  %v2408_v45 = vmul.f32 %v5840_v58, %v7387_v14  ;;  %5849 = vrsqrt.f32 %v2349_v43  ;;  %v2319_v25 = vmul.f32 0.015625, %v2271_v7  ;;  %v7601_v14 = vadd.f32 %v7503_v46, %v2442_v2 }
 0x40d   : > { %v2320_v19 = vmul.f32 0.015625, %v2274_v8  ;;  %5851 = vrsqrt.f32 %v2350_v42  ;;  %v2502_v60 = vpack.c.bf16 %v7591_v59, %v7588_v27  ;;  %v2443_v6 = vmul.f32 %v7498_v30, %v2407_v31 }
 0x40e   : > { %v5842_v32 = vpop.eup %5841  ;;  %v2351_v57 = vadd.f32 1e-05, %v2319_v25  ;;  %v2444_v36 = vmul.f32 %v7498_v30, %v2408_v45 }
 0x40f   : > { %v2352_v9 = vadd.f32 1e-05, %v2320_v19  ;;  %v5844_v41 = vpop.eup %5843  ;;  %v2409_v49 = vmul.f32 %v5842_v32, %v7393_v10  ;;  %v2277_v0 = vpop.xlane.xlu1 %2276  ;;  %5403 = vmatprep.mubr.msk.bf16.mxu1 %vm1765_vm3, %v2502_v60  ;;  %v7604_v15 = vadd.f32 %v7503_v46, %v2443_v6 }
 0x410   : > { %v2280_v55 = vpop.xlane.xlu0 %2279  ;;  %v2410_v20 = vmul.f32 %v5844_v41, %v7399_v21  ;;  %5853 = vrsqrt.f32 %v2351_v57  ;;  %v2321_v63 = vmul.f32 0.015625, %v2277_v0  ;;  %v7614_v21 = vadd.f32 %v7503_v46, %v2444_v36 }
 0x411   : > { %v2322_v17 = vmul.f32 0.015625, %v2280_v55  ;;  %5855 = vrsqrt.f32 %v2352_v9  ;;  %v2503_v10 = vpack.c.bf16 %v7604_v15, %v7601_v14  ;;  %v2445_v39 = vmul.f32 %v7498_v30, %v2409_v49 }
 0x412   : > { %v5846_v54 = vpop.eup %5845  ;;  %v2353_v62 = vadd.f32 1e-05, %v2321_v63  ;;  %v2446_v31 = vmul.f32 %v7498_v30, %v2410_v20 }
 0x413   : > { %v2354_v18 = vadd.f32 1e-05, %v2322_v17  ;;  %v5848_v23 = vpop.eup %5847  ;;  %v2411_v53 = vmul.f32 %v5846_v54, %v7406_v61  ;;  %v2283_v43 = vpop.xlane.xlu1 %2282  ;;  %5404 = vmatmul.mubr.msk.bf16.gmra.mrb[28].mxu1 %vm1765_vm3, %v2503_v10  ;;  %v7617_v58 = vadd.f32 %v7503_v46, %v2445_v39 }
 0x414   : > { %v2286_v42 = vpop.xlane.xlu0 %2285  ;;  %v2412_v7 = vmul.f32 %v5848_v23, %v7412_v47  ;;  %5857 = vrsqrt.f32 %v2353_v62  ;;  %v2323_v8 = vmul.f32 0.015625, %v2283_v43  ;;  %v7627_v47 = vadd.f32 %v7503_v46, %v2446_v31 }
 0x415   : > { %v2324_v2 = vmul.f32 0.015625, %v2286_v42  ;;  %5859 = vrsqrt.f32 %v2354_v18  ;;  %v2504_v61 = vpack.c.bf16 %v7617_v58, %v7614_v21  ;;  %v2447_v45 = vmul.f32 %v7498_v30, %v2411_v53 }
 0x416   : > { %v5850_v25 = vpop.eup %5849  ;;  %v2355_v19 = vadd.f32 1e-05, %v2323_v8  ;;  %v2448_v49 = vmul.f32 %v7498_v30, %v2412_v7 }
 0x417   : > { %v2356_v60 = vadd.f32 1e-05, %v2324_v2  ;;  %v5852_v6 = vpop.eup %5851  ;;  %v2413_v32 = vmul.f32 %v5850_v25, %v7419_v24  ;;  %v2289_v57 = vpop.xlane.xlu1 %2288  ;;  %5407 = vmatprep.mubr.msk.bf16.mxu1 %vm1765_vm3, %v2504_v61  ;;  %v7630_v41 = vadd.f32 %v7503_v46, %v2447_v45 }
 0x418   : > { %v2292_v9 = vpop.xlane.xlu0 %2291  ;;  %v2414_v0 = vmul.f32 %v5852_v6, %v7425_v22  ;;  %5861 = vrsqrt.f32 %v2355_v19  ;;  %v2325_v55 = vmul.f32 0.015625, %v2289_v57  ;;  %v7640_v22 = vadd.f32 %v7503_v46, %v2448_v49 }
 0x419   : > { %v2326_v36 = vmul.f32 0.015625, %v2292_v9  ;;  %5863 = vrsqrt.f32 %v2356_v60  ;;  %v2505_v24 = vpack.c.bf16 %v7630_v41, %v7627_v47  ;;  %v2449_v20 = vmul.f32 %v7498_v30, %v2413_v32 }
 0x41a   : > { %v5854_v63 = vpop.eup %5853  ;;  %v2357_v17 = vadd.f32 1e-05, %v2325_v55  ;;  %v2450_v23 = vmul.f32 %v7498_v30, %v2414_v0 }
 0x41b   : > { %v2358_v10 = vadd.f32 1e-05, %v2326_v36  ;;  %v5856_v39 = vpop.eup %5855  ;;  %v2415_v54 = vmul.f32 %v5854_v63, %v7432_v3  ;;  %v2295_v62 = vpop.xlane.xlu1 %2294  ;;  %5408 = vmatmul.mubr.msk.bf16.gmra.mrb[32].mxu1 %vm1765_vm3, %v2505_v24  ;;  %v7643_v18 = vadd.f32 %v7503_v46, %v2449_v20 }
 0x41c   : > { %v2416_v53 = vmul.f32 %v5856_v39, %v7438_v29  ;;  %5865 = vrsqrt.f32 %v2357_v17  ;;  %v2327_v43 = vmul.f32 0.015625, %v2295_v62  ;;  %v7653_v61 = vadd.f32 %v7503_v46, %v2450_v23 }
 0x41d   : > { %5867 = vrsqrt.f32 %v2358_v10  ;;  %v2506_v42 = vpack.c.bf16 %v7643_v18, %v7640_v22  ;;  %v2451_v3 = vmul.f32 %v7498_v30, %v2415_v54 }
 0x41e   : > { %v5858_v31 = vpop.eup %5857  ;;  %v2359_v7 = vadd.f32 1e-05, %v2327_v43  ;;  %v2452_v45 = vmul.f32 %v7498_v30, %v2416_v53 }
 0x41f   : > { %v5860_v8 = vpop.eup %5859  ;;  %v2417_v2 = vmul.f32 %v5858_v31, %v7444_v44  ;;  %5411 = vmatprep.mubr.msk.bf16.mxu1 %vm1765_vm3, %v2506_v42  ;;  %v7656_v29 = vadd.f32 %v7503_v46, %v2451_v3  ;;  %v5805_v31 = vld [vmem:[%s6332_s28 + $0x30] sm:$0xff]  }
 0x420   : > { %v2418_v25 = vmul.f32 %v5860_v8, %v7450_v12  ;;  %5869 = vrsqrt.f32 %v2359_v7  ;;  %v7666_v57 = vadd.f32 %v7503_v46, %v2452_v45  ;;  %5435 = vmatprep.subr.bf16.mxu0 %v5805_v31  ;;  %v5806_v7 = vld [vmem:[%s6332_s28 + $0x38] sm:$0xff]   ;;  %v7715_v8 = vld [vmem:[%s6337_s14] sm:$0x7f] }
 0x421   : > { %v2507_v19 = vpack.c.bf16 %v7656_v29, %v7653_v61  ;;  %v2453_v60 = vmul.f32 %v7498_v30, %v2417_v2  ;;  %5436 = vmatpush3.bf16.msra.mxu0 %v5805_v31 }
 0x422   : > { %v5862_v6 = vpop.eup %5861  ;;  %v2454_v12 = vmul.f32 %v7498_v30, %v2418_v25  ;;  %5437 = vmatprep.subr.bf16.mxu0 %v5806_v7 }
 0x423   : > { %v5864_v44 = vpop.eup %5863  ;;  %v2419_v32 = vmul.f32 %v5862_v6, %v7456_v4  ;;  %5412 = vmatmul.mubr.msk.bf16.gmra.mrb[36].mxu1 %vm1765_vm3, %v2507_v19  ;;  %v7669_v9 = vadd.f32 %v7503_v46, %v2453_v60 }
 0x424   : > { %v2420_v49 = vmul.f32 %v5864_v44, %v7462_v28  ;;  %v7679_v20 = vadd.f32 %v7503_v46, %v2454_v12 }
 0x425   : > { %v2508_v0 = vpack.c.bf16 %v7669_v9, %v7666_v57  ;;  %v2455_v55 = vmul.f32 %v7498_v30, %v2419_v32  ;;  %5438 = vmatpush3.bf16.msra.mxu0 %v5806_v7 }
 0x426   : > { %v5866_v36 = vpop.eup %5865  ;;  %v2456_v17 = vmul.f32 %v7498_v30, %v2420_v49 }
 0x427   : > { %v5868_v24 = vpop.eup %5867  ;;  %v2421_v4 = vmul.f32 %v5866_v36, %v7468_v48  ;;  %5415 = vmatprep.mubr.msk.bf16.mxu1 %vm1765_vm3, %v2508_v0  ;;  %v7682_v63 = vadd.f32 %v7503_v46, %v2455_v55 }
 0x428   : > { %v2422_v28 = vmul.f32 %v5868_v24, %v7474_v11  ;;  %v7692_v62 = vadd.f32 %v7503_v46, %v2456_v17 }
 0x429   : > { %v2509_v10 = vpack.c.bf16 %v7682_v63, %v7679_v20  ;;  %v2457_v39 = vmul.f32 %v7498_v30, %v2421_v4 }
 0x42a   : > { %v5870_v54 = vpop.eup %5869  ;;  %v2458_v11 = vmul.f32 %v7498_v30, %v2422_v28 }
 0x42b   : > { %v2423_v48 = vmul.f32 %v5870_v54, %v7480_v37  ;;  %5416 = vmatmul.mubr.msk.bf16.gmra.mrb[40].mxu1 %vm1765_vm3, %v2509_v10  ;;  %v7695_v23 = vadd.f32 %v7503_v46, %v2457_v39 }
 0x42c   : > { %v7703_v37 = vadd.f32 %v7503_v46, %v2458_v11 }
 0x42d   : > { %v2510_v53 = vpack.c.bf16 %v7695_v23, %v7692_v62  ;;  %v2459_v43 = vmul.f32 %v7498_v30, %v2423_v48  ;;  %v2522_v30 = vsub.s32 3, %v7050_v13 }
 0x42f   : > { %5419 = vmatprep.mubr.msk.bf16.mxu1 %vm1765_vm3, %v2510_v53  ;;  %v7706_v42 = vadd.f32 %v7503_v46, %v2459_v43  ;;  %v7718_v2 = vrot.slane %v7715_v8, %v2522_v30 }
 0x431   : > { %v2511_v3 = vpack.c.bf16 %v7706_v42, %v7703_v37 }
 0x433   : > { %5420 = vmatmul.mubr.msk.bf16.gmra.mrb[44].mxu1 %vm1765_vm3, %v2511_v3 }
 0x4ce   : > { %v5393_v46 = vpop.f32.mrb[16].mxu1 }
 0x4cf   : > { %v2639_v45 = vadd.f32 %v5393_v46, %v7718_v2  ;;  %v2630_v25 = vpop.f32.mrb[17].mxu1 }
 0x4d0   : > { %v2631_v19 = vadd.f32 %v2630_v25, %v7718_v2  ;;  %v5394_v60 = vpop.f32.mrb[18].mxu1 }
 0x4d1   : > { %v2642_v6 = vadd.f32 %v5394_v60, %v7718_v2  ;;  %v2633_v44 = vpop.f32.mrb[19].mxu1  ;;  %v2759_v12 = vmax.f32 %v2639_v45, 0.0 }
 0x4d2   : > { %v2634_v32 = vadd.f32 %v2633_v44, %v7718_v2  ;;  %v2757_v0 = vmax.f32 %v2631_v19, 0.0 }
 0x4d3   : > { %v2760_v49 = vmax.f32 %v2642_v6, 0.0 }
 0x4d4   : > { %v2758_v55 = vmax.f32 %v2634_v32, 0.0 }
 0x4d5   : > { %v2790_v36 = vpack.c.bf16 %v2760_v49, %v2759_v12 }
 0x4d6   : > { %v2789_v24 = vpack.c.bf16 %v2758_v55, %v2757_v0  ;;  %v5397_v4 = vpop.f32.mrb[20].mxu1 }
 0x4d7   : > { %v2655_v17 = vadd.f32 %v5397_v4, %v7718_v2  ;;  %v2646_v28 = vpop.f32.mrb[21].mxu1 }
 0x4d8   : > { %v2647_v10 = vadd.f32 %v2646_v28, %v7718_v2  ;;  %v5398_v39 = vpop.f32.mrb[22].mxu1  ;;  %5439 = vmatprep.mubr.bf16.mxu0 %v2789_v24 }
 0x4d9   : > { %v2658_v54 = vadd.f32 %v5398_v39, %v7718_v2  ;;  %v2649_v48 = vpop.f32.mrb[23].mxu1  ;;  %5440 = vmatmul.mubr.bf16.vlgmr.msra.gmra.mrb[16].mxu0 %v2790_v36  ;;  %v2763_v53 = vmax.f32 %v2655_v17, 0.0 }
 0x4da   : > { %v2650_v11 = vadd.f32 %v2649_v48, %v7718_v2  ;;  %v2761_v3 = vmax.f32 %v2647_v10, 0.0 }
 0x4db   : > { %v2764_v43 = vmax.f32 %v2658_v54, 0.0 }
 0x4dc   : > { %v2762_v31 = vmax.f32 %v2650_v11, 0.0 }
 0x4dd   : > { %v2792_v7 = vpack.c.bf16 %v2764_v43, %v2763_v53 }
 0x4de   : > { %v2791_v30 = vpack.c.bf16 %v2762_v31, %v2761_v3  ;;  %v5401_v46 = vpop.f32.mrb[24].mxu1 }
 0x4df   : > { %v2671_v45 = vadd.f32 %v5401_v46, %v7718_v2  ;;  %v2662_v25 = vpop.f32.mrb[25].mxu1 }
 0x4e0   : > { %v2663_v19 = vadd.f32 %v2662_v25, %v7718_v2  ;;  %v5402_v60 = vpop.f32.mrb[26].mxu1  ;;  %5443 = vmatprep.mubr.bf16.mxu0 %v2791_v30 }
 0x4e1   : > { %v2674_v6 = vadd.f32 %v5402_v60, %v7718_v2  ;;  %v2665_v44 = vpop.f32.mrb[27].mxu1  ;;  %5444 = vmatmul.mubr.bf16.gmra.mrb[20].mxu0 %v2792_v7  ;;  %v2767_v12 = vmax.f32 %v2671_v45, 0.0 }
 0x4e2   : > { %v2666_v32 = vadd.f32 %v2665_v44, %v7718_v2  ;;  %v2765_v0 = vmax.f32 %v2663_v19, 0.0 }
 0x4e3   : > { %v2768_v49 = vmax.f32 %v2674_v6, 0.0 }
 0x4e4   : > { %v2766_v55 = vmax.f32 %v2666_v32, 0.0 }
 0x4e5   : > { %v2794_v36 = vpack.c.bf16 %v2768_v49, %v2767_v12 }
 0x4e6   : > { %v2793_v24 = vpack.c.bf16 %v2766_v55, %v2765_v0  ;;  %v5405_v4 = vpop.f32.mrb[28].mxu1 }
 0x4e7   : > { %v2687_v17 = vadd.f32 %v5405_v4, %v7718_v2  ;;  %v2678_v28 = vpop.f32.mrb[29].mxu1 }
 0x4e8   : > { %v2679_v10 = vadd.f32 %v2678_v28, %v7718_v2  ;;  %v5406_v39 = vpop.f32.mrb[30].mxu1  ;;  %5447 = vmatprep.mubr.bf16.mxu0 %v2793_v24 }
 0x4e9   : > { %v2690_v54 = vadd.f32 %v5406_v39, %v7718_v2  ;;  %v2681_v48 = vpop.f32.mrb[31].mxu1  ;;  %5448 = vmatmul.mubr.bf16.gmra.mrb[24].mxu0 %v2794_v36  ;;  %v2771_v53 = vmax.f32 %v2687_v17, 0.0 }
 0x4ea   : > { %v2682_v11 = vadd.f32 %v2681_v48, %v7718_v2  ;;  %v2769_v3 = vmax.f32 %v2679_v10, 0.0 }
 0x4eb   : > { %v2772_v43 = vmax.f32 %v2690_v54, 0.0 }
 0x4ec   : > { %v2770_v31 = vmax.f32 %v2682_v11, 0.0 }
 0x4ed   : > { %v2796_v7 = vpack.c.bf16 %v2772_v43, %v2771_v53 }
 0x4ee   : > { %v2795_v30 = vpack.c.bf16 %v2770_v31, %v2769_v3  ;;  %v5409_v46 = vpop.f32.mrb[32].mxu1 }
 0x4ef   : > { %v2703_v45 = vadd.f32 %v5409_v46, %v7718_v2  ;;  %v2694_v25 = vpop.f32.mrb[33].mxu1 }
 0x4f0   : > { %v2695_v19 = vadd.f32 %v2694_v25, %v7718_v2  ;;  %v5410_v60 = vpop.f32.mrb[34].mxu1  ;;  %5451 = vmatprep.mubr.bf16.mxu0 %v2795_v30 }
 0x4f1   : > { %v2706_v6 = vadd.f32 %v5410_v60, %v7718_v2  ;;  %v2697_v44 = vpop.f32.mrb[35].mxu1  ;;  %5452 = vmatmul.mubr.bf16.gmra.mrb[28].mxu0 %v2796_v7  ;;  %v2775_v12 = vmax.f32 %v2703_v45, 0.0 }
 0x4f2   : > { %v2698_v32 = vadd.f32 %v2697_v44, %v7718_v2  ;;  %v2773_v0 = vmax.f32 %v2695_v19, 0.0 }
 0x4f3   : > { %v2776_v49 = vmax.f32 %v2706_v6, 0.0 }
 0x4f4   : > { %v2774_v55 = vmax.f32 %v2698_v32, 0.0 }
 0x4f5   : > { %v2798_v36 = vpack.c.bf16 %v2776_v49, %v2775_v12 }
 0x4f6   : > { %v2797_v24 = vpack.c.bf16 %v2774_v55, %v2773_v0  ;;  %v5413_v4 = vpop.f32.mrb[36].mxu1 }
 0x4f7   : > { %v2719_v17 = vadd.f32 %v5413_v4, %v7718_v2  ;;  %v2710_v28 = vpop.f32.mrb[37].mxu1 }
 0x4f8   : > { %v2711_v10 = vadd.f32 %v2710_v28, %v7718_v2  ;;  %v5414_v39 = vpop.f32.mrb[38].mxu1  ;;  %5455 = vmatprep.mubr.bf16.mxu0 %v2797_v24 }
 0x4f9   : > { %v2722_v54 = vadd.f32 %v5414_v39, %v7718_v2  ;;  %v2713_v48 = vpop.f32.mrb[39].mxu1  ;;  %5456 = vmatmul.mubr.bf16.gmra.mrb[32].mxu0 %v2798_v36  ;;  %v2779_v53 = vmax.f32 %v2719_v17, 0.0 }
 0x4fa   : > { %v2714_v11 = vadd.f32 %v2713_v48, %v7718_v2  ;;  %v2777_v3 = vmax.f32 %v2711_v10, 0.0 }
 0x4fb   : > { %v2780_v43 = vmax.f32 %v2722_v54, 0.0 }
 0x4fc   : > { %v2778_v31 = vmax.f32 %v2714_v11, 0.0 }
 0x4fd   : > { %v2800_v7 = vpack.c.bf16 %v2780_v43, %v2779_v53 }
 0x4fe   : > { %v2799_v30 = vpack.c.bf16 %v2778_v31, %v2777_v3  ;;  %v5417_v46 = vpop.f32.mrb[40].mxu1 }
 0x4ff   : > { %v2735_v45 = vadd.f32 %v5417_v46, %v7718_v2  ;;  %v2726_v25 = vpop.f32.mrb[41].mxu1  ;;  %v2823_v46 = vsub.s32 4, %v7050_v13 }
 0x500   : > { %v2727_v19 = vadd.f32 %v2726_v25, %v7718_v2  ;;  %v5418_v60 = vpop.f32.mrb[42].mxu1  ;;  %5459 = vmatprep.mubr.bf16.mxu0 %v2799_v30 }
 0x501   : > { %v2738_v6 = vadd.f32 %v5418_v60, %v7718_v2  ;;  %v2729_v44 = vpop.f32.mrb[43].mxu1  ;;  %5460 = vmatmul.mubr.bf16.gmra.mrb[36].mxu0 %v2800_v7  ;;  %v2783_v12 = vmax.f32 %v2735_v45, 0.0  ;;  %v7754_v45 = vrot.slane %v7715_v8, %v2823_v46 }
 0x502   : > { %v2730_v32 = vadd.f32 %v2729_v44, %v7718_v2  ;;  %v2781_v0 = vmax.f32 %v2727_v19, 0.0 }
 0x503   : > { %v2784_v49 = vmax.f32 %v2738_v6, 0.0 }
 0x504   : > { %v2782_v55 = vmax.f32 %v2730_v32, 0.0 }
 0x505   : > { %v2802_v36 = vpack.c.bf16 %v2784_v49, %v2783_v12 }
 0x506   : > { %v2801_v24 = vpack.c.bf16 %v2782_v55, %v2781_v0  ;;  %v5421_v4 = vpop.f32.mrb[44].mxu1 }
 0x507   : > { %v2751_v17 = vadd.f32 %v5421_v4, %v7718_v2  ;;  %v2742_v28 = vpop.f32.mrb[45].mxu1 }
 0x508   : > { %v2743_v10 = vadd.f32 %v2742_v28, %v7718_v2  ;;  %v5422_v39 = vpop.f32.mrb[46].mxu1  ;;  %5463 = vmatprep.mubr.bf16.mxu0 %v2801_v24 }
 0x509   : > { %v2754_v54 = vadd.f32 %v5422_v39, %v7718_v2  ;;  %v2745_v48 = vpop.f32.mrb[47].mxu1  ;;  %5464 = vmatmul.mubr.bf16.gmra.mrb[40].mxu0 %v2802_v36  ;;  %v2787_v53 = vmax.f32 %v2751_v17, 0.0 }
 0x50a   : > { %v2746_v11 = vadd.f32 %v2745_v48, %v7718_v2  ;;  %v2785_v3 = vmax.f32 %v2743_v10, 0.0 }
 0x50b   : > { %v2788_v43 = vmax.f32 %v2754_v54, 0.0 }
 0x50c   : > { %v2786_v31 = vmax.f32 %v2746_v11, 0.0 }
 0x50d   : > { %v2804_v7 = vpack.c.bf16 %v2788_v43, %v2787_v53 }
 0x50e   : > { %v2803_v30 = vpack.c.bf16 %v2786_v31, %v2785_v3 }
 0x510   : > { %5467 = vmatprep.mubr.bf16.mxu0 %v2803_v30 }
 0x511   : > { %5468 = vmatmul.mubr.bf16.gmra.mrb[44].mxu0 %v2804_v7 }
 0x5ac   : > { %v5441_v25 = vpop.f32.mrb[16].mxu0 }
 0x5ad   : > { %v2916_v19 = vadd.f32 %v5441_v25, %v7754_v45  ;;  %v2907_v60 = vpop.f32.mrb[17].mxu0 }
 0x5ae   : > { %v2908_v6 = vadd.f32 %v2907_v60, %v7754_v45  ;;  %v5442_v2 = vpop.f32.mrb[18].mxu0 }
 0x5af   : > { %v2919_v44 = vadd.f32 %v5442_v2, %v7754_v45  ;;  %v2910_v32 = vpop.f32.mrb[19].mxu0  ;;  %v7760_v12 = vadd.f32 %v2916_v19, %v7521_v51 }
 0x5b0   : > { %v2911_v49 = vadd.f32 %v2910_v32, %v7754_v45  ;;  %v7769_v36 = vadd.f32 %v2908_v6, %v7511_v16 }
 0x5b1   : > { %v3072_v0 = vsel %vm1765_vm3, %v7760_v12, 0.0  ;;  %v7766_v55 = vadd.f32 %v2919_v44, %v7524_v52 }
 0x5b2   : > { %3073 = vadd.xlane.f32.xlu0 %v3072_v0  ;;  %v7774_v4 = vadd.f32 %v2911_v49, %v7514_v33  ;;  %v3066_v10 = vsel %vm1765_vm3, %v7769_v36, 0.0 }
 0x5b3   : > { %v3075_v24 = vsel %vm1765_vm3, %v7766_v55, 0.0 }
 0x5b4   : > { %3076 = vadd.xlane.f32.xlu1 %v3075_v24  ;;  %v5445_v51 = vpop.f32.mrb[20].mxu0  ;;  %v3069_v48 = vsel %vm1765_vm3, %v7774_v4, 0.0 }
 0x5b5   : > { %v2932_v17 = vadd.f32 %v5445_v51, %v7754_v45  ;;  %v2923_v28 = vpop.f32.mrb[21].mxu0 }
 0x5b6   : > { %v2924_v52 = vadd.f32 %v2923_v28, %v7754_v45  ;;  %3067 = vadd.xlane.f32.xlu0 %v3066_v10  ;;  %v5446_v16 = vpop.f32.mrb[22].mxu0 }
 0x5b7   : > { %v2935_v39 = vadd.f32 %v5446_v16, %v7754_v45  ;;  %v2926_v54 = vpop.f32.mrb[23].mxu0  ;;  %v7784_v33 = vadd.f32 %v2932_v17, %v7549_v56 }
 0x5b8   : > { %v2927_v11 = vadd.f32 %v2926_v54, %v7754_v45  ;;  %3070 = vadd.xlane.f32.xlu1 %v3069_v48  ;;  %v7793_v3 = vadd.f32 %v2924_v52, %v7536_v40 }
 0x5b9   : > { %v3084_v53 = vsel %vm1765_vm3, %v7784_v33, 0.0  ;;  %v7790_v43 = vadd.f32 %v2935_v39, %v7552_v1 }
 0x5ba   : > { %3085 = vadd.xlane.f32.xlu0 %v3084_v53  ;;  %v7798_v7 = vadd.f32 %v2927_v11, %v7539_v26  ;;  %v3078_v25 = vsel %vm1765_vm3, %v7793_v3, 0.0 }
 0x5bb   : > { %v3087_v31 = vsel %vm1765_vm3, %v7790_v43, 0.0 }
 0x5bc   : > { %3088 = vadd.xlane.f32.xlu1 %v3087_v31  ;;  %v5449_v56 = vpop.f32.mrb[24].mxu0  ;;  %v3081_v6 = vsel %vm1765_vm3, %v7798_v7, 0.0 }
 0x5bd   : > { %v2948_v30 = vadd.f32 %v5449_v56, %v7754_v45  ;;  %v2939_v46 = vpop.f32.mrb[25].mxu0 }
 0x5be   : > { %v2940_v1 = vadd.f32 %v2939_v46, %v7754_v45  ;;  %3079 = vadd.xlane.f32.xlu0 %v3078_v25  ;;  %v5450_v40 = vpop.f32.mrb[26].mxu0 }
 0x5bf   : > { %v2951_v19 = vadd.f32 %v5450_v40, %v7754_v45  ;;  %v2942_v60 = vpop.f32.mrb[27].mxu0  ;;  %v7808_v26 = vadd.f32 %v2948_v30, %v7575_v35 }
 0x5c0   : > { %v2943_v2 = vadd.f32 %v2942_v60, %v7754_v45  ;;  %3082 = vadd.xlane.f32.xlu1 %v3081_v6  ;;  %v7817_v49 = vadd.f32 %v2940_v1, %v7562_v34 }
 0x5c1   : > { %v3096_v44 = vsel %vm1765_vm3, %v7808_v26, 0.0  ;;  %v7814_v32 = vadd.f32 %v2951_v19, %v7578_v38 }
 0x5c2   : > { %3097 = vadd.xlane.f32.xlu0 %v3096_v44  ;;  %v7822_v24 = vadd.f32 %v2943_v2, %v7565_v5  ;;  %v3090_v28 = vsel %vm1765_vm3, %v7817_v49, 0.0 }
 0x5c3   : > { %v3099_v0 = vsel %vm1765_vm3, %v7814_v32, 0.0 }
 0x5c4   : > { %3100 = vadd.xlane.f32.xlu1 %v3099_v0  ;;  %v5453_v35 = vpop.f32.mrb[28].mxu0  ;;  %v3093_v16 = vsel %vm1765_vm3, %v7822_v24, 0.0 }
 0x5c5   : > { %v2964_v51 = vadd.f32 %v5453_v35, %v7754_v45  ;;  %v2955_v17 = vpop.f32.mrb[29].mxu0 }
 0x5c6   : > { %v2956_v38 = vadd.f32 %v2955_v17, %v7754_v45  ;;  %3091 = vadd.xlane.f32.xlu0 %v3090_v28  ;;  %v5454_v34 = vpop.f32.mrb[30].mxu0 }
 0x5c7   : > { %v2967_v10 = vadd.f32 %v5454_v34, %v7754_v45  ;;  %v2958_v52 = vpop.f32.mrb[31].mxu0  ;;  %v7832_v5 = vadd.f32 %v2964_v51, %v7601_v14 }
 0x5c8   : > { %v2959_v39 = vadd.f32 %v2958_v52, %v7754_v45  ;;  %3094 = vadd.xlane.f32.xlu1 %v3093_v16  ;;  %v7841_v11 = vadd.f32 %v2956_v38, %v7588_v27 }
 0x5c9   : > { %v3108_v54 = vsel %vm1765_vm3, %v7832_v5, 0.0  ;;  %v7838_v48 = vadd.f32 %v2967_v10, %v7604_v15 }
 0x5ca   : > { %3109 = vadd.xlane.f32.xlu0 %v3108_v54  ;;  %v7846_v31 = vadd.f32 %v2959_v39, %v7591_v59  ;;  %v3102_v46 = vsel %vm1765_vm3, %v7841_v11, 0.0 }
 0x5cb   : > { %v3111_v53 = vsel %vm1765_vm3, %v7838_v48, 0.0 }
 0x5cc   : > { %3112 = vadd.xlane.f32.xlu1 %v3111_v53  ;;  %v5457_v14 = vpop.f32.mrb[32].mxu0  ;;  %v3105_v40 = vsel %vm1765_vm3, %v7846_v31, 0.0 }
 0x5cd   : > { %v2980_v56 = vadd.f32 %v5457_v14, %v7754_v45  ;;  %v2971_v30 = vpop.f32.mrb[33].mxu0 }
 0x5ce   : > { %v2972_v15 = vadd.f32 %v2971_v30, %v7754_v45  ;;  %3103 = vadd.xlane.f32.xlu0 %v3102_v46  ;;  %v5458_v27 = vpop.f32.mrb[34].mxu0 }
 0x5cf   : > { %v2983_v25 = vadd.f32 %v5458_v27, %v7754_v45  ;;  %v2974_v1 = vpop.f32.mrb[35].mxu0  ;;  %v7856_v59 = vadd.f32 %v2980_v56, %v7627_v47 }
 0x5d0   : > { %v2975_v19 = vadd.f32 %v2974_v1, %v7754_v45  ;;  %3106 = vadd.xlane.f32.xlu1 %v3105_v40  ;;  %v7865_v2 = vadd.f32 %v2972_v15, %v7614_v21 }
 0x5d1   : > { %v3120_v60 = vsel %vm1765_vm3, %v7856_v59, 0.0  ;;  %v7862_v6 = vadd.f32 %v2983_v25, %v7630_v41 }
 0x5d2   : > { %3121 = vadd.xlane.f32.xlu0 %v3120_v60  ;;  %v7870_v0 = vadd.f32 %v2975_v19, %v7617_v58  ;;  %v3114_v17 = vsel %vm1765_vm3, %v7865_v2, 0.0 }
 0x5d3   : > { %v3123_v44 = vsel %vm1765_vm3, %v7862_v6, 0.0 }
 0x5d4   : > { %3124 = vadd.xlane.f32.xlu1 %v3123_v44  ;;  %v5461_v47 = vpop.f32.mrb[36].mxu0  ;;  %v3117_v34 = vsel %vm1765_vm3, %v7870_v0, 0.0 }
 0x5d5   : > { %v2996_v35 = vadd.f32 %v5461_v47, %v7754_v45  ;;  %v2987_v51 = vpop.f32.mrb[37].mxu0 }
 0x5d6   : > { %v2988_v41 = vadd.f32 %v2987_v51, %v7754_v45  ;;  %3115 = vadd.xlane.f32.xlu0 %v3114_v17  ;;  %v5462_v21 = vpop.f32.mrb[38].mxu0 }
 0x5d7   : > { %v2999_v28 = vadd.f32 %v5462_v21, %v7754_v45  ;;  %v2990_v38 = vpop.f32.mrb[39].mxu0  ;;  %v7880_v58 = vadd.f32 %v2996_v35, %v7653_v61 }
 0x5d8   : > { %v2991_v10 = vadd.f32 %v2990_v38, %v7754_v45  ;;  %3118 = vadd.xlane.f32.xlu1 %v3117_v34  ;;  %v7889_v39 = vadd.f32 %v2988_v41, %v7640_v22 }
 0x5d9   : > { %v3132_v52 = vsel %vm1765_vm3, %v7880_v58, 0.0  ;;  %v7886_v16 = vadd.f32 %v2999_v28, %v7656_v29 }
 0x5da   : > { %3133 = vadd.xlane.f32.xlu0 %v3132_v52  ;;  %v7894_v53 = vadd.f32 %v2991_v10, %v7643_v18  ;;  %v3126_v30 = vsel %vm1765_vm3, %v7889_v39, 0.0 }
 0x5db   : > { %v3135_v54 = vsel %vm1765_vm3, %v7886_v16, 0.0 }
 0x5dc   : > { %3136 = vadd.xlane.f32.xlu1 %v3135_v54  ;;  %v5465_v61 = vpop.f32.mrb[40].mxu0  ;;  %v3129_v27 = vsel %vm1765_vm3, %v7894_v53, 0.0 }
 0x5dd   : > { %v3012_v14 = vadd.f32 %v5465_v61, %v7754_v45  ;;  %v3003_v56 = vpop.f32.mrb[41].mxu0 }
 0x5de   : > { %v3004_v29 = vadd.f32 %v3003_v56, %v7754_v45  ;;  %3127 = vadd.xlane.f32.xlu0 %v3126_v30  ;;  %v5466_v22 = vpop.f32.mrb[42].mxu0 }
 0x5df   : > { %v3015_v46 = vadd.f32 %v5466_v22, %v7754_v45  ;;  %v3006_v15 = vpop.f32.mrb[43].mxu0  ;;  %v7904_v18 = vadd.f32 %v3012_v14, %v7679_v20 }
 0x5e0   : > { %v3007_v25 = vadd.f32 %v3006_v15, %v7754_v45  ;;  %3130 = vadd.xlane.f32.xlu1 %v3129_v27  ;;  %v7913_v19 = vadd.f32 %v3004_v29, %v7666_v57 }
 0x5e1   : > { %v3144_v1 = vsel %vm1765_vm3, %v7904_v18, 0.0  ;;  %v7910_v40 = vadd.f32 %v3015_v46, %v7682_v63 }
 0x5e2   : > { %3145 = vadd.xlane.f32.xlu0 %v3144_v1  ;;  %v7918_v44 = vadd.f32 %v3007_v25, %v7669_v9  ;;  %v3138_v35 = vsel %vm1765_vm3, %v7913_v19, 0.0 }
 0x5e3   : > { %v3147_v60 = vsel %vm1765_vm3, %v7910_v40, 0.0 }
 0x5e4   : > { %3148 = vadd.xlane.f32.xlu1 %v3147_v60  ;;  %v5469_v20 = vpop.f32.mrb[44].mxu0  ;;  %v3141_v21 = vsel %vm1765_vm3, %v7918_v44, 0.0 }
 0x5e5   : > { %v3019_v47 = vpop.f32.mrb[45].mxu0  ;;  %v3028_v51 = vadd.f32 %v5469_v20, %v7754_v45 }
 0x5e6   : > { %v3020_v63 = vadd.f32 %v3019_v47, %v7754_v45  ;;  %3139 = vadd.xlane.f32.xlu0 %v3138_v35  ;;  %v5470_v57 = vpop.f32.mrb[46].mxu0 }
 0x5e7   : > { %v3031_v17 = vadd.f32 %v5470_v57, %v7754_v45  ;;  %v3022_v41 = vpop.f32.mrb[47].mxu0  ;;  %v7937_v10 = vadd.f32 %v3028_v51, %v7703_v37 }
 0x5e8   : > { %v3023_v9 = vadd.f32 %v3022_v41, %v7754_v45  ;;  %3142 = vadd.xlane.f32.xlu1 %v3141_v21  ;;  %v7929_v28 = vadd.f32 %v3020_v63, %v7692_v62 }
 0x5e9   : > { %v7942_v54 = vadd.f32 %v3031_v17, %v7706_v42  ;;  %v3156_v62 = vsel %vm1765_vm3, %v7937_v10, 0.0 }
 0x5ea   : > { %v3150_v38 = vsel %vm1765_vm3, %v7929_v28, 0.0  ;;  %v7934_v34 = vadd.f32 %v3023_v9, %v7695_v23 }
 0x5eb   : > { %3151 = vadd.xlane.f32.xlu0 %v3150_v38  ;;  %v3159_v45 = vsel %vm1765_vm3, %v7942_v54, 0.0 }
 0x5ec   : > { %v3153_v52 = vsel %vm1765_vm3, %v7934_v34, 0.0 }
 0x5ed   : > { %3154 = vadd.xlane.f32.xlu1 %v3153_v52 }
 0x5ef   : > { %3157 = vadd.xlane.f32.xlu0 %v3156_v62 }
 0x5f1   : > { %3160 = vadd.xlane.f32.xlu1 %v3159_v45 }
 0x63f   : > { %v3074_v23 = vpop.xlane.xlu0 %3073 }
 0x640   : > { %v3164_v61 = vmul.f32 0.015625, %v3074_v23 }
 0x641   : > { %v3077_v37 = vpop.xlane.xlu1 %3076 }
 0x642   : > { %v7949_v14 = vsub.f32 %v7760_v12, %v3164_v61  ;;  %v3165_v56 = vmul.f32 0.015625, %v3077_v37 }
 0x643   : > { %v3068_v30 = vpop.xlane.xlu0 %3067 }
 0x644   : > { %v7952_v42 = vsub.f32 %v7766_v55, %v3165_v56  ;;  %v3162_v29 = vmul.f32 0.015625, %v3068_v30  ;;  %v3228_v22 = vmul.f32 %v7949_v14, %v7949_v14 }
 0x645   : > { %v3071_v46 = vpop.xlane.xlu1 %3070 }
 0x646   : > { %v7957_v15 = vsub.f32 %v7769_v36, %v3162_v29  ;;  %v3163_v27 = vmul.f32 0.015625, %v3071_v46  ;;  %v3264_v25 = vsel %vm1765_vm3, %v3228_v22, 0.0  ;;  %v3229_v12 = vmul.f32 %v7952_v42, %v7952_v42 }
 0x647   : > { %3265 = vadd.xlane.f32.xlu0 %v3264_v25  ;;  %v3086_v1 = vpop.xlane.xlu0 %3085 }
 0x648   : > { %v7963_v60 = vsub.f32 %v7774_v4, %v3163_v27  ;;  %v3168_v55 = vmul.f32 0.015625, %v3086_v1  ;;  %v3267_v20 = vsel %vm1765_vm3, %v3229_v12, 0.0  ;;  %v3226_v47 = vmul.f32 %v7957_v15, %v7957_v15 }
 0x649   : > { %v3089_v35 = vpop.xlane.xlu1 %3088  ;;  %3268 = vadd.xlane.f32.xlu1 %v3267_v20 }
 0x64a   : > { %v7969_v36 = vsub.f32 %v7784_v33, %v3168_v55  ;;  %v3169_v51 = vmul.f32 0.015625, %v3089_v35  ;;  %v3258_v63 = vsel %vm1765_vm3, %v3226_v47, 0.0  ;;  %v3227_v57 = vmul.f32 %v7963_v60, %v7963_v60 }
 0x64b   : > { %3259 = vadd.xlane.f32.xlu0 %v3258_v63  ;;  %v3080_v4 = vpop.xlane.xlu0 %3079 }
 0x64c   : > { %v7975_v17 = vsub.f32 %v7790_v43, %v3169_v51  ;;  %v3166_v41 = vmul.f32 0.015625, %v3080_v4  ;;  %v3261_v21 = vsel %vm1765_vm3, %v3227_v57, 0.0  ;;  %v3232_v9 = vmul.f32 %v7969_v36, %v7969_v36 }
 0x64d   : > { %v3083_v38 = vpop.xlane.xlu1 %3082  ;;  %3262 = vadd.xlane.f32.xlu1 %v3261_v21 }
 0x64e   : > { %v7981_v33 = vsub.f32 %v7793_v3, %v3166_v41  ;;  %v3167_v52 = vmul.f32 0.015625, %v3083_v38  ;;  %v3276_v62 = vsel %vm1765_vm3, %v3232_v9, 0.0  ;;  %v3233_v45 = vmul.f32 %v7975_v17, %v7975_v17 }
 0x64f   : > { %3277 = vadd.xlane.f32.xlu0 %v3276_v62  ;;  %v3098_v43 = vpop.xlane.xlu0 %3097 }
 0x650   : > { %v7987_v23 = vsub.f32 %v7798_v7, %v3167_v52  ;;  %v3172_v61 = vmul.f32 0.015625, %v3098_v43  ;;  %v3279_v37 = vsel %vm1765_vm3, %v3233_v45, 0.0  ;;  %v3230_v56 = vmul.f32 %v7981_v33, %v7981_v33 }
 0x651   : > { %v3101_v30 = vpop.xlane.xlu1 %3100  ;;  %3280 = vadd.xlane.f32.xlu1 %v3279_v37 }
 0x652   : > { %v7993_v3 = vsub.f32 %v7808_v26, %v3172_v61  ;;  %v3173_v29 = vmul.f32 0.015625, %v3101_v30  ;;  %v3270_v22 = vsel %vm1765_vm3, %v3230_v56, 0.0  ;;  %v3231_v46 = vmul.f32 %v7987_v23, %v7987_v23 }
 0x653   : > { %3271 = vadd.xlane.f32.xlu0 %v3270_v22  ;;  %v3092_v7 = vpop.xlane.xlu0 %3091 }
 0x654   : > { %v7999_v27 = vsub.f32 %v7814_v32, %v3173_v29  ;;  %v3170_v25 = vmul.f32 0.015625, %v3092_v7  ;;  %v3273_v12 = vsel %vm1765_vm3, %v3231_v46, 0.0  ;;  %v3236_v1 = vmul.f32 %v7993_v3, %v7993_v3 }
 0x655   : > { %v3095_v55 = vpop.xlane.xlu1 %3094  ;;  %3274 = vadd.xlane.f32.xlu1 %v3273_v12 }
 0x656   : > { %v8005_v26 = vsub.f32 %v7817_v49, %v3170_v25  ;;  %v3171_v20 = vmul.f32 0.015625, %v3095_v55  ;;  %v3288_v47 = vsel %vm1765_vm3, %v3236_v1, 0.0  ;;  %v3237_v35 = vmul.f32 %v7999_v27, %v7999_v27 }
 0x657   : > { %3289 = vadd.xlane.f32.xlu0 %v3288_v47  ;;  %v3110_v32 = vpop.xlane.xlu0 %3109 }
 0x658   : > { %v8011_v51 = vsub.f32 %v7822_v24, %v3171_v20  ;;  %v3176_v63 = vmul.f32 0.015625, %v3110_v32  ;;  %v3291_v57 = vsel %vm1765_vm3, %v3237_v35, 0.0  ;;  %v3234_v4 = vmul.f32 %v8005_v26, %v8005_v26 }
 0x659   : > { %v3113_v41 = vpop.xlane.xlu1 %3112  ;;  %3292 = vadd.xlane.f32.xlu1 %v3291_v57 }
 0x65a   : > { %v8017_v49 = vsub.f32 %v7832_v5, %v3176_v63  ;;  %v3177_v21 = vmul.f32 0.015625, %v3113_v41  ;;  %v3282_v9 = vsel %vm1765_vm3, %v3234_v4, 0.0  ;;  %v3235_v38 = vmul.f32 %v8011_v51, %v8011_v51 }
 0x65b   : > { %3283 = vadd.xlane.f32.xlu0 %v3282_v9  ;;  %v3104_v24 = vpop.xlane.xlu0 %3103 }
 0x65c   : > { %v8023_v52 = vsub.f32 %v7838_v48, %v3177_v21  ;;  %v3174_v62 = vmul.f32 0.015625, %v3104_v24  ;;  %v3285_v45 = vsel %vm1765_vm3, %v3235_v38, 0.0  ;;  %v3240_v43 = vmul.f32 %v8017_v49, %v8017_v49 }
 0x65d   : > { %v3107_v61 = vpop.xlane.xlu1 %3106  ;;  %3286 = vadd.xlane.f32.xlu1 %v3285_v45 }
 0x65e   : > { %v8029_v5 = vsub.f32 %v7841_v11, %v3174_v62  ;;  %v3175_v37 = vmul.f32 0.015625, %v3107_v61  ;;  %v3300_v56 = vsel %vm1765_vm3, %v3240_v43, 0.0  ;;  %v3241_v30 = vmul.f32 %v8023_v52, %v8023_v52 }
 0x65f   : > { %3301 = vadd.xlane.f32.xlu0 %v3300_v56  ;;  %v3122_v48 = vpop.xlane.xlu0 %3121 }
 0x660   : > { %v8035_v29 = vsub.f32 %v7846_v31, %v3175_v37  ;;  %v3180_v22 = vmul.f32 0.015625, %v3122_v48  ;;  %v3303_v46 = vsel %vm1765_vm3, %v3241_v30, 0.0  ;;  %v3238_v7 = vmul.f32 %v8029_v5, %v8029_v5 }
 0x661   : > { %v3125_v25 = vpop.xlane.xlu1 %3124  ;;  %3304 = vadd.xlane.f32.xlu1 %v3303_v46 }
 0x662   : > { %v8041_v11 = vsub.f32 %v7856_v59, %v3180_v22  ;;  %v3181_v12 = vmul.f32 0.015625, %v3125_v25  ;;  %v3294_v1 = vsel %vm1765_vm3, %v3238_v7, 0.0  ;;  %v3239_v55 = vmul.f32 %v8035_v29, %v8035_v29 }
 0x663   : > { %3295 = vadd.xlane.f32.xlu0 %v3294_v1  ;;  %v3116_v31 = vpop.xlane.xlu0 %3115 }
 0x664   : > { %v8047_v20 = vsub.f32 %v7862_v6, %v3181_v12  ;;  %v3178_v47 = vmul.f32 0.015625, %v3116_v31  ;;  %v3297_v35 = vsel %vm1765_vm3, %v3239_v55, 0.0  ;;  %v3244_v32 = vmul.f32 %v8041_v11, %v8041_v11 }
 0x665   : > { %v3119_v63 = vpop.xlane.xlu1 %3118  ;;  %3298 = vadd.xlane.f32.xlu1 %v3297_v35 }
 0x666   : > { %v8053_v59 = vsub.f32 %v7865_v2, %v3178_v47  ;;  %v3179_v57 = vmul.f32 0.015625, %v3119_v63  ;;  %v3312_v4 = vsel %vm1765_vm3, %v3244_v32, 0.0  ;;  %v3245_v41 = vmul.f32 %v8047_v20, %v8047_v20 }
 0x667   : > { %3313 = vadd.xlane.f32.xlu0 %v3312_v4  ;;  %v3134_v6 = vpop.xlane.xlu0 %3133 }
 0x668   : > { %v8059_v21 = vsub.f32 %v7870_v0, %v3179_v57  ;;  %v3184_v9 = vmul.f32 0.015625, %v3134_v6  ;;  %v3315_v38 = vsel %vm1765_vm3, %v3245_v41, 0.0  ;;  %v3242_v24 = vmul.f32 %v8053_v59, %v8053_v59 }
 0x669   : > { %v3137_v62 = vpop.xlane.xlu1 %3136  ;;  %3316 = vadd.xlane.f32.xlu1 %v3315_v38 }
 0x66a   : > { %v8065_v2 = vsub.f32 %v7880_v58, %v3184_v9  ;;  %v3185_v45 = vmul.f32 0.015625, %v3137_v62  ;;  %v3306_v43 = vsel %vm1765_vm3, %v3242_v24, 0.0  ;;  %v3243_v61 = vmul.f32 %v8059_v21, %v8059_v21 }
 0x66b   : > { %3307 = vadd.xlane.f32.xlu0 %v3306_v43  ;;  %v3128_v0 = vpop.xlane.xlu0 %3127 }
 0x66c   : > { %v8071_v37 = vsub.f32 %v7886_v16, %v3185_v45  ;;  %v3182_v56 = vmul.f32 0.015625, %v3128_v0  ;;  %v3309_v30 = vsel %vm1765_vm3, %v3243_v61, 0.0  ;;  %v3248_v48 = vmul.f32 %v8065_v2, %v8065_v2 }
 0x66d   : > { %v3131_v22 = vpop.xlane.xlu1 %3130  ;;  %3310 = vadd.xlane.f32.xlu1 %v3309_v30 }
 0x66e   : > { %v8077_v58 = vsub.f32 %v7889_v39, %v3182_v56  ;;  %v3183_v46 = vmul.f32 0.015625, %v3131_v22  ;;  %v3324_v7 = vsel %vm1765_vm3, %v3248_v48, 0.0  ;;  %v3249_v25 = vmul.f32 %v8071_v37, %v8071_v37 }
 0x66f   : > { %3325 = vadd.xlane.f32.xlu0 %v3324_v7  ;;  %v3146_v16 = vpop.xlane.xlu0 %3145 }
 0x670   : > { %v8083_v12 = vsub.f32 %v7894_v53, %v3183_v46  ;;  %v3188_v1 = vmul.f32 0.015625, %v3146_v16  ;;  %v3327_v55 = vsel %vm1765_vm3, %v3249_v25, 0.0  ;;  %v3246_v31 = vmul.f32 %v8077_v58, %v8077_v58 }
 0x671   : > { %v3149_v47 = vpop.xlane.xlu1 %3148  ;;  %3328 = vadd.xlane.f32.xlu1 %v3327_v55 }
 0x672   : > { %v8089_v39 = vsub.f32 %v7904_v18, %v3188_v1  ;;  %v3189_v35 = vmul.f32 0.015625, %v3149_v47  ;;  %v3318_v32 = vsel %vm1765_vm3, %v3246_v31, 0.0  ;;  %v3247_v63 = vmul.f32 %v8083_v12, %v8083_v12 }
 0x673   : > { %3319 = vadd.xlane.f32.xlu0 %v3318_v32  ;;  %v3140_v53 = vpop.xlane.xlu0 %3139 }
 0x674   : > { %v8095_v57 = vsub.f32 %v7910_v40, %v3189_v35  ;;  %v3186_v4 = vmul.f32 0.015625, %v3140_v53  ;;  %v3321_v41 = vsel %vm1765_vm3, %v3247_v63, 0.0  ;;  %v3252_v6 = vmul.f32 %v8089_v39, %v8089_v39 }
 0x675   : > { %v3143_v9 = vpop.xlane.xlu1 %3142  ;;  %3322 = vadd.xlane.f32.xlu1 %v3321_v41 }
 0x676   : > { %v8101_v18 = vsub.f32 %v7913_v19, %v3186_v4  ;;  %v3187_v38 = vmul.f32 0.015625, %v3143_v9  ;;  %v3336_v24 = vsel %vm1765_vm3, %v3252_v6, 0.0  ;;  %v3253_v62 = vmul.f32 %v8095_v57, %v8095_v57 }
 0x677   : > { %3337 = vadd.xlane.f32.xlu0 %v3336_v24 }
 0x678   : > { %v8107_v40 = vsub.f32 %v7918_v44, %v3187_v38  ;;  %v3152_v45 = vpop.xlane.xlu0 %3151  ;;  %v3339_v43 = vsel %vm1765_vm3, %v3253_v62, 0.0  ;;  %v3250_v61 = vmul.f32 %v8101_v18, %v8101_v18 }
 0x679   : > { %v3190_v0 = vmul.f32 0.015625, %v3152_v45  ;;  %3340 = vadd.xlane.f32.xlu1 %v3339_v43 }
 0x67a   : > { %v3155_v19 = vpop.xlane.xlu1 %3154  ;;  %v3330_v56 = vsel %vm1765_vm3, %v3250_v61, 0.0  ;;  %v3251_v30 = vmul.f32 %v8107_v40, %v8107_v40 }
 0x67b   : > { %v8116_v48 = vsub.f32 %v7929_v28, %v3190_v0  ;;  %v3191_v22 = vmul.f32 0.015625, %v3155_v19  ;;  %3331 = vadd.xlane.f32.xlu0 %v3330_v56 }
 0x67c   : > { %v3158_v44 = vpop.xlane.xlu0 %3157  ;;  %v3333_v46 = vsel %vm1765_vm3, %v3251_v30, 0.0  ;;  %v3484_v30 = vsub.s32 5, %v7050_v13 }
 0x67d   : > { %v8120_v7 = vsub.f32 %v7934_v34, %v3191_v22  ;;  %v3192_v25 = vmul.f32 0.015625, %v3158_v44  ;;  %3334 = vadd.xlane.f32.xlu1 %v3333_v46  ;;  %v3254_v16 = vmul.f32 %v8116_v48, %v8116_v48 }
 0x67e   : > { %v3161_v1 = vpop.xlane.xlu1 %3160 }
 0x67f   : > { %v8125_v55 = vsub.f32 %v7937_v10, %v3192_v25  ;;  %v3193_v31 = vmul.f32 0.015625, %v3161_v1  ;;  %v3342_v28 = vsel %vm1765_vm3, %v3254_v16, 0.0  ;;  %v3255_v47 = vmul.f32 %v8120_v7, %v8120_v7 }
 0x680   : > { %3343 = vadd.xlane.f32.xlu0 %v3342_v28  ;;  %v3520_v25 = vsub.s32 6, %v7050_v13  ;;  %v8143_v28 = vrot.slane %v7715_v8, %v3484_v30 }
 0x681   : > { %v8131_v35 = vsub.f32 %v7942_v54, %v3193_v31  ;;  %v3345_v34 = vsel %vm1765_vm3, %v3255_v47, 0.0  ;;  %v3256_v32 = vmul.f32 %v8125_v55, %v8125_v55 }
 0x682   : > { %3346 = vadd.xlane.f32.xlu1 %v3345_v34 }
 0x683   : > { %v3348_v63 = vsel %vm1765_vm3, %v3256_v32, 0.0  ;;  %v3257_v10 = vmul.f32 %v8131_v35, %v8131_v35 }
 0x684   : > { %3349 = vadd.xlane.f32.xlu0 %v3348_v63 }
 0x685   : > { %v3351_v53 = vsel %vm1765_vm3, %v3257_v10, 0.0  ;;  %v5936_v10 = vld [vmem:[%s6337_s14] sm:$0x7f] }
 0x686   : > { %3352 = vadd.xlane.f32.xlu1 %v3351_v53  ;;  %v8146_v53 = vrot.slane %v5936_v10, %v3520_v25 }
 0x6d4   : > { %v3266_v4 = vpop.xlane.xlu0 %3265 }
 0x6d5   : > { %v3356_v41 = vmul.f32 0.015625, %v3266_v4 }
 0x6d6   : > { %v3269_v6 = vpop.xlane.xlu1 %3268 }
 0x6d7   : > { %v3388_v54 = vadd.f32 1e-05, %v3356_v41  ;;  %v3357_v9 = vmul.f32 0.015625, %v3269_v6 }
 0x6d8   : > { %v3260_v38 = vpop.xlane.xlu0 %3259 }
 0x6d9   : > { %5871 = vrsqrt.f32 %v3388_v54  ;;  %v3389_v24 = vadd.f32 1e-05, %v3357_v9  ;;  %v3354_v62 = vmul.f32 0.015625, %v3260_v38 }
 0x6da   : > { %v3263_v45 = vpop.xlane.xlu1 %3262 }
 0x6db   : > { %5873 = vrsqrt.f32 %v3389_v24  ;;  %v3386_v43 = vadd.f32 1e-05, %v3354_v62  ;;  %v3355_v61 = vmul.f32 0.015625, %v3263_v45 }
 0x6dc   : > { %v3278_v0 = vpop.xlane.xlu0 %3277 }
 0x6dd   : > { %5875 = vrsqrt.f32 %v3386_v43  ;;  %v3387_v19 = vadd.f32 1e-05, %v3355_v61  ;;  %v3360_v56 = vmul.f32 0.015625, %v3278_v0 }
 0x6de   : > { %v3281_v22 = vpop.xlane.xlu1 %3280 }
 0x6df   : > { %5877 = vrsqrt.f32 %v3387_v19  ;;  %v3392_v44 = vadd.f32 1e-05, %v3360_v56  ;;  %v3361_v46 = vmul.f32 0.015625, %v3281_v22 }
 0x6e0   : > { %v3272_v16 = vpop.xlane.xlu0 %3271 }
 0x6e1   : > { %5879 = vrsqrt.f32 %v3392_v44  ;;  %v3393_v1 = vadd.f32 1e-05, %v3361_v46  ;;  %v3358_v31 = vmul.f32 0.015625, %v3272_v16 }
 0x6e2   : > { %v3275_v47 = vpop.xlane.xlu1 %3274 }
 0x6e3   : > { %v5872_v34 = vpop.eup %5871  ;;  %5881 = vrsqrt.f32 %v3393_v1  ;;  %v3390_v32 = vadd.f32 1e-05, %v3358_v31  ;;  %v3359_v63 = vmul.f32 0.015625, %v3275_v47 }
 0x6e4   : > { %v3452_v4 = vmul.f32 %v5872_v34, %v7949_v14  ;;  %v3290_v41 = vpop.xlane.xlu0 %3289 }
 0x6e5   : > { %v5874_v6 = vpop.eup %5873  ;;  %5883 = vrsqrt.f32 %v3390_v32  ;;  %v3391_v13 = vadd.f32 1e-05, %v3359_v63  ;;  %v3364_v54 = vmul.f32 0.015625, %v3290_v41 }
 0x6e6   : > { %v3488_v9 = vmul.f32 %v8143_v28, %v3452_v4  ;;  %v3453_v8 = vmul.f32 %v5874_v6, %v7952_v42  ;;  %v3293_v38 = vpop.xlane.xlu1 %3292 }
 0x6e7   : > { %v5876_v24 = vpop.eup %5875  ;;  %5885 = vrsqrt.f32 %v3391_v13  ;;  %v3396_v62 = vadd.f32 1e-05, %v3364_v54  ;;  %v3365_v45 = vmul.f32 0.015625, %v3293_v38 }
 0x6e8   : > { %v8152_v43 = vadd.f32 %v8146_v53, %v3488_v9  ;;  %v3489_v61 = vmul.f32 %v8143_v28, %v3453_v8  ;;  %v3450_v14 = vmul.f32 %v5876_v24, %v7957_v15  ;;  %v3284_v0 = vpop.xlane.xlu0 %3283 }
 0x6e9   : > { %v5878_v19 = vpop.eup %5877  ;;  %5887 = vrsqrt.f32 %v3396_v62  ;;  %v3397_v56 = vadd.f32 1e-05, %v3365_v45  ;;  %v3362_v30 = vmul.f32 0.015625, %v3284_v0 }
 0x6ea   : > { %3556 = vst.msk [vmem:[#allocation2 + $0x10] sm:$0xff] %vm1765_vm3, %v8152_v43  ;;  %v8159_v42 = vadd.f32 %v8146_v53, %v3489_v61  ;;  %v3486_v22 = vmul.f32 %v8143_v28, %v3450_v14  ;;  %v3451_v44 = vmul.f32 %v5878_v19, %v7963_v60  ;;  %v3287_v46 = vpop.xlane.xlu1 %3286 }
 0x6eb   : > { %v5880_v25 = vpop.eup %5879  ;;  %5889 = vrsqrt.f32 %v3397_v56  ;;  %v3394_v16 = vadd.f32 1e-05, %v3362_v30  ;;  %v3363_v15 = vmul.f32 0.015625, %v3287_v46 }
 0x6ec   : > { %3557 = vst.msk [vmem:[#allocation2 + $0x18] sm:$0xff] %vm1765_vm3, %v8159_v42  ;;  %v8166_v1 = vadd.f32 %v8146_v53, %v3486_v22  ;;  %v3487_v31 = vmul.f32 %v8143_v28, %v3451_v44  ;;  %v3456_v47 = vmul.f32 %v5880_v25, %v7969_v36  ;;  %v3302_v34 = vpop.xlane.xlu0 %3301 }
 0x6ed   : > { %v5882_v32 = vpop.eup %5881  ;;  %5891 = vrsqrt.f32 %v3394_v16  ;;  %v3395_v63 = vadd.f32 1e-05, %v3363_v15  ;;  %v3368_v60 = vmul.f32 0.015625, %v3302_v34 }
 0x6ee   : > { %3554 = vst.msk [vmem:[#allocation2] sm:$0xff] %vm1765_vm3, %v8166_v1  ;;  %v8173_v10 = vadd.f32 %v8146_v53, %v3487_v31  ;;  %v3492_v4 = vmul.f32 %v8143_v28, %v3456_v47  ;;  %v3457_v41 = vmul.f32 %v5882_v32, %v7975_v17  ;;  %v3305_v6 = vpop.xlane.xlu1 %3304 }
 0x6ef   : > { %v5884_v13 = vpop.eup %5883  ;;  %5893 = vrsqrt.f32 %v3395_v63  ;;  %v3400_v54 = vadd.f32 1e-05, %v3368_v60  ;;  %v3369_v36 = vmul.f32 0.015625, %v3305_v6 }
 0x6f0   : > { %3555 = vst.msk [vmem:[#allocation2 + $0x8] sm:$0xff] %vm1765_vm3, %v8173_v10  ;;  %v8180_v9 = vadd.f32 %v8146_v53, %v3492_v4  ;;  %v3493_v8 = vmul.f32 %v8143_v28, %v3457_v41  ;;  %v3454_v38 = vmul.f32 %v5884_v13, %v7981_v33  ;;  %v3296_v24 = vpop.xlane.xlu0 %3295 }
 0x6f1   : > { %v5886_v62 = vpop.eup %5885  ;;  %5895 = vrsqrt.f32 %v3400_v54  ;;  %v3401_v45 = vadd.f32 1e-05, %v3369_v36  ;;  %v3366_v17 = vmul.f32 0.015625, %v3296_v24 }
 0x6f2   : > { %3560 = vst.msk [vmem:[#allocation2 + $0x30] sm:$0xff] %vm1765_vm3, %v8180_v9  ;;  %v8187_v61 = vadd.f32 %v8146_v53, %v3493_v8  ;;  %v3490_v14 = vmul.f32 %v8143_v28, %v3454_v38  ;;  %v3455_v0 = vmul.f32 %v5886_v62, %v7987_v23  ;;  %v3299_v19 = vpop.xlane.xlu1 %3298 }
 0x6f3   : > { %v5888_v56 = vpop.eup %5887  ;;  %5897 = vrsqrt.f32 %v3401_v45  ;;  %v3398_v30 = vadd.f32 1e-05, %v3366_v17  ;;  %v3367_v33 = vmul.f32 0.015625, %v3299_v19 }
 0x6f4   : > { %3561 = vst.msk [vmem:[#allocation2 + $0x38] sm:$0xff] %vm1765_vm3, %v8187_v61  ;;  %v8194_v22 = vadd.f32 %v8146_v53, %v3490_v14  ;;  %v3491_v44 = vmul.f32 %v8143_v28, %v3455_v0  ;;  %v3460_v46 = vmul.f32 %v5888_v56, %v7993_v3  ;;  %v3314_v25 = vpop.xlane.xlu0 %3313 }
 0x6f5   : > { %v5890_v16 = vpop.eup %5889  ;;  %5899 = vrsqrt.f32 %v3398_v30  ;;  %v3399_v15 = vadd.f32 1e-05, %v3367_v33  ;;  %v3372_v23 = vmul.f32 0.015625, %v3314_v25 }
 0x6f6   : > { %3558 = vst.msk [vmem:[#allocation2 + $0x20] sm:$0xff] %vm1765_vm3, %v8194_v22  ;;  %v8201_v31 = vadd.f32 %v8146_v53, %v3491_v44  ;;  %v3496_v47 = vmul.f32 %v8143_v28, %v3460_v46  ;;  %v3461_v34 = vmul.f32 %v5890_v16, %v7999_v27  ;;  %v3317_v32 = vpop.xlane.xlu1 %3316 }
 0x6f7   : > { %v5892_v63 = vpop.eup %5891  ;;  %5901 = vrsqrt.f32 %v3399_v15  ;;  %v3404_v60 = vadd.f32 1e-05, %v3372_v23  ;;  %v3373_v3 = vmul.f32 0.015625, %v3317_v32 }
 0x6f8   : > { %3559 = vst.msk [vmem:[#allocation2 + $0x28] sm:$0xff] %vm1765_vm3, %v8201_v31  ;;  %v8208_v4 = vadd.f32 %v8146_v53, %v3496_v47  ;;  %v3497_v41 = vmul.f32 %v8143_v28, %v3461_v34  ;;  %v3458_v6 = vmul.f32 %v5892_v63, %v8005_v26  ;;  %v3308_v13 = vpop.xlane.xlu0 %3307 }
 0x6f9   : > { %v5894_v54 = vpop.eup %5893  ;;  %5903 = vrsqrt.f32 %v3404_v60  ;;  %v3405_v36 = vadd.f32 1e-05, %v3373_v3  ;;  %v3370_v27 = vmul.f32 0.015625, %v3308_v13 }
 0x6fa   : > { %3564 = vst.msk [vmem:[#allocation2 + $0x50] sm:$0xff] %vm1765_vm3, %v8208_v4  ;;  %v8215_v8 = vadd.f32 %v8146_v53, %v3497_v41  ;;  %v3494_v38 = vmul.f32 %v8143_v28, %v3458_v6  ;;  %v3459_v24 = vmul.f32 %v5894_v54, %v8011_v51  ;;  %v3311_v62 = vpop.xlane.xlu1 %3310 }
 0x6fb   : > { %v5896_v45 = vpop.eup %5895  ;;  %5905 = vrsqrt.f32 %v3405_v36  ;;  %v3402_v17 = vadd.f32 1e-05, %v3370_v27  ;;  %v3371_v26 = vmul.f32 0.015625, %v3311_v62 }
 0x6fc   : > { %3565 = vst.msk [vmem:[#allocation2 + $0x58] sm:$0xff] %vm1765_vm3, %v8215_v8  ;;  %v8222_v14 = vadd.f32 %v8146_v53, %v3494_v38  ;;  %v3495_v0 = vmul.f32 %v8143_v28, %v3459_v24  ;;  %v3464_v19 = vmul.f32 %v5896_v45, %v8017_v49  ;;  %v3326_v56 = vpop.xlane.xlu0 %3325 }
 0x6fd   : > { %v5898_v30 = vpop.eup %5897  ;;  %5907 = vrsqrt.f32 %v3402_v17  ;;  %v3403_v33 = vadd.f32 1e-05, %v3371_v26  ;;  %v3376_v51 = vmul.f32 0.015625, %v3326_v56 }
 0x6fe   : > { %3562 = vst.msk [vmem:[#allocation2 + $0x40] sm:$0xff] %vm1765_vm3, %v8222_v14  ;;  %v8229_v44 = vadd.f32 %v8146_v53, %v3495_v0  ;;  %v3500_v46 = vmul.f32 %v8143_v28, %v3464_v19  ;;  %v3465_v25 = vmul.f32 %v5898_v30, %v8023_v52  ;;  %v3329_v16 = vpop.xlane.xlu1 %3328 }
 0x6ff   : > { %v5900_v15 = vpop.eup %5899  ;;  %5909 = vrsqrt.f32 %v3403_v33  ;;  %v3408_v23 = vadd.f32 1e-05, %v3376_v51  ;;  %v3377_v49 = vmul.f32 0.015625, %v3329_v16 }
 0x700   : > { %3563 = vst.msk [vmem:[#allocation2 + $0x48] sm:$0xff] %vm1765_vm3, %v8229_v44  ;;  %v8236_v47 = vadd.f32 %v8146_v53, %v3500_v46  ;;  %v3501_v34 = vmul.f32 %v8143_v28, %v3465_v25  ;;  %v3462_v32 = vmul.f32 %v5900_v15, %v8029_v5  ;;  %v3320_v63 = vpop.xlane.xlu0 %3319 }
 0x701   : > { %v5902_v60 = vpop.eup %5901  ;;  %5911 = vrsqrt.f32 %v3408_v23  ;;  %v3409_v3 = vadd.f32 1e-05, %v3377_v49  ;;  %v3374_v52 = vmul.f32 0.015625, %v3320_v63 }
 0x702   : > { %3568 = vst.msk [vmem:[#allocation2 + $0x70] sm:$0xff] %vm1765_vm3, %v8236_v47  ;;  %v8243_v41 = vadd.f32 %v8146_v53, %v3501_v34  ;;  %v3498_v6 = vmul.f32 %v8143_v28, %v3462_v32  ;;  %v3463_v13 = vmul.f32 %v5902_v60, %v8035_v29  ;;  %v3323_v54 = vpop.xlane.xlu1 %3322 }
 0x703   : > { %v5904_v36 = vpop.eup %5903  ;;  %5913 = vrsqrt.f32 %v3409_v3  ;;  %v3406_v27 = vadd.f32 1e-05, %v3374_v52  ;;  %v3375_v5 = vmul.f32 0.015625, %v3323_v54 }
 0x704   : > { %3569 = vst.msk [vmem:[#allocation2 + $0x78] sm:$0xff] %vm1765_vm3, %v8243_v41  ;;  %v8250_v38 = vadd.f32 %v8146_v53, %v3498_v6  ;;  %v3499_v24 = vmul.f32 %v8143_v28, %v3463_v13  ;;  %v3468_v62 = vmul.f32 %v5904_v36, %v8041_v11  ;;  %v3338_v45 = vpop.xlane.xlu0 %3337 }
 0x705   : > { %v5906_v17 = vpop.eup %5905  ;;  %5915 = vrsqrt.f32 %v3406_v27  ;;  %v3407_v26 = vadd.f32 1e-05, %v3375_v5  ;;  %v3380_v29 = vmul.f32 0.015625, %v3338_v45 }
 0x706   : > { %3566 = vst.msk [vmem:[#allocation2 + $0x60] sm:$0xff] %vm1765_vm3, %v8250_v38  ;;  %v8257_v0 = vadd.f32 %v8146_v53, %v3499_v24  ;;  %v3504_v19 = vmul.f32 %v8143_v28, %v3468_v62  ;;  %v3469_v56 = vmul.f32 %v5906_v17, %v8047_v20  ;;  %v3341_v30 = vpop.xlane.xlu1 %3340 }
 0x707   : > { %v5908_v33 = vpop.eup %5907  ;;  %5917 = vrsqrt.f32 %v3407_v26  ;;  %v3412_v51 = vadd.f32 1e-05, %v3380_v29  ;;  %v3381_v11 = vmul.f32 0.015625, %v3341_v30 }
 0x708   : > { %3567 = vst.msk [vmem:[#allocation2 + $0x68] sm:$0xff] %vm1765_vm3, %v8257_v0  ;;  %v8264_v46 = vadd.f32 %v8146_v53, %v3504_v19  ;;  %v3505_v25 = vmul.f32 %v8143_v28, %v3469_v56  ;;  %v3466_v16 = vmul.f32 %v5908_v33, %v8053_v59  ;;  %v3332_v15 = vpop.xlane.xlu0 %3331 }
 0x709   : > { %v5910_v23 = vpop.eup %5909  ;;  %5919 = vrsqrt.f32 %v3412_v51  ;;  %v3413_v49 = vadd.f32 1e-05, %v3381_v11  ;;  %v3378_v20 = vmul.f32 0.015625, %v3332_v15 }
 0x70a   : > { %3572 = vst.msk [vmem:[#allocation2 + $0x90] sm:$0xff] %vm1765_vm3, %v8264_v46  ;;  %v8271_v34 = vadd.f32 %v8146_v53, %v3505_v25  ;;  %v3502_v32 = vmul.f32 %v8143_v28, %v3466_v16  ;;  %v3467_v63 = vmul.f32 %v5910_v23, %v8059_v21  ;;  %v3335_v60 = vpop.xlane.xlu1 %3334 }
 0x70b   : > { %v5912_v3 = vpop.eup %5911  ;;  %5921 = vrsqrt.f32 %v3413_v49  ;;  %v3410_v52 = vadd.f32 1e-05, %v3378_v20  ;;  %v3379_v59 = vmul.f32 0.015625, %v3335_v60 }
 0x70c   : > { %3573 = vst.msk [vmem:[#allocation2 + $0x98] sm:$0xff] %vm1765_vm3, %v8271_v34  ;;  %v8278_v6 = vadd.f32 %v8146_v53, %v3502_v32  ;;  %v3503_v13 = vmul.f32 %v8143_v28, %v3467_v63  ;;  %v3472_v54 = vmul.f32 %v5912_v3, %v8065_v2 }
 0x70d   : > { %v5914_v36 = vpop.eup %5913  ;;  %5923 = vrsqrt.f32 %v3410_v52  ;;  %v3411_v27 = vadd.f32 1e-05, %v3379_v59  ;;  %v3344_v5 = vpop.xlane.xlu0 %3343 }
 0x70e   : > { %3570 = vst.msk [vmem:[#allocation2 + $0x80] sm:$0xff] %vm1765_vm3, %v8278_v6  ;;  %v8285_v21 = vadd.f32 %v8146_v53, %v3503_v13  ;;  %v3508_v24 = vmul.f32 %v8143_v28, %v3472_v54  ;;  %v3473_v62 = vmul.f32 %v5914_v36, %v8071_v37  ;;  %v3382_v45 = vmul.f32 0.015625, %v3344_v5 }
 0x70f   : > { %v5916_v17 = vpop.eup %5915  ;;  %5925 = vrsqrt.f32 %v3411_v27  ;;  %v3347_v26 = vpop.xlane.xlu1 %3346 }
 0x710   : > { %3571 = vst.msk [vmem:[#allocation2 + $0x88] sm:$0xff] %vm1765_vm3, %v8285_v21  ;;  %v8292_v2 = vadd.f32 %v8146_v53, %v3508_v24  ;;  %v3509_v29 = vmul.f32 %v8143_v28, %v3473_v62  ;;  %v3470_v19 = vmul.f32 %v5916_v17, %v8077_v58  ;;  %v3414_v56 = vadd.f32 1e-05, %v3382_v45 }
 0x711   : > { %v5918_v30 = vpop.eup %5917  ;;  %v3383_v33 = vmul.f32 0.015625, %v3347_v26  ;;  %v3350_v51 = vpop.xlane.xlu0 %3349 }
 0x712   : > { %3576 = vst.msk [vmem:[#allocation2 + $0xb0] sm:$0xff] %vm1765_vm3, %v8292_v2  ;;  %v8299_v37 = vadd.f32 %v8146_v53, %v3509_v29  ;;  %v3506_v11 = vmul.f32 %v8143_v28, %v3470_v19  ;;  %v3471_v25 = vmul.f32 %v5918_v30, %v8083_v12  ;;  %5927 = vrsqrt.f32 %v3414_v56 }
 0x713   : > { %v5920_v16 = vpop.eup %5919  ;;  %v3415_v15 = vadd.f32 1e-05, %v3383_v33  ;;  %v3384_v23 = vmul.f32 0.015625, %v3350_v51  ;;  %v3353_v49 = vpop.xlane.xlu1 %3352 }
 0x714   : > { %3577 = vst.msk [vmem:[#allocation2 + $0xb8] sm:$0xff] %vm1765_vm3, %v8299_v37  ;;  %v8306_v58 = vadd.f32 %v8146_v53, %v3506_v11  ;;  %v3507_v20 = vmul.f32 %v8143_v28, %v3471_v25  ;;  %v3476_v32 = vmul.f32 %v5920_v16, %v8089_v39  ;;  %v3385_v63 = vmul.f32 0.015625, %v3353_v49 }
 0x715   : > { %v5922_v60 = vpop.eup %5921  ;;  %5929 = vrsqrt.f32 %v3415_v15  ;;  %v3416_v3 = vadd.f32 1e-05, %v3384_v23 }
 0x716   : > { %3574 = vst.msk [vmem:[#allocation2 + $0xa0] sm:$0xff] %vm1765_vm3, %v8306_v58  ;;  %v8313_v12 = vadd.f32 %v8146_v53, %v3507_v20  ;;  %v3512_v52 = vmul.f32 %v8143_v28, %v3476_v32  ;;  %v3477_v59 = vmul.f32 %v5922_v60, %v8095_v57  ;;  %v3417_v13 = vadd.f32 1e-05, %v3385_v63 }
 0x717   : > { %v5924_v54 = vpop.eup %5923  ;;  %5931 = vrsqrt.f32 %v3416_v3 }
 0x718   : > { %3575 = vst.msk [vmem:[#allocation2 + $0xa8] sm:$0xff] %vm1765_vm3, %v8313_v12  ;;  %v8320_v39 = vadd.f32 %v8146_v53, %v3512_v52  ;;  %v3513_v36 = vmul.f32 %v8143_v28, %v3477_v59  ;;  %v3474_v27 = vmul.f32 %v5924_v54, %v8101_v18  ;;  %5933 = vrsqrt.f32 %v3417_v13 }
 0x719   : > { %v5926_v5 = vpop.eup %5925 }
 0x71a   : > { %3580 = vst.msk [vmem:[#allocation2 + $0xd0] sm:$0xff] %vm1765_vm3, %v8320_v39  ;;  %v8327_v57 = vadd.f32 %v8146_v53, %v3513_v36  ;;  %v3510_v24 = vmul.f32 %v8143_v28, %v3474_v27  ;;  %v3475_v62 = vmul.f32 %v5926_v5, %v8107_v40 }
 0x71c   : > { %v5928_v45 = vpop.eup %5927  ;;  %3581 = vst.msk [vmem:[#allocation2 + $0xd8] sm:$0xff] %vm1765_vm3, %v8327_v57  ;;  %v8334_v17 = vadd.f32 %v8146_v53, %v3510_v24  ;;  %v3511_v18 = vmul.f32 %v8143_v28, %v3475_v62 }
 0x71d   : > { %v3478_v26 = vmul.f32 %v5928_v45, %v8116_v48 }
 0x71e   : > { %3578 = vst.msk [vmem:[#allocation2 + $0xc0] sm:$0xff] %vm1765_vm3, %v8334_v17  ;;  %v3547_v29 = vadd.f32 %v8146_v53, %v3511_v18 }
 0x71f   : > { %v5930_v19 = vpop.eup %5929  ;;  %v3514_v56 = vmul.f32 %v8143_v28, %v3478_v26 }
 0x720   : > { %3579 = vst.msk [vmem:[#allocation2 + $0xc8] sm:$0xff] %vm1765_vm3, %v3547_v29  ;;  %v3479_v40 = vmul.f32 %v5930_v19, %v8120_v7 }
 0x721   : > { %v5932_v30 = vpop.eup %5931  ;;  %v8345_v33 = vadd.f32 %v8146_v53, %v3514_v56 }
 0x722   : > { %v5934_v51 = vpop.eup %5933  ;;  %v3515_v11 = vmul.f32 %v8143_v28, %v3479_v40  ;;  %v3480_v48 = vmul.f32 %v5932_v30, %v8125_v55 }
 0x723   : > { %3582 = vst.msk [vmem:[#allocation2 + $0xe0] sm:$0xff] %vm1765_vm3, %v8345_v33  ;;  %v3481_v25 = vmul.f32 %v5934_v51, %v8131_v35  ;;  %3589 = sbr.rel (%p5119_p6) target bundleno = 2521 (0x9d9), region = 84 }
 0x724   : > { %v3551_v16 = vadd.f32 %v8146_v53, %v3515_v11  ;;  %v3516_v15 = vmul.f32 %v8143_v28, %v3480_v48 }
 0x725   : > { %v3517_v7 = vmul.f32 %v8143_v28, %v3481_v25 }
 0x726   : > { %3583 = vst.msk [vmem:[#allocation2 + $0xe8] sm:$0xff] %vm1765_vm3, %v3551_v16  ;;  %v3552_v23 = vadd.f32 %v8146_v53, %v3516_v15 }
 0x727   : > { %v3553_v49 = vadd.f32 %v8146_v53, %v3517_v7 }
 0x728   : > { %3584 = vst.msk [vmem:[#allocation2 + $0xf0] sm:$0xff] %vm1765_vm3, %v3552_v23 }
 0x729   : > { %3585 = vst.msk [vmem:[#allocation2 + $0xf8] sm:$0xff] %vm1765_vm3, %v3553_v49 }
 0x72a   : > { %v5937_v55 = vld [vmem:[%s9794_s8] sm:$0xff]   ;;  %v5938_v35 = vld [vmem:[%s9794_s8 + $0x8] sm:$0xff]   ;;  %v3590_v28 = vpack.c.bf16 %v8173_v10, %v8166_v1  ;;  %v3598_v53 = vpack.c.bf16 %v8285_v21, %v8278_v6  ;;  %v5939_v20 = vld [vmem:[%s9794_s8 + $0x10] sm:$0xff]   ;;  %v3591_v10 = vpack.c.bf16 %v8159_v42, %v8152_v43  ;;  %v3599_v6 = vpack.c.bf16 %v8271_v34, %v8264_v46  ;;  %s9932_s24 = sld [smem:[#allocation55_spill]] }
 0x72b   : > { %5471 = vmatprep.subr.bf16.mxu0 %v5937_v55  ;;  %5623 = vmatprep.subr.bf16.mxu1 %v5937_v55  ;;  %v5940_v1 = vld [vmem:[%s9794_s8 + $0x18] sm:$0xff]   ;;  %v3592_v21 = vpack.c.bf16 %v8201_v31, %v8194_v22  ;;  %v3600_v32 = vpack.c.bf16 %v8313_v12, %v8306_v58  ;;  %v3593_v43 = vpack.c.bf16 %v8187_v61, %v8180_v9  ;;  %vm3924_vm8 = vcmask 64512  }
 0x72c   : > { %5472 = vmatpush3.bf16.msra.mxu0 %v5937_v55  ;;  %5627 = vmatpush3.bf16.msra.mxu1 %v5937_v55  ;;  %v3601_v42 = vpack.c.bf16 %v8299_v37, %v8292_v2  ;;  %v3594_v22 = vpack.c.bf16 %v8229_v44, %v8222_v14  ;;  %v3602_v31 = vpack.c.bf16 %v3547_v29, %v8334_v17 }
 0x72d   : > { %5473 = vmatprep.subr.bf16.mxu0 %v5938_v35  ;;  %5624 = vmatprep.subr.bf16.mxu1 %v5938_v35  ;;  %v3595_v46 = vpack.c.bf16 %v8215_v8, %v8208_v4  ;;  %v3603_v9 = vpack.c.bf16 %v8327_v57, %v8320_v39  ;;  %v3596_v61 = vpack.c.bf16 %v8257_v0, %v8250_v38  ;;  %v8418_v8 = vand.u32 127, %v1737_v50  ;;  %v8425_v38 = vld [vmem:[%s9795_s9] ss:$0 sm:$0xff] }
 0x72e   : > { %5479 = vmatprep.mubr.msk.bf16.mxu0 %vm1765_vm3, %v3590_v28  ;;  %5495 = vmatprep.mubr.msk.bf16.mxu1 %vm1765_vm3, %v3598_v53  ;;  %v3604_v14 = vpack.c.bf16 %v3551_v16, %v8345_v33  ;;  %v3597_v44 = vpack.c.bf16 %v8243_v41, %v8236_v47  ;;  %v3605_v4 = vpack.c.bf16 %v3553_v49, %v3552_v23 }
 0x72f   : > { %vm3889_vm4 = vcmp.ge.s32.totalorder %v8418_v8, 3  ;;  %vm3890_vm5 = vcmp.lt.s32.totalorder %v8418_v8, 5  ;;  %vm4341_vm7 = vcmp.ge.s32.totalorder %v8418_v8, 5  ;;  %vm4342_vm9 = vcmp.lt.s32.totalorder %v8418_v8, 7 }
 0x730   : > { %5474 = vmatpush3.bf16.msra.mxu0 %v5938_v35  ;;  %5628 = vmatpush3.bf16.msra.mxu1 %v5938_v35  ;;  %vm8427_vm6 = vmand %vm3889_vm4, %vm3890_vm5  ;;  %vm3856_vm11 = vcmp.lt.s32.totalorder %v8418_v8, 3  ;;  %vm4792_vm12 = vcmp.eq.s32.totalorder %v8418_v8, 7 }
 0x731   : > { %5475 = vmatprep.subr.bf16.mxu0 %v5939_v20  ;;  %5625 = vmatprep.subr.bf16.mxu1 %v5939_v20  ;;  %vm8452_vm10 = vmand %vm4341_vm7, %vm4342_vm9 }
 0x734   : > { %5476 = vmatpush3.bf16.msra.mxu0 %v5939_v20  ;;  %5629 = vmatpush3.bf16.msra.mxu1 %v5939_v20 }
 0x735   : > { %5477 = vmatprep.subr.bf16.mxu0 %v5940_v1  ;;  %5626 = vmatprep.subr.bf16.mxu1 %v5940_v1 }
 0x738   : > { %5478 = vmatpush3.bf16.msra.mxu0 %v5940_v1  ;;  %5630 = vmatpush3.bf16.msra.mxu1 %v5940_v1 }
 0x73b   : > { %5480 = vmatmul.mubr.msk.bf16.vlgmr.msra.gmra.mrb[0].mxu0 %vm1765_vm3, %v3591_v10  ;;  %5496 = vmatmul.mubr.msk.bf16.vlgmr.msra.gmra.mrb[0].mxu1 %vm1765_vm3, %v3599_v6 }
 0x73c   : > { %5483 = vmatprep.mubr.msk.bf16.mxu0 %vm1765_vm3, %v3592_v21  ;;  %5499 = vmatprep.mubr.msk.bf16.mxu1 %vm1765_vm3, %v3600_v32 }
 0x743   : > { %5484 = vmatmul.mubr.msk.bf16.gmra.mrb[4].mxu0 %vm1765_vm3, %v3593_v43  ;;  %5500 = vmatmul.mubr.msk.bf16.gmra.mrb[4].mxu1 %vm1765_vm3, %v3601_v42 }
 0x744   : > { %5487 = vmatprep.mubr.msk.bf16.mxu0 %vm1765_vm3, %v3594_v22  ;;  %5503 = vmatprep.mubr.msk.bf16.mxu1 %vm1765_vm3, %v3602_v31 }
 0x74b   : > { %5488 = vmatmul.mubr.msk.bf16.gmra.mrb[8].mxu0 %vm1765_vm3, %v3595_v46  ;;  %5504 = vmatmul.mubr.msk.bf16.gmra.mrb[8].mxu1 %vm1765_vm3, %v3603_v9 }
 0x74c   : > { %5491 = vmatprep.mubr.msk.bf16.mxu0 %vm1765_vm3, %v3596_v61  ;;  %5507 = vmatprep.mubr.msk.bf16.mxu1 %vm1765_vm3, %v3604_v14 }
 0x753   : > { %5492 = vmatmul.mubr.msk.bf16.gmra.mrb[12].mxu0 %vm1765_vm3, %v3597_v44  ;;  %5508 = vmatmul.mubr.msk.bf16.gmra.mrb[12].mxu1 %vm1765_vm3, %v3605_v4 }
 0x80e   : > { %v5481_v0 = vpop.f32.mrb[0].mxu0  ;;  %v5497_v34 = vpop.f32.mrb[0].mxu1 }
 0x80f   : > { %v8433_v50 = vadd.f32 %v5481_v0, %v8425_v38  ;;  %v8436_v41 = vadd.f32 %v5497_v34, %v8425_v38  ;;  %v3791_v2 = vpop.f32.mrb[1].mxu1  ;;  %v3727_v37 = vpop.f32.mrb[1].mxu0 }
 0x810   : > { %v5498_v58 = vpop.f32.mrb[2].mxu1  ;;  %v5482_v63 = vpop.f32.mrb[2].mxu0  ;;  %v8470_v17 = vadd.f32 %v8425_v38, %v3727_v37  ;;  %v8491_v48 = vadd.f32 %v8425_v38, %v3791_v2 }
 0x811   : > { %v8440_v60 = vadd.f32 %v5482_v63, %v8425_v38  ;;  %v3794_v3 = vpop.f32.mrb[3].mxu1  ;;  %v3730_v12 = vpop.f32.mrb[3].mxu0  ;;  %v3910_v52 = vsel %vm8427_vm6, %v8436_v41, -inf  ;;  %v3894_v59 = vsel %vm8427_vm6, %v8433_v50, -inf  ;;  %v8457_v36 = vadd.f32 %v5498_v58, %v8425_v38 }
 0x812   : > { %v3979_v13 = vsel %vm3924_vm8, %v3910_v52, -inf  ;;  %v3931_v54 = vsel %vm3924_vm8, %v3894_v59, -inf  ;;  %v4346_v27 = vsel %vm8452_vm10, %v8433_v50, -inf  ;;  %v4362_v18 = vsel %vm8452_vm10, %v8436_v41, -inf }
 0x813   : > { %3980 = vmax.xlane.f32.xlu0 %v3979_v13  ;;  %3932 = vmax.xlane.f32.xlu1 %v3931_v54  ;;  %v3895_v5 = vsel %vm8427_vm6, %v8440_v60, -inf  ;;  %v4382_v57 = vsel %vm3924_vm8, %v4346_v27, -inf  ;;  %v3911_v26 = vsel %vm8427_vm6, %v8457_v36, -inf  ;;  %v4430_v51 = vsel %vm3924_vm8, %v4362_v18, -inf }
 0x814   : > { %v3934_v24 = vsel %vm3924_vm8, %v3895_v5, -inf  ;;  %v3982_v11 = vsel %vm3924_vm8, %v3911_v26, -inf  ;;  %v4347_v25 = vsel %vm8452_vm10, %v8440_v60, -inf  ;;  %v3892_v16 = vsel %vm8427_vm6, %v8470_v17, -inf }
 0x815   : > { %v4385_v15 = vsel %vm3924_vm8, %v4347_v25, -inf  ;;  %v3925_v7 = vsel %vm3924_vm8, %v3892_v16, -inf  ;;  %v8502_v55 = vadd.f32 %v8425_v38, %v3794_v3  ;;  %v4363_v35 = vsel %vm8452_vm10, %v8457_v36, -inf }
 0x816   : > { %v5485_v62 = vpop.f32.mrb[4].mxu0  ;;  %v8467_v45 = vpop.f32.mrb[4].mxu1  ;;  %v3908_v28 = vsel %vm8427_vm6, %v8491_v48, -inf  ;;  %v8511_v32 = vadd.f32 %v8425_v38, %v3730_v12  ;;  %v4433_v43 = vsel %vm3924_vm8, %v4363_v35, -inf  ;;  %v4344_v46 = vsel %vm8452_vm10, %v8470_v17, -inf }
 0x817   : > { %4383 = vmax.xlane.f32.xlu0 %v4382_v57  ;;  %3935 = vmax.xlane.f32.xlu1 %v3934_v24  ;;  %v8478_v29 = vpop.f32.mrb[5].mxu0  ;;  %v8480_v19 = vpop.f32.mrb[5].mxu1  ;;  %v3973_v42 = vsel %vm3924_vm8, %v3908_v28, -inf  ;;  %v3909_v31 = vsel %vm8427_vm6, %v8502_v55, -inf  ;;  %v4376_v34 = vsel %vm3924_vm8, %v4344_v46, -inf  ;;  %v4360_v3 = vsel %vm8452_vm10, %v8491_v48, -inf }
 0x818   : > { %v5486_v56 = vpop.f32.mrb[6].mxu0  ;;  %v8482_v40 = vpop.f32.mrb[6].mxu1  ;;  %v3976_v0 = vsel %vm3924_vm8, %v3909_v31, -inf  ;;  %v4345_v63 = vsel %vm8452_vm10, %v8511_v32, -inf  ;;  %v8554_v27 = vadd.f32 %v5485_v62, %v8425_v38  ;;  %v4424_v26 = vsel %vm3924_vm8, %v4360_v3, -inf }
 0x819   : > { %v8484_v30 = vpop.f32.mrb[7].mxu0  ;;  %v8486_v33 = vpop.f32.mrb[7].mxu1  ;;  %v8557_v5 = vadd.f32 %v5486_v56, %v8425_v38  ;;  %v4379_v18 = vsel %vm3924_vm8, %v4345_v63, -inf  ;;  %v3893_v62 = vsel %vm8427_vm6, %v8511_v32, -inf  ;;  %v8569_v56 = vadd.f32 %v8467_v45, %v8425_v38 }
 0x81a   : > { %9891 = vst [vmem:[#allocation14_spill] sm:$0xff] %v8554_v27  ;;  %v4350_v46 = vsel %vm8452_vm10, %v8554_v27, -inf }
 0x81b   : > { %4431 = vmax.xlane.f32.xlu0 %v4430_v51  ;;  %3983 = vmax.xlane.f32.xlu1 %v3982_v11  ;;  %9892 = vst [vmem:[#allocation15_spill] sm:$0xff] %v8557_v5  ;;  %v4361_v51 = vsel %vm8452_vm10, %v8502_v55, -inf  ;;  %9893 = vst [vmem:[#allocation16_spill] sm:$0xff] %v8569_v56  ;;  %v8573_v11 = vadd.f32 %v8482_v40, %v8425_v38  ;;  %v3899_v16 = vsel %vm8427_vm6, %v8557_v5, -inf  ;;  %v4351_v31 = vsel %vm8452_vm10, %v8557_v5, -inf }
 0x81c   : > { %v4427_v40 = vsel %vm3924_vm8, %v4361_v51, -inf  ;;  %v4366_v3 = vsel %vm8452_vm10, %v8569_v56, -inf }
 0x81d   : > { %9894 = vst [vmem:[#allocation17_spill] sm:$0xff] %v8573_v11  ;;  %v4367_v63 = vsel %vm8452_vm10, %v8573_v11, -inf }
 0x81e   : > { %v5489_v23 = vpop.f32.mrb[8].mxu0  ;;  %v5505_v49 = vpop.f32.mrb[8].mxu1 }
 0x81f   : > { %4386 = vmax.xlane.f32.xlu1 %v4385_v15  ;;  %3926 = vmax.xlane.f32.xlu0 %v3925_v7  ;;  %v3759_v53 = vpop.f32.mrb[9].mxu0  ;;  %v3823_v20 = vpop.f32.mrb[9].mxu1  ;;  %v8516_v22 = vadd.f32 %v5489_v23, %v8425_v38  ;;  %v8531_v14 = vadd.f32 %v5505_v49, %v8425_v38  ;;  %v3898_v15 = vsel %vm8427_vm6, %v8554_v27, -inf  ;;  %v3928_v23 = vsel %vm3924_vm8, %v3893_v62, -inf }
 0x820   : > { %v5490_v1 = vpop.f32.mrb[10].mxu0  ;;  %v5506_v10 = vpop.f32.mrb[10].mxu1  ;;  %v8525_v9 = vadd.f32 %v8425_v38, %v3759_v53  ;;  %v8534_v44 = vadd.f32 %v8425_v38, %v3823_v20  ;;  %v3946_v53 = vsel %vm3924_vm8, %v3899_v16, -inf  ;;  %v3943_v20 = vsel %vm3924_vm8, %v3898_v15, -inf }
 0x821   : > { %v3762_v6 = vpop.f32.mrb[11].mxu0  ;;  %v3826_v21 = vpop.f32.mrb[11].mxu1  ;;  %9883 = vst [vmem:[#allocation6_spill] sm:$0xff] %v8516_v22  ;;  %v8528_v61 = vadd.f32 %v5490_v1, %v8425_v38  ;;  %9886 = vst [vmem:[#allocation9_spill] sm:$0xff] %v8531_v14  ;;  %v8537_v4 = vadd.f32 %v5506_v10, %v8425_v38  ;;  %v3915_v10 = vsel %vm8427_vm6, %v8573_v11, -inf }
 0x822   : > { %9884 = vst [vmem:[#allocation7_spill] sm:$0xff] %v8525_v9  ;;  %9887 = vst [vmem:[#allocation10_spill] sm:$0xff] %v8534_v44  ;;  %v8542_v2 = vadd.f32 %v8425_v38, %v3762_v6  ;;  %v8551_v12 = vadd.f32 %v8425_v38, %v3826_v21  ;;  %v3914_v6 = vsel %vm8427_vm6, %v8569_v56, -inf }
 0x823   : > { %4434 = vmax.xlane.f32.xlu1 %v4433_v43  ;;  %3974 = vmax.xlane.f32.xlu0 %v3973_v42  ;;  %9885 = vst [vmem:[#allocation8_spill] sm:$0xff] %v8528_v61  ;;  %9888 = vst [vmem:[#allocation11_spill] sm:$0xff] %v8537_v4  ;;  %v3994_v43 = vsel %vm3924_vm8, %v3915_v10, -inf  ;;  %v3991_v42 = vsel %vm3924_vm8, %v3914_v6, -inf }
 0x824   : > { %9889 = vst [vmem:[#allocation12_spill] sm:$0xff] %v8542_v2  ;;  %9890 = vst [vmem:[#allocation13_spill] sm:$0xff] %v8551_v12 }
 0x826   : > { %v5493_v37 = vpop.f32.mrb[12].mxu0  ;;  %v5509_v58 = vpop.f32.mrb[12].mxu1 }
 0x827   : > { %3977 = vmax.xlane.f32.xlu1 %v3976_v0  ;;  %4377 = vmax.xlane.f32.xlu0 %v4376_v34  ;;  %v3775_v52 = vpop.f32.mrb[13].mxu0  ;;  %v3839_v59 = vpop.f32.mrb[13].mxu1  ;;  %v8576_v25 = vadd.f32 %v5493_v37, %v8425_v38  ;;  %v8593_v49 = vadd.f32 %v5509_v58, %v8425_v38  ;;  %v4397_v0 = vsel %vm3924_vm8, %v4351_v31, -inf  ;;  %v4394_v34 = vsel %vm3924_vm8, %v4350_v46, -inf }
 0x828   : > { %v5494_v13 = vpop.f32.mrb[14].mxu0  ;;  %v5510_v54 = vpop.f32.mrb[14].mxu1  ;;  %v8585_v7 = vadd.f32 %v8425_v38, %v3775_v52  ;;  %v8596_v35 = vadd.f32 %v8425_v38, %v3839_v59  ;;  %v8627_v37 = vadd.f32 %v8425_v38, %v8478_v29  ;;  %v8631_v58 = vadd.f32 %v8425_v38, %v8484_v30 }
 0x829   : > { %v3778_v57 = vpop.f32.mrb[15].mxu0  ;;  %v3842_v24 = vpop.f32.mrb[15].mxu1  ;;  %9895 = vst [vmem:[#allocation18_spill] sm:$0xff] %v8576_v25  ;;  %v8588_v45 = vadd.f32 %v5494_v13, %v8425_v38  ;;  %9897 = vst [vmem:[#allocation20_spill] sm:$0xff] %v8593_v49  ;;  %v8599_v28 = vadd.f32 %v5510_v54, %v8425_v38  ;;  %v4445_v52 = vsel %vm3924_vm8, %v4367_v63, -inf  ;;  %v4442_v59 = vsel %vm3924_vm8, %v4366_v3, -inf }
 0x82a   : > { %v8604_v1 = vadd.f32 %v8425_v38, %v3778_v57  ;;  %v8613_v21 = vadd.f32 %v8425_v38, %v3842_v24  ;;  %9901 = vst [vmem:[#allocation24_spill] sm:$0xff] %v8627_v37  ;;  %9902 = vst [vmem:[#allocation25_spill] sm:$0xff] %v8631_v58  ;;  %v8643_v29 = vadd.f32 %v8425_v38, %v8480_v19  ;;  %v3897_v13 = vsel %vm8427_vm6, %v8631_v58, -inf }
 0x82b   : > { %4380 = vmax.xlane.f32.xlu1 %v4379_v18  ;;  %4425 = vmax.xlane.f32.xlu0 %v4424_v26  ;;  %9896 = vst [vmem:[#allocation19_spill] sm:$0xff] %v8588_v45  ;;  %9898 = vst [vmem:[#allocation21_spill] sm:$0xff] %v8599_v28  ;;  %v8647_v30 = vadd.f32 %v8425_v38, %v8486_v33  ;;  %v3896_v54 = vsel %vm8427_vm6, %v8627_v37, -inf  ;;  %v3940_v57 = vsel %vm3924_vm8, %v3897_v13, -inf  ;;  %v4349_v26 = vsel %vm8452_vm10, %v8631_v58, -inf }
 0x82c   : > { %9899 = vst [vmem:[#allocation22_spill] sm:$0xff] %v8604_v1  ;;  %9900 = vst [vmem:[#allocation23_spill] sm:$0xff] %v8613_v21  ;;  %v3937_v24 = vsel %vm3924_vm8, %v3896_v54, -inf  ;;  %v3912_v19 = vsel %vm8427_vm6, %v8643_v29, -inf  ;;  %v4348_v51 = vsel %vm8452_vm10, %v8627_v37, -inf  ;;  %v4391_v62 = vsel %vm3924_vm8, %v4349_v26, -inf }
 0x82d   : > { %9903 = vst [vmem:[#allocation26_spill] sm:$0xff] %v8643_v29  ;;  %9904 = vst [vmem:[#allocation27_spill] sm:$0xff] %v8647_v30  ;;  %v3913_v38 = vsel %vm8427_vm6, %v8647_v30, -inf  ;;  %v3985_v18 = vsel %vm3924_vm8, %v3912_v19, -inf  ;;  %v4388_v16 = vsel %vm3924_vm8, %v4348_v51, -inf  ;;  %v4365_v15 = vsel %vm8452_vm10, %v8647_v30, -inf }
 0x82e   : > { %v3988_v33 = vsel %vm3924_vm8, %v3913_v38, -inf  ;;  %v3918_v31 = vsel %vm8427_vm6, %v8531_v14, -inf  ;;  %v4354_v63 = vsel %vm8452_vm10, %v8516_v22, -inf  ;;  %v4370_v13 = vsel %vm8452_vm10, %v8531_v14, -inf }
 0x82f   : > { %4428 = vmax.xlane.f32.xlu1 %v4427_v40  ;;  %3929 = vmax.xlane.f32.xlu0 %v3928_v23  ;;  %v4364_v40 = vsel %vm8452_vm10, %v8643_v29, -inf  ;;  %v3903_v23 = vsel %vm8427_vm6, %v8528_v61, -inf  ;;  %v3900_v38 = vsel %vm8427_vm6, %v8525_v9, -inf  ;;  %v3916_v26 = vsel %vm8427_vm6, %v8534_v44, -inf }
 0x830   : > { %v4436_v10 = vsel %vm3924_vm8, %v4364_v40, -inf  ;;  %v3958_v6 = vsel %vm3924_vm8, %v3903_v23, -inf }
 0x833   : > { %3947 = vmax.xlane.f32.xlu1 %v3946_v53  ;;  %3944 = vmax.xlane.f32.xlu0 %v3943_v20  ;;  %v3902_v53 = vsel %vm8427_vm6, %v8516_v22, -inf  ;;  %v4439_v20 = vsel %vm3924_vm8, %v4365_v15, -inf  ;;  %v4352_v15 = vsel %vm8452_vm10, %v8525_v9, -inf }
 0x834   : > { %v4400_v23 = vsel %vm3924_vm8, %v4352_v15, -inf }
 0x837   : > { %3995 = vmax.xlane.f32.xlu1 %v3994_v43  ;;  %3992 = vmax.xlane.f32.xlu0 %v3991_v42  ;;  %v3955_v43 = vsel %vm3924_vm8, %v3902_v53, -inf  ;;  %v3919_v42 = vsel %vm8427_vm6, %v8537_v4, -inf  ;;  %v4369_v53 = vsel %vm8452_vm10, %v8551_v12, -inf }
 0x838   : > { %v4006_v46 = vsel %vm3924_vm8, %v3919_v42, -inf }
 0x83b   : > { %4398 = vmax.xlane.f32.xlu1 %v4397_v0  ;;  %4395 = vmax.xlane.f32.xlu0 %v4394_v34  ;;  %v4003_v0 = vsel %vm3924_vm8, %v3918_v31, -inf  ;;  %v4355_v34 = vsel %vm8452_vm10, %v8528_v61, -inf }
 0x83c   : > { %v4409_v3 = vsel %vm3924_vm8, %v4355_v34, -inf  ;;  %v3922_v34 = vsel %vm8427_vm6, %v8593_v49, -inf }
 0x83f   : > { %4446 = vmax.xlane.f32.xlu1 %v4445_v52  ;;  %4443 = vmax.xlane.f32.xlu0 %v4442_v59  ;;  %v4406_v52 = vsel %vm3924_vm8, %v4354_v63, -inf  ;;  %v4371_v59 = vsel %vm8452_vm10, %v8537_v4, -inf }
 0x840   : > { %v4457_v54 = vsel %vm3924_vm8, %v4371_v59, -inf  ;;  %v4358_v59 = vsel %vm8452_vm10, %v8576_v25, -inf }
 0x843   : > { %3941 = vmax.xlane.f32.xlu1 %v3940_v57  ;;  %3938 = vmax.xlane.f32.xlu0 %v3937_v24  ;;  %v4454_v57 = vsel %vm3924_vm8, %v4370_v13, -inf  ;;  %v3901_v24 = vsel %vm8427_vm6, %v8542_v2, -inf }
 0x844   : > { %v3952_v19 = vsel %vm3924_vm8, %v3901_v24, -inf  ;;  %v4374_v24 = vsel %vm8452_vm10, %v8593_v49, -inf }
 0x847   : > { %3989 = vmax.xlane.f32.xlu1 %v3988_v33  ;;  %3986 = vmax.xlane.f32.xlu0 %v3985_v18  ;;  %v3949_v33 = vsel %vm3924_vm8, %v3900_v38, -inf  ;;  %v3917_v18 = vsel %vm8427_vm6, %v8551_v12, -inf }
 0x848   : > { %v4000_v51 = vsel %vm3924_vm8, %v3917_v18, -inf  ;;  %v3904_v18 = vsel %vm8427_vm6, %v8585_v7, -inf }
 0x84b   : > { %4392 = vmax.xlane.f32.xlu1 %v4391_v62  ;;  %4389 = vmax.xlane.f32.xlu0 %v4388_v16  ;;  %v3997_v62 = vsel %vm3924_vm8, %v3916_v26, -inf  ;;  %v4353_v16 = vsel %vm8452_vm10, %v8542_v2, -inf }
 0x84c   : > { %v4403_v40 = vsel %vm3924_vm8, %v4353_v16, -inf  ;;  %v3920_v16 = vsel %vm8427_vm6, %v8596_v35, -inf }
 0x84f   : > { %4440 = vmax.xlane.f32.xlu1 %v4439_v20  ;;  %4437 = vmax.xlane.f32.xlu0 %v4436_v10  ;;  %v4368_v20 = vsel %vm8452_vm10, %v8534_v44, -inf  ;;  %v3907_v10 = vsel %vm8427_vm6, %v8588_v45, -inf }
 0x850   : > { %v4448_v42 = vsel %vm3924_vm8, %v4368_v20, -inf  ;;  %v3970_v31 = vsel %vm3924_vm8, %v3907_v10, -inf }
 0x853   : > { %3959 = vmax.xlane.f32.xlu1 %v3958_v6  ;;  %3956 = vmax.xlane.f32.xlu0 %v3955_v43  ;;  %v3906_v6 = vsel %vm8427_vm6, %v8576_v25, -inf  ;;  %v4451_v43 = vsel %vm3924_vm8, %v4369_v53, -inf  ;;  %v4356_v53 = vsel %vm8452_vm10, %v8585_v7, -inf }
 0x854   : > { %v4412_v10 = vsel %vm3924_vm8, %v4356_v53, -inf }
 0x857   : > { %4007 = vmax.xlane.f32.xlu1 %v4006_v46  ;;  %4004 = vmax.xlane.f32.xlu0 %v4003_v0  ;;  %v3967_v46 = vsel %vm3924_vm8, %v3906_v6, -inf  ;;  %v3923_v0 = vsel %vm8427_vm6, %v8599_v28, -inf  ;;  %v4373_v6 = vsel %vm8452_vm10, %v8613_v21, -inf }
 0x858   : > { %v4018_v63 = vsel %vm3924_vm8, %v3923_v0, -inf }
 0x85b   : > { %4410 = vmax.xlane.f32.xlu1 %v4409_v3  ;;  %4407 = vmax.xlane.f32.xlu0 %v4406_v52  ;;  %v4015_v3 = vsel %vm3924_vm8, %v3922_v34, -inf  ;;  %v4359_v52 = vsel %vm8452_vm10, %v8588_v45, -inf }
 0x85c   : > { %v4421_v13 = vsel %vm3924_vm8, %v4359_v52, -inf }
 0x85f   : > { %4458 = vmax.xlane.f32.xlu1 %v4457_v54  ;;  %4455 = vmax.xlane.f32.xlu0 %v4454_v57  ;;  %v4418_v54 = vsel %vm3924_vm8, %v4358_v59, -inf  ;;  %v4375_v57 = vsel %vm8452_vm10, %v8599_v28, -inf }
 0x860   : > { %v4469_v38 = vsel %vm3924_vm8, %v4375_v57, -inf }
 0x863   : > { %3953 = vmax.xlane.f32.xlu1 %v3952_v19  ;;  %3950 = vmax.xlane.f32.xlu0 %v3949_v33  ;;  %v4466_v19 = vsel %vm3924_vm8, %v4374_v24, -inf  ;;  %v3905_v33 = vsel %vm8427_vm6, %v8604_v1, -inf }
 0x864   : > { %v3964_v26 = vsel %vm3924_vm8, %v3905_v33, -inf }
 0x867   : > { %4001 = vmax.xlane.f32.xlu1 %v4000_v51  ;;  %3998 = vmax.xlane.f32.xlu0 %v3997_v62  ;;  %v3961_v51 = vsel %vm3924_vm8, %v3904_v18, -inf  ;;  %v3921_v62 = vsel %vm8427_vm6, %v8613_v21, -inf }
 0x868   : > { %v4012_v15 = vsel %vm3924_vm8, %v3921_v62, -inf }
 0x86b   : > { %4404 = vmax.xlane.f32.xlu1 %v4403_v40  ;;  %4401 = vmax.xlane.f32.xlu0 %v4400_v23  ;;  %v4009_v40 = vsel %vm3924_vm8, %v3920_v16, -inf  ;;  %v4357_v23 = vsel %vm8452_vm10, %v8604_v1, -inf }
 0x86c   : > { %v4415_v20 = vsel %vm3924_vm8, %v4357_v23, -inf }
 0x86f   : > { %4452 = vmax.xlane.f32.xlu1 %v4451_v43  ;;  %4449 = vmax.xlane.f32.xlu0 %v4448_v42  ;;  %v4372_v43 = vsel %vm8452_vm10, %v8596_v35, -inf  ;;  %v4463_v42 = vsel %vm3924_vm8, %v4373_v6, -inf }
 0x873   : > { %3971 = vmax.xlane.f32.xlu1 %v3970_v31  ;;  %3968 = vmax.xlane.f32.xlu0 %v3967_v46  ;;  %v4460_v31 = vsel %vm3924_vm8, %v4372_v43, -inf }
 0x877   : > { %4019 = vmax.xlane.f32.xlu1 %v4018_v63  ;;  %4016 = vmax.xlane.f32.xlu0 %v4015_v3 }
 0x87b   : > { %4422 = vmax.xlane.f32.xlu1 %v4421_v13  ;;  %4419 = vmax.xlane.f32.xlu0 %v4418_v54 }
 0x87f   : > { %4470 = vmax.xlane.f32.xlu1 %v4469_v38  ;;  %4467 = vmax.xlane.f32.xlu0 %v4466_v19 }
 0x883   : > { %3965 = vmax.xlane.f32.xlu1 %v3964_v26  ;;  %3962 = vmax.xlane.f32.xlu0 %v3961_v51 }
 0x887   : > { %4013 = vmax.xlane.f32.xlu1 %v4012_v15  ;;  %4010 = vmax.xlane.f32.xlu0 %v4009_v40 }
 0x88b   : > { %4416 = vmax.xlane.f32.xlu1 %v4415_v20  ;;  %4413 = vmax.xlane.f32.xlu0 %v4412_v10 }
 0x88f   : > { %4464 = vmax.xlane.f32.xlu1 %v4463_v42  ;;  %4461 = vmax.xlane.f32.xlu0 %v4460_v31 }
 0x8a0   : > { %v3981_v46 = vpop.xlane.xlu0 %3980  ;;  %v3933_v0 = vpop.xlane.xlu1 %3932 }
 0x8a1   : > { %v4039_v34 = vsub.f32 %v8436_v41, %v3981_v46  ;;  %v4023_v63 = vsub.f32 %v8433_v50, %v3933_v0 }
 0x8a3   : > { %v4089_v3 = vmul.f32 1.442695, %v4039_v34  ;;  %v4057_v52 = vmul.f32 1.442695, %v4023_v63 }
 0x8a4   : > { %v4384_v59 = vpop.xlane.xlu0 %4383  ;;  %v3936_v13 = vpop.xlane.xlu1 %3935 }
 0x8a5   : > { %5941 = vpow2.f32 %v4089_v3  ;;  %v4474_v54 = vsub.f32 %v8433_v50, %v4384_v59  ;;  %v4024_v57 = vsub.f32 %v8440_v60, %v3936_v13 }
 0x8a6   : > { %5943 = vpow2.f32 %v4057_v52 }
 0x8a7   : > { %v4508_v24 = vmul.f32 1.442695, %v4474_v54  ;;  %v4059_v38 = vmul.f32 1.442695, %v4024_v57 }
 0x8a8   : > { %v4432_v19 = vpop.xlane.xlu0 %4431  ;;  %v3984_v33 = vpop.xlane.xlu1 %3983 }
 0x8a9   : > { %5945 = vpow2.f32 %v4508_v24  ;;  %v4490_v18 = vsub.f32 %v8436_v41, %v4432_v19  ;;  %v4040_v26 = vsub.f32 %v8457_v36, %v3984_v33 }
 0x8aa   : > { %5947 = vpow2.f32 %v4059_v38 }
 0x8ab   : > { %v4540_v51 = vmul.f32 1.442695, %v4490_v18  ;;  %v4091_v62 = vmul.f32 1.442695, %v4040_v26 }
 0x8ac   : > { %v4387_v16 = vpop.xlane.xlu1 %4386  ;;  %v3927_v15 = vpop.xlane.xlu0 %3926 }
 0x8ad   : > { %5949 = vpow2.f32 %v4540_v51  ;;  %v4475_v40 = vsub.f32 %v8440_v60, %v4387_v16  ;;  %v4021_v23 = vsub.f32 %v8470_v17, %v3927_v15 }
 0x8ae   : > { %5951 = vpow2.f32 %v4091_v62 }
 0x8af   : > { %v5942_v53 = vpop.eup %5941  ;;  %v4510_v20 = vmul.f32 1.442695, %v4475_v40  ;;  %v4053_v10 = vmul.f32 1.442695, %v4021_v23 }
 0x8b0   : > { %v5944_v6 = vpop.eup %5943  ;;  %v4435_v43 = vpop.xlane.xlu1 %4434  ;;  %v8827_v59 = vsel %vm8427_vm6, %v5942_v53, 0.0 }
 0x8b1   : > { %v3975_v42 = vpop.xlane.xlu0 %3974  ;;  %5953 = vpow2.f32 %v4510_v20  ;;  %v4491_v31 = vsub.f32 %v8457_v36, %v4435_v43  ;;  %v8821_v0 = vsel %vm8427_vm6, %v5944_v6, 0.0  ;;  %v4203_v33 = vsel %vm3924_vm8, %v8827_v59, 0.0 }
 0x8b2   : > { %v4037_v46 = vsub.f32 %v8491_v48, %v3975_v42  ;;  %5955 = vpow2.f32 %v4053_v10  ;;  %v4155_v34 = vsel %vm3924_vm8, %v8821_v0, 0.0 }
 0x8b3   : > { %v5946_v63 = vpop.eup %5945  ;;  %v4542_v3 = vmul.f32 1.442695, %v4491_v31  ;;  %4156 = vadd.xlane.f32.xlu0 %v4155_v34 }
 0x8b4   : > { %v4085_v52 = vmul.f32 1.442695, %v4037_v46  ;;  %v5948_v13 = vpop.eup %5947  ;;  %v3978_v54 = vpop.xlane.xlu1 %3977  ;;  %v8840_v51 = vsel %vm8452_vm10, %v5946_v63, 0.0 }
 0x8b5   : > { %v4378_v57 = vpop.xlane.xlu0 %4377  ;;  %5957 = vpow2.f32 %v4542_v3  ;;  %v8832_v38 = vsel %vm8427_vm6, %v5948_v13, 0.0  ;;  %v4038_v16 = vsub.f32 %v8502_v55, %v3978_v54  ;;  %v4606_v10 = vsel %vm3924_vm8, %v8840_v51, 0.0 }
 0x8b6   : > { %v4472_v24 = vsub.f32 %v8470_v17, %v4378_v57  ;;  %5959 = vpow2.f32 %v4085_v52  ;;  %v4158_v19 = vsel %vm3924_vm8, %v8832_v38, 0.0 }
 0x8b7   : > { %v5950_v18 = vpop.eup %5949  ;;  %4159 = vadd.xlane.f32.xlu1 %v4158_v19  ;;  %4204 = vadd.xlane.f32.xlu0 %v4203_v33  ;;  %v4087_v46 = vmul.f32 1.442695, %v4038_v16 }
 0x8b8   : > { %v4504_v26 = vmul.f32 1.442695, %v4472_v24  ;;  %v5952_v62 = vpop.eup %5951  ;;  %v4381_v15 = vpop.xlane.xlu1 %4380  ;;  %v8854_v42 = vsel %vm8452_vm10, %v5950_v18, 0.0 }
 0x8b9   : > { %v4426_v40 = vpop.xlane.xlu0 %4425  ;;  %v8846_v53 = vsel %vm8427_vm6, %v5952_v62, 0.0  ;;  %v4473_v52 = vsub.f32 %v8511_v32, %v4381_v15  ;;  %v4654_v57 = vsel %vm3924_vm8, %v8854_v42, 0.0 }
 0x8ba   : > { %v4488_v23 = vsub.f32 %v8491_v48, %v4426_v40  ;;  %5961 = vpow2.f32 %v4504_v26  ;;  %v4206_v20 = vsel %vm3924_vm8, %v8846_v53, 0.0 }
 0x8bb   : > { %v5954_v6 = vpop.eup %5953  ;;  %4207 = vadd.xlane.f32.xlu1 %v4206_v20  ;;  %4607 = vadd.xlane.f32.xlu0 %v4606_v10  ;;  %v4506_v15 = vmul.f32 1.442695, %v4473_v52 }
 0x8bc   : > { %v4536_v43 = vmul.f32 1.442695, %v4488_v23  ;;  %v5956_v31 = vpop.eup %5955  ;;  %v4429_v34 = vpop.xlane.xlu1 %4428  ;;  %v8858_v3 = vsel %vm8452_vm10, %v5954_v6, 0.0 }
 0x8bd   : > { %v3930_v63 = vpop.xlane.xlu0 %3929  ;;  %v4609_v54 = vsel %vm3924_vm8, %v8858_v3, 0.0  ;;  %v8868_v33 = vsel %vm8427_vm6, %v5956_v31, 0.0  ;;  %v4489_v40 = vsub.f32 %v8502_v55, %v4429_v34 }
 0x8be   : > { %v4022_v13 = vsub.f32 %v8511_v32, %v3930_v63  ;;  %5963 = vpow2.f32 %v4536_v43  ;;  %v4149_v10 = vsel %vm3924_vm8, %v8868_v33, 0.0 }
 0x8bf   : > { %v5958_v24 = vpop.eup %5957  ;;  %4610 = vadd.xlane.f32.xlu1 %v4609_v54  ;;  %4655 = vadd.xlane.f32.xlu0 %v4654_v57  ;;  %5965 = vpow2.f32 %v4087_v46  ;;  %v4538_v34 = vmul.f32 1.442695, %v4489_v40 }
 0x8c0   : > { %v4055_v19 = vmul.f32 1.442695, %v4022_v13  ;;  %v5960_v18 = vpop.eup %5959  ;;  %v3948_v26 = vpop.xlane.xlu1 %3947  ;;  %v8872_v16 = vsel %vm8452_vm10, %v5958_v24, 0.0 }
 0x8c1   : > { %v3945_v62 = vpop.xlane.xlu0 %3944  ;;  %v4657_v20 = vsel %vm3924_vm8, %v8872_v16, 0.0  ;;  %v8882_v43 = vsel %vm8427_vm6, %v5960_v18, 0.0  ;;  %v4028_v52 = vsub.f32 %v8557_v5, %v3948_v26 }
 0x8c2   : > { %v4027_v23 = vsub.f32 %v8554_v27, %v3945_v62  ;;  %5967 = vpow2.f32 %v4055_v19  ;;  %v4197_v54 = vsel %vm3924_vm8, %v8882_v43, 0.0 }
 0x8c3   : > { %4658 = vadd.xlane.f32.xlu1 %v4657_v20  ;;  %4150 = vadd.xlane.f32.xlu0 %v4149_v10  ;;  %5969 = vpow2.f32 %v4506_v15  ;;  %v4067_v15 = vmul.f32 1.442695, %v4028_v52 }
 0x8c4   : > { %v4065_v6 = vmul.f32 1.442695, %v4027_v23  ;;  %v5962_v31 = vpop.eup %5961  ;;  %v3996_v46 = vpop.xlane.xlu1 %3995 }
 0x8c5   : > { %v3993_v63 = vpop.xlane.xlu0 %3992  ;;  %v8890_v24 = vsel %vm8452_vm10, %v5962_v31, 0.0  ;;  %v4044_v40 = vsub.f32 %v8573_v11, %v3996_v46 }
 0x8c6   : > { %v4043_v13 = vsub.f32 %v8569_v56, %v3993_v63  ;;  %5971 = vpow2.f32 %v4065_v6  ;;  %v4600_v20 = vsel %vm3924_vm8, %v8890_v24, 0.0 }
 0x8c7   : > { %4198 = vadd.xlane.f32.xlu0 %v4197_v54  ;;  %5973 = vpow2.f32 %v4538_v34  ;;  %v4099_v46 = vmul.f32 1.442695, %v4044_v40 }
 0x8c8   : > { %v4097_v57 = vmul.f32 1.442695, %v4043_v13  ;;  %v5964_v19 = vpop.eup %5963  ;;  %v4399_v18 = vpop.xlane.xlu1 %4398 }
 0x8c9   : > { %v4396_v62 = vpop.xlane.xlu0 %4395  ;;  %v5966_v23 = vpop.eup %5965  ;;  %v8898_v6 = vsel %vm8452_vm10, %v5964_v19, 0.0  ;;  %v4479_v63 = vsub.f32 %v8557_v5, %v4399_v18 }
 0x8ca   : > { %v4478_v26 = vsub.f32 %v8554_v27, %v4396_v62  ;;  %5975 = vpow2.f32 %v4097_v57  ;;  %v4648_v57 = vsel %vm3924_vm8, %v8898_v6, 0.0  ;;  %v8912_v18 = vsel %vm8427_vm6, %v5966_v23, 0.0 }
 0x8cb   : > { %4601 = vadd.xlane.f32.xlu0 %v4600_v20  ;;  %5977 = vpow2.f32 %v4067_v15  ;;  %v4518_v40 = vmul.f32 1.442695, %v4479_v63 }
 0x8cc   : > { %v4516_v10 = vmul.f32 1.442695, %v4478_v26  ;;  %v5968_v31 = vpop.eup %5967  ;;  %v4447_v34 = vpop.xlane.xlu1 %4446 }
 0x8cd   : > { %v4444_v52 = vpop.xlane.xlu0 %4443  ;;  %v8904_v54 = vsel %vm8427_vm6, %v5968_v31, 0.0  ;;  %v5970_v62 = vpop.eup %5969 }
 0x8ce   : > { %v4494_v13 = vsub.f32 %v8569_v56, %v4444_v52  ;;  %5979 = vpow2.f32 %v4516_v10  ;;  %v4152_v19 = vsel %vm3924_vm8, %v8904_v54, 0.0  ;;  %v4495_v10 = vsub.f32 %v8573_v11, %v4447_v34 }
 0x8cf   : > { %4649 = vadd.xlane.f32.xlu0 %v4648_v57  ;;  %4153 = vadd.xlane.f32.xlu1 %v4152_v19  ;;  %5981 = vpow2.f32 %v4099_v46  ;;  %v8926_v34 = vsel %vm8452_vm10, %v5970_v62, 0.0 }
 0x8d0   : > { %v4548_v26 = vmul.f32 1.442695, %v4494_v13  ;;  %v5972_v15 = vpop.eup %5971  ;;  %v3942_v20 = vpop.xlane.xlu1 %3941  ;;  %v4200_v13 = vsel %vm3924_vm8, %v8912_v18, 0.0 }
 0x8d1   : > { %v3939_v31 = vpop.xlane.xlu0 %3938  ;;  %v8918_v5 = vsel %vm8427_vm6, %v5972_v15, 0.0  ;;  %v5974_v57 = vpop.eup %5973 }
 0x8d2   : > { %v4025_v52 = vsub.f32 %v8627_v37, %v3939_v31  ;;  %5983 = vpow2.f32 %v4548_v26  ;;  %v4167_v23 = vsel %vm3924_vm8, %v8918_v5, 0.0  ;;  %v4550_v31 = vmul.f32 1.442695, %v4495_v10 }
 0x8d3   : > { %4201 = vadd.xlane.f32.xlu1 %v4200_v13  ;;  %4168 = vadd.xlane.f32.xlu0 %v4167_v23  ;;  %5985 = vpow2.f32 %v4518_v40  ;;  %v4026_v26 = vsub.f32 %v8631_v58, %v3942_v20  ;;  %v8940_v20 = vsel %vm8452_vm10, %v5974_v57, 0.0 }
 0x8d4   : > { %v4061_v63 = vmul.f32 1.442695, %v4025_v52  ;;  %v5976_v46 = vpop.eup %5975  ;;  %v3990_v19 = vpop.xlane.xlu1 %3989  ;;  %v4603_v52 = vsel %vm3924_vm8, %v8926_v34, 0.0 }
 0x8d5   : > { %v3987_v15 = vpop.xlane.xlu0 %3986  ;;  %v8932_v56 = vsel %vm8427_vm6, %v5976_v46, 0.0  ;;  %v5978_v13 = vpop.eup %5977  ;;  %v4042_v23 = vsub.f32 %v8647_v30, %v3990_v19 }
 0x8d6   : > { %v4041_v11 = vsub.f32 %v8643_v29, %v3987_v15  ;;  %9905 = vst [vmem:[#allocation28_spill] sm:$0xff] %v8932_v56  ;;  %5987 = vpow2.f32 %v4061_v63  ;;  %v4215_v62 = vsel %vm3924_vm8, %v8932_v56, 0.0  ;;  %v4063_v63 = vmul.f32 1.442695, %v4026_v26 }
 0x8d7   : > { %4604 = vadd.xlane.f32.xlu1 %v4603_v52  ;;  %4216 = vadd.xlane.f32.xlu0 %v4215_v62  ;;  %5989 = vpow2.f32 %v4550_v31  ;;  %v8954_v19 = vsel %vm8427_vm6, %v5978_v13, 0.0  ;;  %v4095_v26 = vmul.f32 1.442695, %v4042_v23 }
 0x8d8   : > { %v4093_v40 = vmul.f32 1.442695, %v4041_v11  ;;  %v5980_v10 = vpop.eup %5979  ;;  %v4393_v46 = vpop.xlane.xlu1 %4392  ;;  %v4651_v11 = vsel %vm3924_vm8, %v8940_v20, 0.0 }
 0x8d9   : > { %v4390_v15 = vpop.xlane.xlu0 %4389  ;;  %v8946_v56 = vsel %vm8452_vm10, %v5980_v10, 0.0  ;;  %v5982_v52 = vpop.eup %5981 }
 0x8da   : > { %v4476_v27 = vsub.f32 %v8627_v37, %v4390_v15  ;;  %9906 = vst [vmem:[#allocation29_spill] sm:$0xff] %v8946_v56  ;;  %5991 = vpow2.f32 %v4093_v40  ;;  %v4618_v57 = vsel %vm3924_vm8, %v8946_v56, 0.0  ;;  %v4477_v40 = vsub.f32 %v8631_v58, %v4393_v46 }
 0x8db   : > { %4652 = vadd.xlane.f32.xlu1 %v4651_v11  ;;  %4619 = vadd.xlane.f32.xlu0 %v4618_v57  ;;  %5993 = vpow2.f32 %v4063_v63  ;;  %v4170_v11 = vsel %vm3924_vm8, %v8954_v19, 0.0  ;;  %v8968_v46 = vsel %vm8427_vm6, %v5982_v52, 0.0 }
 0x8dc   : > { %v4512_v62 = vmul.f32 1.442695, %v4476_v27  ;;  %v5984_v31 = vpop.eup %5983  ;;  %v4441_v15 = vpop.xlane.xlu1 %4440  ;;  %9907 = vst [vmem:[#allocation30_spill] sm:$0xff] %v8968_v46 }
 0x8dd   : > { %v4438_v10 = vpop.xlane.xlu0 %4437  ;;  %v8960_v56 = vsel %vm8452_vm10, %v5984_v31, 0.0  ;;  %v5986_v27 = vpop.eup %5985 }
 0x8de   : > { %v4492_v37 = vsub.f32 %v8643_v29, %v4438_v10  ;;  %5995 = vpow2.f32 %v4512_v62  ;;  %v4666_v13 = vsel %vm3924_vm8, %v8960_v56, 0.0  ;;  %v4514_v10 = vmul.f32 1.442695, %v4477_v40 }
 0x8df   : > { %4171 = vadd.xlane.f32.xlu1 %v4170_v11  ;;  %4667 = vadd.xlane.f32.xlu0 %v4666_v13  ;;  %5997 = vpow2.f32 %v4095_v26  ;;  %v4493_v62 = vsub.f32 %v8647_v30, %v4441_v15  ;;  %v8982_v15 = vsel %vm8452_vm10, %v5986_v27, 0.0 }
 0x8e0   : > { %v4544_v23 = vmul.f32 1.442695, %v4492_v37  ;;  %v5988_v63 = vpop.eup %5987  ;;  %v3960_v57 = vpop.xlane.xlu1 %3959  ;;  %v4218_v37 = vsel %vm3924_vm8, %v8968_v46, 0.0 }
 0x8e1   : > { %v3957_v31 = vpop.xlane.xlu0 %3956  ;;  %v8974_v29 = vsel %vm8427_vm6, %v5988_v63, 0.0  ;;  %v5990_v11 = vpop.eup %5989  ;;  %v4032_v13 = vsub.f32 %v8528_v61, %v3960_v57 }
 0x8e2   : > { %v4031_v58 = vsub.f32 %v8516_v22, %v3957_v31  ;;  %9908 = vst [vmem:[#allocation31_spill] sm:$0xff] %v8974_v29  ;;  %5999 = vpow2.f32 %v4544_v23  ;;  %v4161_v52 = vsel %vm3924_vm8, %v8974_v29, 0.0  ;;  %v4546_v23 = vmul.f32 1.442695, %v4493_v62 }
 0x8e3   : > { %4219 = vadd.xlane.f32.xlu1 %v4218_v37  ;;  %4162 = vadd.xlane.f32.xlu0 %v4161_v52  ;;  %6001 = vpow2.f32 %v4514_v10  ;;  %v8996_v57 = vsel %vm8452_vm10, %v5990_v11, 0.0  ;;  %v4075_v62 = vmul.f32 1.442695, %v4032_v13 }
 0x8e4   : > { %v4073_v26 = vmul.f32 1.442695, %v4031_v58  ;;  %v5992_v40 = vpop.eup %5991  ;;  %v4008_v63 = vpop.xlane.xlu1 %4007  ;;  %v4621_v58 = vsel %vm3924_vm8, %v8982_v15, 0.0  ;;  %9910 = vst [vmem:[#allocation33_spill] sm:$0xff] %v8996_v57 }
 0x8e5   : > { %v4005_v31 = vpop.xlane.xlu0 %4004  ;;  %v8988_v29 = vsel %vm8427_vm6, %v5992_v40, 0.0  ;;  %v5994_v37 = vpop.eup %5993 }
 0x8e6   : > { %v4047_v30 = vsub.f32 %v8531_v14, %v4005_v31  ;;  %9909 = vst [vmem:[#allocation32_spill] sm:$0xff] %v8988_v29  ;;  %6003 = vpow2.f32 %v4073_v26  ;;  %v4209_v27 = vsel %vm3924_vm8, %v8988_v29, 0.0  ;;  %v4048_v26 = vsub.f32 %v8537_v4, %v4008_v63 }
 0x8e7   : > { %4622 = vadd.xlane.f32.xlu1 %v4621_v58  ;;  %4210 = vadd.xlane.f32.xlu0 %v4209_v27  ;;  %6005 = vpow2.f32 %v4546_v23  ;;  %v4669_v58 = vsel %vm3924_vm8, %v8996_v57, 0.0  ;;  %v9010_v63 = vsel %vm8427_vm6, %v5994_v37, 0.0 }
 0x8e8   : > { %v4105_v52 = vmul.f32 1.442695, %v4047_v30  ;;  %v5996_v10 = vpop.eup %5995  ;;  %v4411_v31 = vpop.xlane.xlu1 %4410 }
 0x8e9   : > { %v4408_v40 = vpop.xlane.xlu0 %4407  ;;  %v9002_v29 = vsel %vm8452_vm10, %v5996_v10, 0.0  ;;  %v5998_v30 = vpop.eup %5997 }
 0x8ea   : > { %v4482_v46 = vsub.f32 %v8516_v22, %v4408_v40  ;;  %6007 = vpow2.f32 %v4105_v52  ;;  %v4612_v11 = vsel %vm3924_vm8, %v9002_v29, 0.0  ;;  %v4107_v40 = vmul.f32 1.442695, %v4048_v26 }
 0x8eb   : > { %4670 = vadd.xlane.f32.xlu1 %v4669_v58  ;;  %4613 = vadd.xlane.f32.xlu0 %v4612_v11  ;;  %6009 = vpow2.f32 %v4075_v62  ;;  %v4483_v52 = vsub.f32 %v8528_v61, %v4411_v31  ;;  %v9024_v31 = vsel %vm8427_vm6, %v5998_v30, 0.0 }
 0x8ec   : > { %v4524_v13 = vmul.f32 1.442695, %v4482_v46  ;;  %v6000_v23 = vpop.eup %5999  ;;  %v4459_v27 = vpop.xlane.xlu1 %4458  ;;  %v4164_v46 = vsel %vm3924_vm8, %v9010_v63, 0.0  ;;  %9911 = vst [vmem:[#allocation34_spill] sm:$0xff] %v9024_v31 }
 0x8ed   : > { %v4456_v10 = vpop.xlane.xlu0 %4455  ;;  %v9016_v57 = vsel %vm8452_vm10, %v6000_v23, 0.0  ;;  %v6002_v58 = vpop.eup %6001  ;;  %v4499_v11 = vsub.f32 %v8537_v4, %v4459_v27 }
 0x8ee   : > { %v4498_v22 = vsub.f32 %v8531_v14, %v4456_v10  ;;  %6011 = vpow2.f32 %v4524_v13  ;;  %v4660_v37 = vsel %vm3924_vm8, %v9016_v57, 0.0  ;;  %v4526_v13 = vmul.f32 1.442695, %v4483_v52 }
 0x8ef   : > { %4165 = vadd.xlane.f32.xlu1 %v4164_v46  ;;  %4661 = vadd.xlane.f32.xlu0 %v4660_v37  ;;  %6013 = vpow2.f32 %v4107_v40  ;;  %v9038_v27 = vsel %vm8452_vm10, %v6002_v58, 0.0  ;;  %v4558_v52 = vmul.f32 1.442695, %v4499_v11 }
 0x8f0   : > { %v4556_v62 = vmul.f32 1.442695, %v4498_v22  ;;  %v6004_v26 = vpop.eup %6003  ;;  %v3954_v23 = vpop.xlane.xlu1 %3953  ;;  %v4212_v22 = vsel %vm3924_vm8, %v9024_v31, 0.0  ;;  %9913 = vst [vmem:[#allocation36_spill] sm:$0xff] %v9038_v27 }
 0x8f1   : > { %v3951_v10 = vpop.xlane.xlu0 %3950  ;;  %v9030_v14 = vsel %vm8427_vm6, %v6004_v26, 0.0  ;;  %v6006_v46 = vpop.eup %6005 }
 0x8f2   : > { %v4029_v61 = vsub.f32 %v8525_v9, %v3951_v10  ;;  %9912 = vst [vmem:[#allocation35_spill] sm:$0xff] %v9030_v14  ;;  %6015 = vpow2.f32 %v4556_v62  ;;  %v4179_v30 = vsel %vm3924_vm8, %v9030_v14, 0.0  ;;  %v4030_v62 = vsub.f32 %v8542_v2, %v3954_v23 }
 0x8f3   : > { %4213 = vadd.xlane.f32.xlu1 %v4212_v22  ;;  %4180 = vadd.xlane.f32.xlu0 %v4179_v30  ;;  %6017 = vpow2.f32 %v4526_v13  ;;  %v4615_v22 = vsel %vm3924_vm8, %v9038_v27, 0.0  ;;  %v9052_v23 = vsel %vm8452_vm10, %v6006_v46, 0.0 }
 0x8f4   : > { %v4069_v37 = vmul.f32 1.442695, %v4029_v61  ;;  %v6008_v40 = vpop.eup %6007  ;;  %v4002_v10 = vpop.xlane.xlu1 %4001 }
 0x8f5   : > { %v3999_v26 = vpop.xlane.xlu0 %3998  ;;  %v9044_v14 = vsel %vm8427_vm6, %v6008_v40, 0.0  ;;  %v6010_v61 = vpop.eup %6009 }
 0x8f6   : > { %v4045_v4 = vsub.f32 %v8534_v44, %v3999_v26  ;;  %9914 = vst [vmem:[#allocation37_spill] sm:$0xff] %v9044_v14  ;;  %6019 = vpow2.f32 %v4069_v37  ;;  %v4227_v58 = vsel %vm3924_vm8, %v9044_v14, 0.0  ;;  %v4071_v26 = vmul.f32 1.442695, %v4030_v62 }
 0x8f7   : > { %4616 = vadd.xlane.f32.xlu1 %v4615_v22  ;;  %4228 = vadd.xlane.f32.xlu0 %v4227_v58  ;;  %6021 = vpow2.f32 %v4558_v52  ;;  %v4046_v37 = vsub.f32 %v8551_v12, %v4002_v10  ;;  %v9066_v10 = vsel %vm8427_vm6, %v6010_v61, 0.0 }
 0x8f8   : > { %v4101_v11 = vmul.f32 1.442695, %v4045_v4  ;;  %v6012_v13 = vpop.eup %6011  ;;  %v4405_v30 = vpop.xlane.xlu1 %4404  ;;  %v4663_v4 = vsel %vm3924_vm8, %v9052_v23, 0.0 }
 0x8f9   : > { %v4402_v40 = vpop.xlane.xlu0 %4401  ;;  %v9058_v27 = vsel %vm8452_vm10, %v6012_v13, 0.0  ;;  %v6014_v22 = vpop.eup %6013  ;;  %v4481_v58 = vsub.f32 %v8542_v2, %v4405_v30 }
 0x8fa   : > { %v4480_v31 = vsub.f32 %v8525_v9, %v4402_v40  ;;  %6023 = vpow2.f32 %v4101_v11  ;;  %v4630_v46 = vsel %vm3924_vm8, %v9058_v27, 0.0  ;;  %v4103_v11 = vmul.f32 1.442695, %v4046_v37 }
 0x8fb   : > { %4664 = vadd.xlane.f32.xlu1 %v4663_v4  ;;  %4631 = vadd.xlane.f32.xlu0 %v4630_v46  ;;  %6025 = vpow2.f32 %v4071_v26  ;;  %v9080_v30 = vsel %vm8427_vm6, %v6014_v22, 0.0  ;;  %v4522_v37 = vmul.f32 1.442695, %v4481_v58 }
 0x8fc   : > { %v4520_v52 = vmul.f32 1.442695, %v4480_v31  ;;  %v6016_v62 = vpop.eup %6015  ;;  %v4453_v13 = vpop.xlane.xlu1 %4452  ;;  %v4182_v31 = vsel %vm3924_vm8, %v9066_v10, 0.0  ;;  %9915 = vst [vmem:[#allocation38_spill] sm:$0xff] %v9080_v30 }
 0x8fd   : > { %v4450_v40 = vpop.xlane.xlu0 %4449  ;;  %v9072_v14 = vsel %vm8452_vm10, %v6016_v62, 0.0  ;;  %v6018_v4 = vpop.eup %6017 }
 0x8fe   : > { %v4496_v9 = vsub.f32 %v8534_v44, %v4450_v40  ;;  %6027 = vpow2.f32 %v4520_v52  ;;  %v4678_v61 = vsel %vm3924_vm8, %v9072_v14, 0.0  ;;  %v4497_v52 = vsub.f32 %v8551_v12, %v4453_v13 }
 0x8ff   : > { %4183 = vadd.xlane.f32.xlu1 %v4182_v31  ;;  %4679 = vadd.xlane.f32.xlu0 %v4678_v61  ;;  %6029 = vpow2.f32 %v4103_v11  ;;  %v4230_v31 = vsel %vm3924_vm8, %v9080_v30, 0.0  ;;  %v9094_v13 = vsel %vm8452_vm10, %v6018_v4, 0.0 }
 0x900   : > { %v4552_v46 = vmul.f32 1.442695, %v4496_v9  ;;  %v6020_v26 = vpop.eup %6019  ;;  %v3972_v40 = vpop.xlane.xlu1 %3971 }
 0x901   : > { %v3969_v62 = vpop.xlane.xlu0 %3968  ;;  %v9086_v44 = vsel %vm8427_vm6, %v6020_v26, 0.0  ;;  %v6022_v9 = vpop.eup %6021 }
 0x902   : > { %v4035_v2 = vsub.f32 %v8576_v25, %v3969_v62  ;;  %9916 = vst [vmem:[#allocation39_spill] sm:$0xff] %v9086_v44  ;;  %6031 = vpow2.f32 %v4552_v46  ;;  %v4173_v22 = vsel %vm3924_vm8, %v9086_v44, 0.0  ;;  %v4554_v62 = vmul.f32 1.442695, %v4497_v52 }
 0x903   : > { %4231 = vadd.xlane.f32.xlu1 %v4230_v31  ;;  %4174 = vadd.xlane.f32.xlu0 %v4173_v22  ;;  %6033 = vpow2.f32 %v4522_v37  ;;  %v4036_v46 = vsub.f32 %v8588_v45, %v3972_v40  ;;  %v9108_v40 = vsel %vm8452_vm10, %v6022_v9, 0.0 }
 0x904   : > { %v4081_v58 = vmul.f32 1.442695, %v4035_v2  ;;  %v6024_v11 = vpop.eup %6023  ;;  %v4020_v61 = vpop.xlane.xlu1 %4019  ;;  %v4633_v2 = vsel %vm3924_vm8, %v9094_v13, 0.0  ;;  %9918 = vst [vmem:[#allocation41_spill] sm:$0xff] %v9108_v40 }
 0x905   : > { %v4017_v26 = vpop.xlane.xlu0 %4016  ;;  %v9100_v30 = vsel %vm8427_vm6, %v6024_v11, 0.0  ;;  %v6026_v31 = vpop.eup %6025  ;;  %v4083_v11 = vmul.f32 1.442695, %v4036_v46 }
 0x906   : > { %v4051_v12 = vsub.f32 %v8593_v49, %v4017_v26  ;;  %9917 = vst [vmem:[#allocation40_spill] sm:$0xff] %v9100_v30  ;;  %6035 = vpow2.f32 %v4081_v58  ;;  %v4221_v4 = vsel %vm3924_vm8, %v9100_v30, 0.0  ;;  %v4052_v30 = vsub.f32 %v8599_v28, %v4020_v61 }
 0x907   : > { %4634 = vadd.xlane.f32.xlu1 %v4633_v2  ;;  %4222 = vadd.xlane.f32.xlu0 %v4221_v4  ;;  %6037 = vpow2.f32 %v4554_v62  ;;  %v9122_v62 = vsel %vm8427_vm6, %v6026_v31, 0.0 }
 0x908   : > { %v4113_v37 = vmul.f32 1.442695, %v4051_v12  ;;  %v6028_v52 = vpop.eup %6027  ;;  %v4423_v22 = vpop.xlane.xlu1 %4422  ;;  %v4681_v12 = vsel %vm3924_vm8, %v9108_v40, 0.0  ;;  %9920 = vst [vmem:[#allocation43_spill] sm:$0xff] %v9122_v62 }
 0x909   : > { %v4420_v26 = vpop.xlane.xlu0 %4419  ;;  %v9113_v44 = vsel %vm8452_vm10, %v6028_v52, 0.0  ;;  %v6030_v2 = vpop.eup %6029  ;;  %v4487_v61 = vsub.f32 %v8588_v45, %v4423_v22 }
 0x90a   : > { %v4486_v58 = vsub.f32 %v8576_v25, %v4420_v26  ;;  %9919 = vst [vmem:[#allocation42_spill] sm:$0xff] %v9113_v44  ;;  %6039 = vpow2.f32 %v4113_v37  ;;  %v4624_v9 = vsel %vm3924_vm8, %v9113_v44, 0.0  ;;  %v4115_v44 = vmul.f32 1.442695, %v4052_v30 }
 0x90b   : > { %4682 = vadd.xlane.f32.xlu1 %v4681_v12  ;;  %4625 = vadd.xlane.f32.xlu0 %v4624_v9  ;;  %6041 = vpow2.f32 %v4083_v11  ;;  %v9137_v11 = vsel %vm8427_vm6, %v6030_v2, 0.0 }
 0x90c   : > { %v4532_v4 = vmul.f32 1.442695, %v4486_v58  ;;  %v6032_v46 = vpop.eup %6031  ;;  %v9124_v52 = vpop.xlane.xlu1 %4470  ;;  %v4176_v58 = vsel %vm3924_vm8, %v9122_v62, 0.0  ;;  %9922 = vst [vmem:[#allocation45_spill] sm:$0xff] %v9137_v11 }
 0x90d   : > { %v4468_v26 = vpop.xlane.xlu0 %4467  ;;  %v9129_v37 = vsel %vm8452_vm10, %v6032_v46, 0.0  ;;  %v6034_v25 = vpop.eup %6033  ;;  %v4534_v46 = vmul.f32 1.442695, %v4487_v61 }
 0x90e   : > { %9921 = vst [vmem:[#allocation44_spill] sm:$0xff] %v9129_v37  ;;  %6043 = vpow2.f32 %v4532_v4  ;;  %v4672_v31 = vsel %vm3924_vm8, %v9129_v37, 0.0  ;;  %v9151_v61 = vsel %vm8452_vm10, %v6034_v25, 0.0 }
 0x90f   : > { %4177 = vadd.xlane.f32.xlu1 %v4176_v58  ;;  %4673 = vadd.xlane.f32.xlu0 %v4672_v31  ;;  %6045 = vpow2.f32 %v4115_v44  ;;  %v4224_v58 = vsel %vm3924_vm8, %v9137_v11, 0.0  ;;  %9924 = vst [vmem:[#allocation47_spill] sm:$0xff] %v9151_v61 }
 0x910   : > { %v6036_v22 = vpop.eup %6035  ;;  %v3966_v12 = vpop.xlane.xlu1 %3965  ;;  %6047 = vpow2.f32 %v4534_v46 }
 0x911   : > { %v3963_v9 = vpop.xlane.xlu0 %3962  ;;  %v4034_v45 = vsub.f32 %v8604_v1, %v3966_v12  ;;  %v9143_v4 = vsel %vm8427_vm6, %v6036_v22, 0.0  ;;  %v6038_v31 = vpop.eup %6037 }
 0x912   : > { %v4033_v30 = vsub.f32 %v8585_v7, %v3963_v9  ;;  %9923 = vst [vmem:[#allocation46_spill] sm:$0xff] %v9143_v4  ;;  %v4191_v2 = vsel %vm3924_vm8, %v9143_v4, 0.0 }
 0x913   : > { %4225 = vadd.xlane.f32.xlu1 %v4224_v58  ;;  %4192 = vadd.xlane.f32.xlu0 %v4191_v2  ;;  %v4079_v9 = vmul.f32 1.442695, %v4034_v45  ;;  %v4502_v2 = vsub.f32 %v8593_v49, %v4468_v26 }
 0x914   : > { %v4077_v62 = vmul.f32 1.442695, %v4033_v30  ;;  %v6040_v12 = vpop.eup %6039  ;;  %v4014_v37 = vpop.xlane.xlu1 %4013  ;;  %v4627_v30 = vsel %vm3924_vm8, %v9151_v61, 0.0 }
 0x915   : > { %v4011_v22 = vpop.xlane.xlu0 %4010  ;;  %v4050_v44 = vsub.f32 %v8613_v21, %v4014_v37  ;;  %v9157_v4 = vsel %vm8427_vm6, %v6040_v12, 0.0  ;;  %v6042_v58 = vpop.eup %6041  ;;  %v9165_v37 = vsel %vm8452_vm10, %v6038_v31, 0.0 }
 0x916   : > { %v4049_v11 = vsub.f32 %v8596_v35, %v4011_v22  ;;  %9925 = vst [vmem:[#allocation48_spill] sm:$0xff] %v9157_v4  ;;  %6049 = vpow2.f32 %v4077_v62  ;;  %v4239_v25 = vsel %vm3924_vm8, %v9157_v4, 0.0  ;;  %v4675_v31 = vsel %vm3924_vm8, %v9165_v37, 0.0 }
 0x917   : > { %4628 = vadd.xlane.f32.xlu1 %v4627_v30  ;;  %4240 = vadd.xlane.f32.xlu0 %v4239_v25  ;;  %6051 = vpow2.f32 %v4079_v9  ;;  %v4111_v22 = vmul.f32 1.442695, %v4050_v44  ;;  %v9180_v9 = vsel %vm8427_vm6, %v6042_v58, 0.0  ;;  %v4564_v25 = vmul.f32 1.442695, %v4502_v2 }
 0x918   : > { %v4109_v45 = vmul.f32 1.442695, %v4049_v11  ;;  %v6044_v46 = vpop.eup %6043  ;;  %v4417_v12 = vpop.xlane.xlu1 %4416 }
 0x919   : > { %v4414_v62 = vpop.xlane.xlu0 %4413  ;;  %v4485_v61 = vsub.f32 %v8604_v1, %v4417_v12  ;;  %v9172_v11 = vsel %vm8452_vm10, %v6044_v46, 0.0  ;;  %v6046_v44 = vpop.eup %6045 }
 0x91a   : > { %v4484_v40 = vsub.f32 %v8585_v7, %v4414_v62  ;;  %6053 = vpow2.f32 %v4109_v45  ;;  %v4642_v30 = vsel %vm3924_vm8, %v9172_v11, 0.0  ;;  %v9188_v58 = vsel %vm8427_vm6, %v6046_v44, 0.0 }
 0x91b   : > { %4676 = vadd.xlane.f32.xlu1 %v4675_v31  ;;  %4643 = vadd.xlane.f32.xlu0 %v4642_v30  ;;  %6055 = vpow2.f32 %v4111_v22  ;;  %v4530_v46 = vmul.f32 1.442695, %v4485_v61  ;;  %v6048_v31 = vpop.eup %6047  ;;  %9926 = vst [vmem:[#allocation49_spill] sm:$0xff] %v9188_v58  ;;  %v4503_v61 = vsub.f32 %v8599_v28, %v9124_v52 }
 0x91c   : > { %v4528_v26 = vmul.f32 1.442695, %v4484_v40  ;;  %v4465_v12 = vpop.xlane.xlu1 %4464  ;;  %v4194_v40 = vsel %vm3924_vm8, %v9180_v9, 0.0 }
 0x91d   : > { %v4462_v62 = vpop.xlane.xlu0 %4461  ;;  %v4501_v49 = vsub.f32 %v8613_v21, %v4465_v12 }
 0x91e   : > { %v4500_v45 = vsub.f32 %v8596_v35, %v4462_v62  ;;  %6057 = vpow2.f32 %v4528_v26  ;;  %v4242_v62 = vsel %vm3924_vm8, %v9188_v58, 0.0 }
 0x91f   : > { %4195 = vadd.xlane.f32.xlu1 %v4194_v40  ;;  %6059 = vpow2.f32 %v4564_v25  ;;  %v4562_v12 = vmul.f32 1.442695, %v4501_v49  ;;  %v9202_v25 = vsel %vm8452_vm10, %v6048_v31, 0.0 }
 0x920   : > { %v4560_v30 = vmul.f32 1.442695, %v4500_v45  ;;  %v6050_v2 = vpop.eup %6049  ;;  %6061 = vpow2.f32 %v4530_v46  ;;  %v4566_v45 = vmul.f32 1.442695, %v4503_v61  ;;  %v4645_v49 = vsel %vm3924_vm8, %v9202_v25, 0.0 }
 0x921   : > { %v9194_v22 = vsel %vm8427_vm6, %v6050_v2, 0.0  ;;  %v6052_v26 = vpop.eup %6051 }
 0x922   : > { %6063 = vpow2.f32 %v4560_v30  ;;  %v4185_v44 = vsel %vm3924_vm8, %v9194_v22, 0.0  ;;  %v9214_v31 = vsel %vm8427_vm6, %v6052_v26, 0.0 }
 0x923   : > { %4243 = vadd.xlane.f32.xlu1 %v4242_v62  ;;  %4186 = vadd.xlane.f32.xlu0 %v4185_v44  ;;  %6065 = vpow2.f32 %v4562_v12  ;;  %v4188_v12 = vsel %vm3924_vm8, %v9214_v31, 0.0 }
 0x924   : > { %v6054_v52 = vpop.eup %6053  ;;  %6067 = vpow2.f32 %v4566_v45 }
 0x925   : > { %v9206_v46 = vsel %vm8427_vm6, %v6054_v52, 0.0  ;;  %v6056_v30 = vpop.eup %6055 }
 0x926   : > { %v4233_v40 = vsel %vm3924_vm8, %v9206_v46, 0.0  ;;  %v9226_v26 = vsel %vm8427_vm6, %v6056_v30, 0.0 }
 0x927   : > { %4646 = vadd.xlane.f32.xlu1 %v4645_v49  ;;  %4234 = vadd.xlane.f32.xlu0 %v4233_v40  ;;  %9927 = vst [vmem:[#allocation50_spill] sm:$0xff] %v9226_v26  ;;  %v4236_v45 = vsel %vm3924_vm8, %v9226_v26, 0.0 }
 0x928   : > { %v6058_v2 = vpop.eup %6057 }
 0x929   : > { %v9218_v62 = vsel %vm8452_vm10, %v6058_v2, 0.0  ;;  %v6060_v61 = vpop.eup %6059 }
 0x92a   : > { %v4636_v44 = vsel %vm3924_vm8, %v9218_v62, 0.0  ;;  %v6062_v52 = vpop.eup %6061  ;;  %v9242_v30 = vsel %vm8452_vm10, %v6060_v61, 0.0 }
 0x92b   : > { %4189 = vadd.xlane.f32.xlu1 %v4188_v12  ;;  %4637 = vadd.xlane.f32.xlu0 %v4636_v44  ;;  %v9238_v12 = vsel %vm8452_vm10, %v6062_v52, 0.0  ;;  %9929 = vst [vmem:[#allocation52_spill] sm:$0xff] %v9242_v30  ;;  %v4690_v28 = vsel %vm3924_vm8, %v9242_v30, 0.0 }
 0x92c   : > { %v6064_v49 = vpop.eup %6063  ;;  %9928 = vst [vmem:[#allocation51_spill] sm:$0xff] %v9238_v12 }
 0x92d   : > { %v9230_v40 = vsel %vm8452_vm10, %v6064_v49, 0.0  ;;  %v6066_v44 = vpop.eup %6065  ;;  %v4639_v49 = vsel %vm3924_vm8, %v9238_v12, 0.0 }
 0x92e   : > { %v4684_v2 = vsel %vm3924_vm8, %v9230_v40, 0.0 }
 0x92f   : > { %4237 = vadd.xlane.f32.xlu1 %v4236_v45  ;;  %4685 = vadd.xlane.f32.xlu0 %v4684_v2  ;;  %v9250_v45 = vsel %vm8452_vm10, %v6066_v44, 0.0  ;;  %v6068_v2 = vpop.eup %6067 }
 0x930   : > { %9930 = vst [vmem:[#allocation53_spill] sm:$0xff] %v9250_v45  ;;  %v4687_v52 = vsel %vm3924_vm8, %v9250_v45, 0.0  ;;  %v9256_v61 = vsel %vm8452_vm10, %v6068_v2, 0.0 }
 0x931   : > { %9931 = vst [vmem:[#allocation54_spill] sm:$0xff] %v9256_v61  ;;  %v4693_v58 = vsel %vm3924_vm8, %v9256_v61, 0.0 }
 0x933   : > { %4640 = vadd.xlane.f32.xlu1 %v4639_v49  ;;  %4691 = vadd.xlane.f32.xlu0 %v4690_v28 }
 0x937   : > { %4688 = vadd.xlane.f32.xlu1 %v4687_v52 }
 0x93b   : > { %4694 = vadd.xlane.f32.xlu1 %v4693_v58 }
 0x940   : > { %v4157_v21 = vpop.xlane.xlu0 %4156 }
 0x941   : > { %6069 = vrcp.f32 %v4157_v21 }
 0x944   : > { %v4160_v49 = vpop.xlane.xlu1 %4159  ;;  %v4205_v28 = vpop.xlane.xlu0 %4204 }
 0x945   : > { %6071 = vrcp.f32 %v4160_v49 }
 0x946   : > { %6073 = vrcp.f32 %v4205_v28 }
 0x948   : > { %v4208_v44 = vpop.xlane.xlu1 %4207  ;;  %v4608_v30 = vpop.xlane.xlu0 %4607 }
 0x949   : > { %6075 = vrcp.f32 %v4608_v30  ;;  %v3859_v30 = vsel %vm3856_vm11, %v8433_v50, 0.0 }
 0x94a   : > { %6077 = vrcp.f32 %v4208_v44 }
 0x94b   : > { %v6070_v2 = vpop.eup %6069 }
 0x94c   : > { %v4611_v45 = vpop.xlane.xlu1 %4610  ;;  %v4656_v52 = vpop.xlane.xlu0 %4655  ;;  %v4250_v58 = vmul.f32 %v6070_v2, %v8821_v0 }
 0x94d   : > { %6079 = vrcp.f32 %v4611_v45 }
 0x94e   : > { %6081 = vrcp.f32 %v4656_v52  ;;  %v4311_v0 = vsel %vm8427_vm6, %v4250_v58, %v3859_v30 }
 0x94f   : > { %v6072_v61 = vpop.eup %6071 }
 0x950   : > { %v4659_v26 = vpop.xlane.xlu1 %4658  ;;  %v4151_v12 = vpop.xlane.xlu0 %4150  ;;  %v4252_v45 = vmul.f32 %v6072_v61, %v8832_v38  ;;  %v3875_v38 = vsel %vm3856_vm11, %v8436_v41, 0.0 }
 0x951   : > { %6083 = vrcp.f32 %v4659_v26  ;;  %v6074_v1 = vpop.eup %6073 }
 0x952   : > { %6085 = vrcp.f32 %v4151_v12  ;;  %v4282_v28 = vmul.f32 %v6074_v1, %v8827_v59  ;;  %v3860_v12 = vsel %vm3856_vm11, %v8440_v60, 0.0 }
 0x953   : > { %v6076_v4 = vpop.eup %6075  ;;  %v4312_v59 = vsel %vm8427_vm6, %v4252_v45, %v3860_v12  ;;  %v3876_v45 = vsel %vm3856_vm11, %v8457_v36, 0.0 }
 0x954   : > { %v4199_v21 = vpop.xlane.xlu0 %4198  ;;  %v4701_v49 = vmul.f32 %v6076_v4, %v8840_v51  ;;  %v6078_v26 = vpop.eup %6077 }
 0x955   : > { %6087 = vrcp.f32 %v4199_v21  ;;  %v4284_v61 = vmul.f32 %v6078_v26, %v8846_v53 }
 0x956   : > { %v4762_v52 = vsel %vm8452_vm10, %v4701_v49, %v4311_v0 }
 0x957   : > { %v6080_v44 = vpop.eup %6079  ;;  %v4795_v51 = vsel %vm4792_vm12, %v8433_v50, %v4762_v52  ;;  %v4327_v50 = vsel %vm8427_vm6, %v4282_v28, %v3875_v38  ;;  %v4328_v0 = vsel %vm8427_vm6, %v4284_v61, %v3876_v45 }
 0x958   : > { %v6082_v2 = vpop.eup %6081  ;;  %v4703_v4 = vmul.f32 %v6080_v44, %v8858_v3  ;;  %v4602_v1 = vpop.xlane.xlu0 %4601  ;;  %4827 = vst.msk [vmem:[%s9932_s24 + $0x10] sm:$0xff] %vm3924_vm8, %v4795_v51  ;;  %v3857_v51 = vsel %vm3856_vm11, %v8470_v17, 0.0 }
 0x959   : > { %v4733_v58 = vmul.f32 %v6082_v2, %v8854_v42  ;;  %6089 = vrcp.f32 %v4602_v1 }
 0x95a   : > { %v4763_v3 = vsel %vm8452_vm10, %v4703_v4, %v4312_v59 }
 0x95b   : > { %v6084_v21 = vpop.eup %6083  ;;  %v4796_v30 = vsel %vm4792_vm12, %v8440_v60, %v4763_v3  ;;  %v4778_v53 = vsel %vm8452_vm10, %v4733_v58, %v4327_v50 }
 0x95c   : > { %4828 = vst.msk [vmem:[%s9932_s24 + $0x18] sm:$0xff] %vm3924_vm8, %v4796_v30  ;;  %v4811_v42 = vsel %vm4792_vm12, %v8436_v41, %v4778_v53  ;;  %v4735_v49 = vmul.f32 %v6084_v21, %v8872_v16  ;;  %v4154_v26 = vpop.xlane.xlu1 %4153  ;;  %v4650_v60 = vpop.xlane.xlu0 %4649 }
 0x95d   : > { %4843 = vst.msk [vmem:[%s9932_s24 + $0x90] sm:$0xff] %vm3924_vm8, %v4811_v42  ;;  %v6086_v28 = vpop.eup %6085  ;;  %6091 = vrcp.f32 %v4650_v60 }
 0x95e   : > { %v4779_v44 = vsel %vm8452_vm10, %v4735_v49, %v4328_v0  ;;  %6093 = vrcp.f32 %v4154_v26  ;;  %v4246_v52 = vmul.f32 %v6086_v28, %v8868_v33  ;;  %v3858_v28 = vsel %vm3856_vm11, %v8511_v32, 0.0 }
 0x95f   : > { %v4812_v41 = vsel %vm4792_vm12, %v8457_v36, %v4779_v44  ;;  %v6088_v2 = vpop.eup %6087 }
 0x960   : > { %4844 = vst.msk [vmem:[%s9932_s24 + $0x98] sm:$0xff] %vm3924_vm8, %v4812_v41  ;;  %v4202_v16 = vpop.xlane.xlu1 %4201  ;;  %v4169_v12 = vpop.xlane.xlu0 %4168  ;;  %v4309_v59 = vsel %vm8427_vm6, %v4246_v52, %v3857_v51  ;;  %v4278_v61 = vmul.f32 %v6088_v2, %v8882_v43  ;;  %v3873_v43 = vsel %vm3856_vm11, %v8491_v48, 0.0 }
 0x961   : > { %6095 = vrcp.f32 %v4202_v16 }
 0x962   : > { %6097 = vrcp.f32 %v4169_v12 }
 0x963   : > { %v6090_v38 = vpop.eup %6089 }
 0x964   : > { %v4697_v4 = vmul.f32 %v6090_v38, %v8890_v24  ;;  %v4605_v36 = vpop.xlane.xlu1 %4604  ;;  %v4217_v1 = vpop.xlane.xlu0 %4216 }
 0x965   : > { %6099 = vrcp.f32 %v4605_v36 }
 0x966   : > { %v4760_v33 = vsel %vm8452_vm10, %v4697_v4, %v4309_v59  ;;  %6101 = vrcp.f32 %v4217_v1  ;;  %v3874_v4 = vsel %vm3856_vm11, %v8502_v55, 0.0 }
 0x967   : > { %v4793_v58 = vsel %vm4792_vm12, %v8470_v17, %v4760_v33  ;;  %v6092_v50 = vpop.eup %6091  ;;  %v4325_v17 = vsel %vm8427_vm6, %v4278_v61, %v3873_v43  ;;  %v9934_v61 = vld [vmem:[#allocation29_spill] sm:$0xff] }
 0x968   : > { %4825 = vst.msk [vmem:[%s9932_s24] sm:$0xff] %vm3924_vm8, %v4793_v58  ;;  %v4653_v24 = vpop.xlane.xlu1 %4652  ;;  %v4620_v3 = vpop.xlane.xlu0 %4619  ;;  %v4729_v21 = vmul.f32 %v6092_v50, %v8898_v6  ;;  %v9935_v50 = vld [vmem:[#allocation28_spill] sm:$0xff] }
 0x969   : > { %6103 = vrcp.f32 %v4653_v24  ;;  %v6094_v30 = vpop.eup %6093 }
 0x96a   : > { %6105 = vrcp.f32 %v4620_v3  ;;  %v4776_v53 = vsel %vm8452_vm10, %v4729_v21, %v4325_v17  ;;  %v4248_v60 = vmul.f32 %v6094_v30, %v8904_v54 }
 0x96b   : > { %v4809_v45 = vsel %vm4792_vm12, %v8491_v48, %v4776_v53  ;;  %v6096_v26 = vpop.eup %6095 }
 0x96c   : > { %v4172_v42 = vpop.xlane.xlu1 %4171  ;;  %v4668_v49 = vpop.xlane.xlu0 %4667  ;;  %4841 = vst.msk [vmem:[%s9932_s24 + $0x80] sm:$0xff] %vm3924_vm8, %v4809_v45  ;;  %v4310_v54 = vsel %vm8427_vm6, %v4248_v60, %v3858_v28  ;;  %v4280_v16 = vmul.f32 %v6096_v26, %v8912_v18  ;;  %v9936_v45 = vld [vmem:[#allocation16_spill] sm:$0xff] }
 0x96d   : > { %v6098_v6 = vpop.eup %6097  ;;  %6107 = vrcp.f32 %v4668_v49 }
 0x96e   : > { %6109 = vrcp.f32 %v4172_v42  ;;  %v4258_v52 = vmul.f32 %v6098_v6, %v8918_v5  ;;  %v4326_v1 = vsel %vm8427_vm6, %v4280_v16, %v3874_v4  ;;  %v9939_v4 = vld [vmem:[#allocation31_spill] sm:$0xff] }
 0x96f   : > { %v6100_v0 = vpop.eup %6099 }
 0x970   : > { %v4699_v44 = vmul.f32 %v6100_v0, %v8926_v34  ;;  %v4220_v48 = vpop.xlane.xlu1 %4219  ;;  %v4163_v41 = vpop.xlane.xlu0 %4162 }
 0x971   : > { %v6102_v12 = vpop.eup %6101  ;;  %6111 = vrcp.f32 %v4220_v48 }
 0x972   : > { %v4761_v2 = vsel %vm8452_vm10, %v4699_v44, %v4310_v54  ;;  %6113 = vrcp.f32 %v4163_v41  ;;  %v4290_v24 = vmul.f32 %v6102_v12, %v9935_v50  ;;  %v9937_v54 = vld [vmem:[#allocation15_spill] sm:$0xff] }
 0x973   : > { %v6104_v38 = vpop.eup %6103  ;;  %v4794_v51 = vsel %vm4792_vm12, %v8511_v32, %v4761_v2  ;;  %v9933_v32 = vld [vmem:[#allocation14_spill] sm:$0xff]  ;;  %v3864_v16 = vsel %vm3856_vm11, %v9937_v54, 0.0 }
 0x974   : > { %v6106_v34 = vpop.eup %6105  ;;  %4826 = vst.msk [vmem:[%s9932_s24 + $0x8] sm:$0xff] %vm3924_vm8, %v4794_v51  ;;  %v4731_v5 = vmul.f32 %v6104_v38, %v8940_v20  ;;  %v4623_v18 = vpop.xlane.xlu1 %4622  ;;  %v3863_v59 = vsel %vm3856_vm11, %v9933_v32, 0.0  ;;  %v9938_v38 = vld [vmem:[#allocation30_spill] sm:$0xff] }
 0x975   : > { %v4211_v36 = vpop.xlane.xlu0 %4210  ;;  %v4709_v33 = vmul.f32 %v6106_v34, %v9934_v61  ;;  %6115 = vrcp.f32 %v4623_v18  ;;  %v4315_v58 = vsel %vm8427_vm6, %v4258_v52, %v3863_v59  ;;  %v9941_v61 = vld [vmem:[#allocation33_spill] sm:$0xff] }
 0x976   : > { %v4777_v20 = vsel %vm8452_vm10, %v4731_v5, %v4326_v1  ;;  %6117 = vrcp.f32 %v4211_v36 }
 0x977   : > { %v4810_v3 = vsel %vm4792_vm12, %v8502_v55, %v4777_v20  ;;  %v4766_v43 = vsel %vm8452_vm10, %v4709_v33, %v4315_v58  ;;  %v6108_v21 = vpop.eup %6107  ;;  %v3879_v55 = vsel %vm3856_vm11, %v9936_v45, 0.0  ;;  %v9942_v20 = vld [vmem:[#allocation24_spill] sm:$0xff] }
 0x978   : > { %4842 = vst.msk [vmem:[%s9932_s24 + $0x88] sm:$0xff] %vm3924_vm8, %v4810_v3  ;;  %v4799_v30 = vsel %vm4792_vm12, %v9933_v32, %v4766_v43  ;;  %v4671_v17 = vpop.xlane.xlu1 %4670  ;;  %v4741_v42 = vmul.f32 %v6108_v21, %v8960_v56  ;;  %v6110_v49 = vpop.eup %6109  ;;  %v4331_v26 = vsel %vm8427_vm6, %v4290_v24, %v3879_v55  ;;  %v9940_v32 = vld [vmem:[#allocation17_spill] sm:$0xff]  ;;  %v3861_v3 = vsel %vm3856_vm11, %v9942_v20, 0.0 }
 0x979   : > { %v4614_v53 = vpop.xlane.xlu0 %4613  ;;  %4831 = vst.msk [vmem:[%s9932_s24 + $0x30] sm:$0xff] %vm3924_vm8, %v4799_v30  ;;  %6119 = vrcp.f32 %v4671_v17  ;;  %v4260_v48 = vmul.f32 %v6110_v49, %v8954_v19  ;;  %v3880_v59 = vsel %vm3856_vm11, %v9940_v32, 0.0  ;;  %v9943_v30 = vld [vmem:[#allocation32_spill] sm:$0xff] }
 0x97a   : > { %6121 = vrcp.f32 %v4614_v53  ;;  %v4782_v60 = vsel %vm8452_vm10, %v4741_v42, %v4331_v26 }
 0x97b   : > { %v4815_v6 = vsel %vm4792_vm12, %v9936_v45, %v4782_v60  ;;  %v6112_v44 = vpop.eup %6111  ;;  %v4316_v19 = vsel %vm8427_vm6, %v4260_v48, %v3864_v16  ;;  %v9944_v60 = vld [vmem:[#allocation26_spill] sm:$0xff] }
 0x97c   : > { %v4166_v0 = vpop.xlane.xlu1 %4165  ;;  %4847 = vst.msk [vmem:[%s9932_s24 + $0xb0] sm:$0xff] %vm3924_vm8, %v4815_v6  ;;  %v6114_v56 = vpop.eup %6113  ;;  %v4292_v51 = vmul.f32 %v6112_v44, %v9938_v38  ;;  %v3877_v6 = vsel %vm3856_vm11, %v9944_v60, 0.0  ;;  %v9946_v38 = vld [vmem:[#allocation36_spill] sm:$0xff] }
 0x97d   : > { %v4662_v28 = vpop.xlane.xlu0 %4661  ;;  %v4254_v5 = vmul.f32 %v6114_v56, %v9939_v4 }
 0x97e   : > { %6123 = vrcp.f32 %v4662_v28  ;;  %v4332_v24 = vsel %vm8427_vm6, %v4292_v51, %v3880_v59 }
 0x97f   : > { %v6116_v41 = vpop.eup %6115  ;;  %6125 = vrcp.f32 %v4166_v0  ;;  %v4313_v21 = vsel %vm8427_vm6, %v4254_v5, %v3861_v3  ;;  %v9947_v5 = vld [vmem:[#allocation34_spill] sm:$0xff] }
 0x980   : > { %v4711_v12 = vmul.f32 %v6116_v41, %v8982_v15  ;;  %v4214_v52 = vpop.xlane.xlu1 %4213  ;;  %v6118_v34 = vpop.eup %6117 }
 0x981   : > { %v4181_v2 = vpop.xlane.xlu0 %4180  ;;  %6127 = vrcp.f32 %v4214_v52  ;;  %v4286_v17 = vmul.f32 %v6118_v34, %v9943_v30 }
 0x982   : > { %v4767_v18 = vsel %vm8452_vm10, %v4711_v12, %v4316_v19  ;;  %6129 = vrcp.f32 %v4181_v2  ;;  %v9945_v2 = vld [vmem:[#allocation25_spill] sm:$0xff] }
 0x983   : > { %v6120_v36 = vpop.eup %6119  ;;  %v4800_v1 = vsel %vm4792_vm12, %v9937_v54, %v4767_v18  ;;  %v4329_v44 = vsel %vm8427_vm6, %v4286_v17, %v3877_v6  ;;  %v3862_v19 = vsel %vm3856_vm11, %v9945_v2, 0.0  ;;  %v9952_v6 = vld [vmem:[#allocation9_spill] sm:$0xff] }
 0x984   : > { %v6122_v15 = vpop.eup %6121  ;;  %4832 = vst.msk [vmem:[%s9932_s24 + $0x38] sm:$0xff] %vm3924_vm8, %v4800_v1  ;;  %v4743_v33 = vmul.f32 %v6120_v36, %v9941_v61  ;;  %v4617_v58 = vpop.xlane.xlu1 %4616  ;;  %v9948_v1 = vld [vmem:[#allocation35_spill] sm:$0xff] }
 0x985   : > { %v4229_v50 = vpop.xlane.xlu0 %4228  ;;  %v4705_v43 = vmul.f32 %v6122_v15, %v9002_v29  ;;  %6131 = vrcp.f32 %v4617_v58  ;;  %v9949_v58 = vld [vmem:[#allocation27_spill] sm:$0xff] }
 0x986   : > { %v4783_v53 = vsel %vm8452_vm10, %v4743_v33, %v4332_v24  ;;  %6133 = vrcp.f32 %v4229_v50  ;;  %v3878_v50 = vsel %vm3856_vm11, %v9949_v58, 0.0 }
 0x987   : > { %v4816_v45 = vsel %vm4792_vm12, %v9940_v32, %v4783_v53  ;;  %v4764_v55 = vsel %vm8452_vm10, %v4705_v43, %v4313_v21  ;;  %v9950_v21 = vld [vmem:[#allocation6_spill] sm:$0xff] }
 0x988   : > { %v6124_v42 = vpop.eup %6123  ;;  %4848 = vst.msk [vmem:[%s9932_s24 + $0xb8] sm:$0xff] %vm3924_vm8, %v4816_v45  ;;  %v4797_v29 = vsel %vm4792_vm12, %v9942_v20, %v4764_v55  ;;  %v4665_v49 = vpop.xlane.xlu1 %4664  ;;  %v3867_v30 = vsel %vm3856_vm11, %v9950_v21, 0.0  ;;  %v9951_v45 = vld [vmem:[#allocation37_spill] sm:$0xff] }
 0x989   : > { %v4632_v26 = vpop.xlane.xlu0 %4631  ;;  %4829 = vst.msk [vmem:[%s9932_s24 + $0x20] sm:$0xff] %vm3924_vm8, %v4797_v29  ;;  %v4737_v0 = vmul.f32 %v6124_v42, %v9016_v57  ;;  %6135 = vrcp.f32 %v4665_v49  ;;  %v6126_v28 = vpop.eup %6125 }
 0x98a   : > { %6137 = vrcp.f32 %v4632_v26  ;;  %v4256_v12 = vmul.f32 %v6126_v28, %v9010_v63 }
 0x98b   : > { %v4780_v48 = vsel %vm8452_vm10, %v4737_v0, %v4329_v44  ;;  %v6128_v16 = vpop.eup %6127  ;;  %v3883_v0 = vsel %vm3856_vm11, %v9952_v6, 0.0 }
 0x98c   : > { %v4813_v56 = vsel %vm4792_vm12, %v9944_v60, %v4780_v48  ;;  %v4184_v41 = vpop.xlane.xlu1 %4183  ;;  %v6130_v57 = vpop.eup %6129  ;;  %v4314_v63 = vsel %vm8427_vm6, %v4256_v12, %v3862_v19  ;;  %v4288_v18 = vmul.f32 %v6128_v16, %v9947_v5 }
 0x98d   : > { %v4680_v54 = vpop.xlane.xlu0 %4679  ;;  %4845 = vst.msk [vmem:[%s9932_s24 + $0xa0] sm:$0xff] %vm3924_vm8, %v4813_v56  ;;  %v4266_v15 = vmul.f32 %v6130_v57, %v9948_v1 }
 0x98e   : > { %6139 = vrcp.f32 %v4680_v54  ;;  %v4330_v43 = vsel %vm8427_vm6, %v4288_v18, %v3878_v50  ;;  %v9955_v18 = vld [vmem:[#allocation39_spill] sm:$0xff] }
 0x98f   : > { %v6132_v52 = vpop.eup %6131  ;;  %6141 = vrcp.f32 %v4184_v41  ;;  %v4319_v53 = vsel %vm8427_vm6, %v4266_v15, %v3867_v30 }
 0x990   : > { %v4707_v51 = vmul.f32 %v6132_v52, %v9946_v38  ;;  %v4232_v34 = vpop.xlane.xlu1 %4231  ;;  %v6134_v36 = vpop.eup %6133 }
 0x991   : > { %v4175_v4 = vpop.xlane.xlu0 %4174  ;;  %6143 = vrcp.f32 %v4232_v34  ;;  %v4298_v55 = vmul.f32 %v6134_v36, %v9951_v45 }
 0x992   : > { %v4765_v32 = vsel %vm8452_vm10, %v4707_v51, %v4314_v63  ;;  %6145 = vrcp.f32 %v4175_v4  ;;  %v9954_v4 = vld [vmem:[#allocation38_spill] sm:$0xff] }
 0x993   : > { %v6136_v59 = vpop.eup %6135  ;;  %v4798_v61 = vsel %vm4792_vm12, %v9945_v2, %v4765_v32  ;;  %v4335_v48 = vsel %vm8427_vm6, %v4298_v55, %v3883_v0  ;;  %v9953_v2 = vld [vmem:[#allocation8_spill] sm:$0xff] }
 0x994   : > { %v6138_v33 = vpop.eup %6137  ;;  %4830 = vst.msk [vmem:[%s9932_s24 + $0x28] sm:$0xff] %vm3924_vm8, %v4798_v61  ;;  %v4739_v24 = vmul.f32 %v6136_v59, %v9052_v23  ;;  %v4635_v20 = vpop.xlane.xlu1 %4634  ;;  %v3868_v19 = vsel %vm3856_vm11, %v9953_v2, 0.0  ;;  %v9956_v59 = vld [vmem:[#allocation11_spill] sm:$0xff]  ;;  %v9962_v0 = vld [vmem:[#allocation44_spill] sm:$0xff] }
 0x995   : > { %v4223_v3 = vpop.xlane.xlu0 %4222  ;;  %v4717_v17 = vmul.f32 %v6138_v33, %v9058_v27  ;;  %6147 = vrcp.f32 %v4635_v20  ;;  %v3884_v61 = vsel %vm3856_vm11, %v9956_v59, 0.0  ;;  %v9957_v33 = vld [vmem:[#allocation41_spill] sm:$0xff] }
 0x996   : > { %v4781_v23 = vsel %vm8452_vm10, %v4739_v24, %v4330_v43  ;;  %6149 = vrcp.f32 %v4223_v3  ;;  %v9958_v3 = vld [vmem:[#allocation7_spill] sm:$0xff] }
 0x997   : > { %v4814_v42 = vsel %vm4792_vm12, %v9949_v58, %v4781_v23  ;;  %v4770_v29 = vsel %vm8452_vm10, %v4717_v17, %v4319_v53  ;;  %v3865_v43 = vsel %vm3856_vm11, %v9958_v3, 0.0  ;;  %v9960_v53 = vld [vmem:[#allocation40_spill] sm:$0xff] }
 0x998   : > { %v6140_v49 = vpop.eup %6139  ;;  %4846 = vst.msk [vmem:[%s9932_s24 + $0xa8] sm:$0xff] %vm3924_vm8, %v4814_v42  ;;  %v4803_v27 = vsel %vm4792_vm12, %v9950_v21, %v4770_v29  ;;  %v4683_v26 = vpop.xlane.xlu1 %4682  ;;  %v9959_v21 = vld [vmem:[#allocation42_spill] sm:$0xff] }
 0x999   : > { %v4626_v60 = vpop.xlane.xlu0 %4625  ;;  %4835 = vst.msk [vmem:[%s9932_s24 + $0x50] sm:$0xff] %vm3924_vm8, %v4803_v27  ;;  %v4749_v28 = vmul.f32 %v6140_v49, %v9072_v14  ;;  %6151 = vrcp.f32 %v4683_v26  ;;  %v6142_v44 = vpop.eup %6141 }
 0x99a   : > { %6153 = vrcp.f32 %v4626_v60  ;;  %v4268_v57 = vmul.f32 %v6142_v44, %v9066_v10  ;;  %v9961_v60 = vld [vmem:[#allocation10_spill] sm:$0xff] }
 0x99b   : > { %v4786_v56 = vsel %vm8452_vm10, %v4749_v28, %v4335_v48  ;;  %v6144_v12 = vpop.eup %6143 }
 0x99c   : > { %v4819_v41 = vsel %vm4792_vm12, %v9952_v6, %v4786_v56  ;;  %v4178_v54 = vpop.xlane.xlu1 %4177  ;;  %v6146_v14 = vpop.eup %6145  ;;  %v4320_v10 = vsel %vm8427_vm6, %v4268_v57, %v3868_v19  ;;  %v4300_v63 = vmul.f32 %v6144_v12, %v9954_v4  ;;  %v3881_v6 = vsel %vm3856_vm11, %v9961_v60, 0.0  ;;  %v9963_v12 = vld [vmem:[#allocation43_spill] sm:$0xff] }
 0x99d   : > { %v4674_v16 = vpop.xlane.xlu0 %4673  ;;  %4851 = vst.msk [vmem:[%s9932_s24 + $0xd0] sm:$0xff] %vm3924_vm8, %v4819_v41  ;;  %v4262_v36 = vmul.f32 %v6146_v14, %v9955_v18  ;;  %v9967_v18 = vld [vmem:[#allocation46_spill] sm:$0xff] }
 0x99e   : > { %6155 = vrcp.f32 %v4674_v16  ;;  %v4336_v20 = vsel %vm8427_vm6, %v4300_v63, %v3884_v61  ;;  %v9966_v63 = vld [vmem:[#allocation45_spill] sm:$0xff] }
 0x99f   : > { %v6148_v52 = vpop.eup %6147  ;;  %6157 = vrcp.f32 %v4178_v54  ;;  %v4317_v17 = vsel %vm8427_vm6, %v4262_v36, %v3865_v43 }
 0x9a0   : > { %v4719_v38 = vmul.f32 %v6148_v52, %v9094_v13  ;;  %v4226_v51 = vpop.xlane.xlu1 %4225  ;;  %v6150_v5 = vpop.eup %6149 }
 0x9a1   : > { %v4193_v34 = vpop.xlane.xlu0 %4192  ;;  %6159 = vrcp.f32 %v4226_v51  ;;  %v4294_v45 = vmul.f32 %v6150_v5, %v9960_v53 }
 0x9a2   : > { %v4771_v1 = vsel %vm8452_vm10, %v4719_v38, %v4320_v10  ;;  %6161 = vrcp.f32 %v4193_v34  ;;  %v9965_v38 = vld [vmem:[#allocation47_spill] sm:$0xff] }
 0x9a3   : > { %v6152_v15 = vpop.eup %6151  ;;  %v4804_v32 = vsel %vm4792_vm12, %v9953_v2, %v4771_v1  ;;  %v4333_v48 = vsel %vm8427_vm6, %v4294_v45, %v3881_v6  ;;  %v9964_v2 = vld [vmem:[#allocation12_spill] sm:$0xff] }
 0x9a4   : > { %v6154_v13 = vpop.eup %6153  ;;  %4836 = vst.msk [vmem:[%s9932_s24 + $0x58] sm:$0xff] %vm3924_vm8, %v4804_v32  ;;  %v4751_v58 = vmul.f32 %v6152_v15, %v9957_v33  ;;  %v4629_v50 = vpop.xlane.xlu1 %4628  ;;  %v3866_v19 = vsel %vm3856_vm11, %v9964_v2, 0.0 }
 0x9a5   : > { %v9572_v24 = vpop.xlane.xlu0 %4240  ;;  %v4713_v30 = vmul.f32 %v6154_v13, %v9959_v21  ;;  %6163 = vrcp.f32 %v4629_v50 }
 0x9a6   : > { %v4787_v55 = vsel %vm8452_vm10, %v4751_v58, %v4336_v20 }
 0x9a7   : > { %v4820_v23 = vsel %vm4792_vm12, %v9956_v59, %v4787_v55  ;;  %v4768_v42 = vsel %vm8452_vm10, %v4713_v30, %v4317_v17  ;;  %v9968_v59 = vld [vmem:[#allocation13_spill] sm:$0xff] }
 0x9a8   : > { %v6156_v29 = vpop.eup %6155  ;;  %4852 = vst.msk [vmem:[%s9932_s24 + $0xd8] sm:$0xff] %vm3924_vm8, %v4820_v23  ;;  %v4801_v49 = vsel %vm4792_vm12, %v9958_v3, %v4768_v42  ;;  %v4677_v27 = vpop.xlane.xlu1 %4676  ;;  %v3882_v61 = vsel %vm3856_vm11, %v9968_v59, 0.0  ;;  %v9969_v3 = vld [vmem:[#allocation18_spill] sm:$0xff] }
 0x9a9   : > { %v4644_v26 = vpop.xlane.xlu0 %4643  ;;  %4833 = vst.msk [vmem:[%s9932_s24 + $0x40] sm:$0xff] %vm3924_vm8, %v4801_v49  ;;  %v4745_v28 = vmul.f32 %v6156_v29, %v9962_v0  ;;  %6165 = vrcp.f32 %v4677_v27  ;;  %v6158_v44 = vpop.eup %6157  ;;  %v3871_v43 = vsel %vm3856_vm11, %v9969_v3, 0.0 }
 0x9aa   : > { %6167 = vrcp.f32 %v4644_v26  ;;  %v4264_v57 = vmul.f32 %v6158_v44, %v9963_v12 }
 0x9ab   : > { %v4784_v56 = vsel %vm8452_vm10, %v4745_v28, %v4333_v48  ;;  %v6160_v16 = vpop.eup %6159 }
 0x9ac   : > { %v4817_v41 = vsel %vm4792_vm12, %v9961_v60, %v4784_v56  ;;  %v4196_v54 = vpop.xlane.xlu1 %4195  ;;  %v6162_v14 = vpop.eup %6161  ;;  %v4318_v4 = vsel %vm8427_vm6, %v4264_v57, %v3866_v19  ;;  %v4296_v5 = vmul.f32 %v6160_v16, %v9966_v63  ;;  %v9970_v60 = vld [vmem:[#allocation19_spill] sm:$0xff] }
 0x9ad   : > { %4849 = vst.msk [vmem:[%s9932_s24 + $0xc0] sm:$0xff] %vm3924_vm8, %v4817_v41  ;;  %6169 = vrcp.f32 %v4196_v54  ;;  %v4274_v36 = vmul.f32 %v6162_v14, %v9967_v18  ;;  %v3872_v6 = vsel %vm3856_vm11, %v9970_v60, 0.0 }
 0x9ae   : > { %v4334_v20 = vsel %vm8427_vm6, %v4296_v5, %v3882_v61 }
 0x9af   : > { %v6164_v52 = vpop.eup %6163  ;;  %v4323_v30 = vsel %vm8427_vm6, %v4274_v36, %v3871_v43 }
 0x9b0   : > { %v4715_v51 = vmul.f32 %v6164_v52, %v9965_v38  ;;  %v4244_v34 = vpop.xlane.xlu1 %4243  ;;  %v4187_v10 = vpop.xlane.xlu0 %4186 }
 0x9b1   : > { %6171 = vrcp.f32 %v4187_v10 }
 0x9b2   : > { %v4769_v1 = vsel %vm8452_vm10, %v4715_v51, %v4318_v4  ;;  %v9971_v4 = vld [vmem:[#allocation48_spill] sm:$0xff] }
 0x9b3   : > { %v6166_v15 = vpop.eup %6165  ;;  %v4802_v32 = vsel %vm4792_vm12, %v9964_v2, %v4769_v1 }
 0x9b4   : > { %v6168_v13 = vpop.eup %6167  ;;  %4834 = vst.msk [vmem:[%s9932_s24 + $0x48] sm:$0xff] %vm3924_vm8, %v4802_v32  ;;  %v4747_v33 = vmul.f32 %v6166_v15, %v9165_v37  ;;  %v4647_v58 = vpop.xlane.xlu1 %4646  ;;  %v9973_v15 = vld [vmem:[#allocation51_spill] sm:$0xff] }
 0x9b5   : > { %v4235_v50 = vpop.xlane.xlu0 %4234  ;;  %v4725_v21 = vmul.f32 %v6168_v13, %v9172_v11  ;;  %6173 = vrcp.f32 %v4647_v58  ;;  %v9974_v13 = vld [vmem:[#allocation20_spill] sm:$0xff] }
 0x9b6   : > { %v4785_v17 = vsel %vm8452_vm10, %v4747_v33, %v4334_v20  ;;  %6175 = vrcp.f32 %v4235_v50  ;;  %v9975_v33 = vld [vmem:[#allocation50_spill] sm:$0xff]  ;;  %v9976_v50 = vld [vmem:[#allocation52_spill] sm:$0xff] }
 0x9b7   : > { %v4818_v37 = vsel %vm4792_vm12, %v9968_v59, %v4785_v17  ;;  %v4774_v53 = vsel %vm8452_vm10, %v4725_v21, %v4323_v30  ;;  %v6170_v23 = vpop.eup %6169  ;;  %v3887_v59 = vsel %vm3856_vm11, %v9974_v13, 0.0 }
 0x9b8   : > { %4850 = vst.msk [vmem:[%s9932_s24 + $0xc8] sm:$0xff] %vm3924_vm8, %v4818_v37  ;;  %v4807_v11 = vsel %vm4792_vm12, %v9969_v3, %v4774_v53  ;;  %v4190_v45 = vpop.xlane.xlu1 %4189  ;;  %v4276_v49 = vmul.f32 %v6170_v23, %v9180_v9  ;;  %v9977_v37 = vld [vmem:[#allocation23_spill] sm:$0xff]  ;;  %v9979_v23 = vld [vmem:[#allocation49_spill] sm:$0xff] }
 0x9b9   : > { %v4638_v55 = vpop.xlane.xlu0 %4637  ;;  %4839 = vst.msk [vmem:[%s9932_s24 + $0x70] sm:$0xff] %vm3924_vm8, %v4807_v11  ;;  %v3886_v53 = vsel %vm3856_vm11, %v9977_v37, 0.0 }
 0x9ba   : > { %6177 = vrcp.f32 %v4638_v55  ;;  %v4324_v48 = vsel %vm8427_vm6, %v4276_v49, %v3872_v6 }
 0x9bb   : > { %6179 = vrcp.f32 %v4190_v45  ;;  %v6172_v27 = vpop.eup %6171  ;;  %v9978_v45 = vld [vmem:[#allocation53_spill] sm:$0xff] }
 0x9bc   : > { %v4238_v42 = vpop.xlane.xlu1 %4237  ;;  %6181 = vrcp.f32 %v9572_v24  ;;  %v4270_v24 = vmul.f32 %v6172_v27, %v9194_v22  ;;  %v3869_v22 = vsel %vm3856_vm11, %v8585_v7, 0.0 }
 0x9bd   : > { %v4686_v29 = vpop.xlane.xlu0 %4685 }
 0x9be   : > { %6183 = vrcp.f32 %v4686_v29  ;;  %v4321_v57 = vsel %vm8427_vm6, %v4270_v24, %v3869_v22 }
 0x9bf   : > { %v6174_v26 = vpop.eup %6173  ;;  %6185 = vrcp.f32 %v4238_v42 }
 0x9c0   : > { %v4727_v0 = vmul.f32 %v6174_v26, %v9202_v25  ;;  %v4641_v28 = vpop.xlane.xlu1 %4640  ;;  %v6176_v56 = vpop.eup %6175 }
 0x9c1   : > { %v4692_v44 = vpop.xlane.xlu0 %4691  ;;  %6187 = vrcp.f32 %v4641_v28  ;;  %v4302_v14 = vmul.f32 %v6176_v56, %v9206_v46 }
 0x9c2   : > { %v4775_v9 = vsel %vm8452_vm10, %v4727_v0, %v4324_v48  ;;  %6189 = vrcp.f32 %v4692_v44  ;;  %v9981_v0 = vld [vmem:[#allocation54_spill] sm:$0xff] }
 0x9c3   : > { %v4808_v41 = vsel %vm4792_vm12, %v9970_v60, %v4775_v9  ;;  %6191 = vrcp.f32 %v4244_v34  ;;  %v9980_v60 = vld [vmem:[#allocation21_spill] sm:$0xff] }
 0x9c4   : > { %v6178_v54 = vpop.eup %6177  ;;  %4840 = vst.msk [vmem:[%s9932_s24 + $0x78] sm:$0xff] %vm3924_vm8, %v4808_v41  ;;  %v4689_v25 = vpop.xlane.xlu1 %4688  ;;  %v3888_v6 = vsel %vm3856_vm11, %v9980_v60, 0.0 }
 0x9c5   : > { %v4721_v16 = vmul.f32 %v6178_v54, %v9218_v62  ;;  %6193 = vrcp.f32 %v4689_v25  ;;  %v6180_v12 = vpop.eup %6179  ;;  %v3885_v62 = vsel %vm3856_vm11, %v8596_v35, 0.0 }
 0x9c6   : > { %v6182_v52 = vpop.eup %6181  ;;  %v4272_v34 = vmul.f32 %v6180_v12, %v9214_v31  ;;  %v9972_v31 = vld [vmem:[#allocation22_spill] sm:$0xff] }
 0x9c7   : > { %v4772_v2 = vsel %vm8452_vm10, %v4721_v16, %v4321_v57  ;;  %v4306_v63 = vmul.f32 %v6182_v52, %v9971_v4  ;;  %v3870_v1 = vsel %vm3856_vm11, %v9972_v31, 0.0 }
 0x9c8   : > { %v6184_v19 = vpop.eup %6183  ;;  %v4805_v38 = vsel %vm4792_vm12, %v8585_v7, %v4772_v2  ;;  %v4695_v51 = vpop.xlane.xlu1 %4694  ;;  %v4337_v7 = vsel %vm8427_vm6, %v4302_v14, %v3885_v62  ;;  %v4322_v61 = vsel %vm8427_vm6, %v4272_v34, %v3870_v1 }
 0x9c9   : > { %4837 = vst.msk [vmem:[%s9932_s24 + $0x60] sm:$0xff] %vm3924_vm8, %v4805_v38  ;;  %v4753_v46 = vmul.f32 %v6184_v19, %v9230_v40  ;;  %6195 = vrcp.f32 %v4695_v51  ;;  %v6186_v10 = vpop.eup %6185 }
 0x9ca   : > { %v4304_v58 = vmul.f32 %v6186_v10, %v9975_v33 }
 0x9cb   : > { %v6188_v5 = vpop.eup %6187  ;;  %v4788_v18 = vsel %vm8452_vm10, %v4753_v46, %v4337_v7 }
 0x9cc   : > { %v6190_v36 = vpop.eup %6189  ;;  %v4821_v40 = vsel %vm4792_vm12, %v8596_v35, %v4788_v18  ;;  %v4723_v32 = vmul.f32 %v6188_v5, %v9973_v15  ;;  %v4339_v35 = vsel %vm8427_vm6, %v4306_v63, %v3887_v59  ;;  %v4338_v29 = vsel %vm8427_vm6, %v4304_v58, %v3886_v53 }
 0x9cd   : > { %4853 = vst.msk [vmem:[%s9932_s24 + $0xe0] sm:$0xff] %vm3924_vm8, %v4821_v40  ;;  %v4757_v20 = vmul.f32 %v6190_v36, %v9976_v50  ;;  %v6192_v3 = vpop.eup %6191 }
 0x9ce   : > { %v4773_v43 = vsel %vm8452_vm10, %v4723_v32, %v4322_v61  ;;  %v4308_v42 = vmul.f32 %v6192_v3, %v9979_v23 }
 0x9cf   : > { %v6194_v21 = vpop.eup %6193  ;;  %v4806_v30 = vsel %vm4792_vm12, %v9972_v31, %v4773_v43  ;;  %v4790_v17 = vsel %vm8452_vm10, %v4757_v20, %v4339_v35 }
 0x9d0   : > { %4838 = vst.msk [vmem:[%s9932_s24 + $0x68] sm:$0xff] %vm3924_vm8, %v4806_v30  ;;  %v4823_v11 = vsel %vm4792_vm12, %v9974_v13, %v4790_v17  ;;  %v4755_v55 = vmul.f32 %v6194_v21, %v9978_v45  ;;  %v4340_v44 = vsel %vm8427_vm6, %v4308_v42, %v3888_v6 }
 0x9d1   : > { %4855 = vst.msk [vmem:[%s9932_s24 + $0xf0] sm:$0xff] %vm3924_vm8, %v4823_v11 }
 0x9d2   : > { %v4789_v49 = vsel %vm8452_vm10, %v4755_v55, %v4338_v29 }
 0x9d3   : > { %v6196_v27 = vpop.eup %6195  ;;  %v4822_v26 = vsel %vm4792_vm12, %v9977_v37, %v4789_v49 }
 0x9d4   : > { %4854 = vst.msk [vmem:[%s9932_s24 + $0xe8] sm:$0xff] %vm3924_vm8, %v4822_v26  ;;  %v4759_v28 = vmul.f32 %v6196_v27, %v9981_v0 }
 0x9d6   : > { %v4791_v48 = vsel %vm8452_vm10, %v4759_v28, %v4340_v44 }
 0x9d7   : > { %v4824_v24 = vsel %vm4792_vm12, %v9980_v60, %v4791_v48 }
 0x9d8   : > { %4856 = vst.msk [vmem:[%s9932_s24 + $0xf8] sm:$0xff] %vm3924_vm8, %v4824_v24 }
 0x9d9 PF: > { %s9982_s16 = sld [smem:[#allocation4_spill]]  ;;  %s9983_s29 = sld [smem:[#allocation3_spill]] }
 0x9da   : > { %s9984_s30 = sld [smem:[#allocation5_spill]] }
 0x9df   : > { %s24_s15 = sadd.s32 1, %s9982_s16  }
 0x9e0   : > { %p21_p7 = scmp.ge.s32.totalorder %s24_s15, 4  }
 0x9e2   :  { %23 = sbr.rel (!%p21_p7) target bundleno = 2 (0x2), region = 129 }

</bundles_post_ra>
